<compile_context>
chip_gen: v7x
topology: tpu7x:2x2x1
jax: 0.10.0
libtpu: 0.0.40
codegen_flags: <defaults>
</compile_context>

<pallas_src>
import functools

import jax
import jax.numpy as jnp
from jax.experimental import pallas as pl
from jax.experimental.pallas import tpu as pltpu


_LANES = 128

_LPIPS_SHIFT = jnp.array([-0.030, -0.088, -0.188], jnp.float32)
_LPIPS_SCALE = jnp.array([0.458, 0.448, 0.450], jnp.float32)


def _round_up(x, m):
    return ((x + m - 1) // m) * m


def _cdiv(a, b):
    return (a + b - 1) // b


def _vmem_limit_bytes():
    # Per-generation scoped-VMEM budget: ~96 MiB on 128 MiB parts (v5e/v6e),
    # ~38 MiB on v7x's 64 MiB.
    try:
        cap = pltpu.get_tpu_info().vmem_capacity_bytes
    except Exception:
        cap = 64 * 1024 * 1024          # conservative (v7x-sized) fallback
    if cap >= 128 * 1024 * 1024:
        return 96 * 1024 * 1024
    return int(cap * 3 // 5)


_VMEM_LIMIT = _vmem_limit_bytes()
_MAX_TILE_ROWS = 2048 if _VMEM_LIMIT >= 64 * 1024 * 1024 else 1024


def _balanced_tile(n, max_tile, align=8):
    # Tile ~<= max_tile, multiple of `align`, padding bounded by one alignment
    # group per chunk (fixes the old tm=min(1024, ...) / round_up(M, tm) blow-up).
    n = max(int(n), 1)
    chunks = _cdiv(n, max_tile)
    tile = _round_up(_cdiv(n, chunks), align)
    return tile, chunks, tile * chunks


# ----------------------------------------------------------------------------
# Pallas kernels
# ----------------------------------------------------------------------------
def _mse_partial_kernel(p_ref, t_ref, o_ref):
    # p, t: (TR, 128) tiles; o: (1, 128) per-chunk partial sum of squared diff.
    d = p_ref[...].astype(jnp.float32) - t_ref[...].astype(jnp.float32)
    o_ref[...] = jnp.sum(d * d, axis=0, keepdims=True)


def _matmul_bias_relu_kernel(a_ref, w_ref, b_ref, o_ref):
    # a: (TM, K), w: (K, N), b: (1, N) -> o: (TM, N) = relu(a @ w + b)
    acc = jnp.dot(a_ref[...], w_ref[...], preferred_element_type=jnp.float32)
    acc = acc + b_ref[...]
    o_ref[...] = jnp.maximum(acc, 0.0).astype(o_ref.dtype)


def _lpips_layer_kernel(f_ref, o_ref, *, nb):
    # f: (2*nb, TP, C) feature tile -- rows [0:nb] = pred, [nb:2nb] = target.
    # o: (1, nb, C) per-chunk, per-channel partial sums of the squared
    #    unit-normalized feature difference (lin weights applied in glue).
    f1 = f_ref[0:nb].astype(jnp.float32)
    f2 = f_ref[nb:2 * nb].astype(jnp.float32)
    inv1 = jax.lax.rsqrt(jnp.sum(f1 * f1, axis=-1, keepdims=True) + 1e-20)
    inv2 = jax.lax.rsqrt(jnp.sum(f2 * f2, axis=-1, keepdims=True) + 1e-20)
    d = f1 * inv1 - f2 * inv2               # zero-padded pixels/channels stay 0
    o_ref[...] = jnp.sum(d * d, axis=1)[None]


# ----------------------------------------------------------------------------
# Wrappers calling pallas_call
# ----------------------------------------------------------------------------
def mse_loss(pred, tgt):
    n = pred.size
    flat_p = pred.reshape(-1)
    flat_t = tgt.reshape(-1)
    rows = _cdiv(n, _LANES)
    tr, n_chunks, rows_pad = _balanced_tile(rows, _MAX_TILE_ROWS)
    n_pad = rows_pad * _LANES
    if n_pad != n:
        flat_p = jnp.pad(flat_p, (0, n_pad - n))
        flat_t = jnp.pad(flat_t, (0, n_pad - n))
    p2 = flat_p.reshape(rows_pad, _LANES)
    t2 = flat_t.reshape(rows_pad, _LANES)

    partials = pl.pallas_call(
        _mse_partial_kernel,
        out_shape=jax.ShapeDtypeStruct((1, n_chunks * _LANES), jnp.float32),
        grid=(n_chunks,),
        in_specs=[pl.BlockSpec((tr, _LANES), lambda i: (i, 0)),
                  pl.BlockSpec((tr, _LANES), lambda i: (i, 0))],
        out_specs=pl.BlockSpec((1, _LANES), lambda i: (0, i)),
        compiler_params=pltpu.CompilerParams(
            dimension_semantics=("parallel",),
            vmem_limit_bytes=_VMEM_LIMIT),
    )(p2, t2)
    return jnp.sum(partials) / jnp.float32(n)


def _im2col_nchw(x_nchw):
    # Layer-1 patches gathered straight from NCHW input (the NCHW->NHWC
    # transpose is folded into the gather; each column is a pure slice).
    # Column order: channel-major, tap-minor -- matches init_lpips_params w1.
    B, C, H, W = x_nchw.shape
    Ho, Wo = H - 2, W - 2
    cols = [x_nchw[:, c, di:di + Ho, dj:dj + Wo]
            for c in range(C) for di in range(3) for dj in range(3)]
    patches = jnp.stack(cols, axis=-1)                      # (B, Ho, Wo, 9*C)
    return patches.reshape(B * Ho * Wo, 9 * C), (B, Ho, Wo)


def _im2col_nhwc(x_nhwc, c_real):
    # Layer-2 patches: only the c_real real channels enter the contraction
    # (K de-pad: 9*c_real instead of 9*128).  Tap-major, channel-minor columns.
    # TODO(synk): replace with an in-kernel halo row-strip DMA conv to remove
    # the 9x HBM read amplification for large images.
    B, H, W, _ = x_nhwc.shape
    Ho, Wo = H - 2, W - 2
    cols = [x_nhwc[:, di:di + Ho, dj:dj + Wo, :c_real]
            for di in range(3) for dj in range(3)]
    patches = jnp.concatenate(cols, axis=-1)                # (B, Ho, Wo, 9*c_real)
    return patches.reshape(B * Ho * Wo, 9 * c_real), (B, Ho, Wo)


def _conv_matmul_relu(a, w, b):
    # a: (M, K) patch matrix; w: (K, N=128); b: (1, N). Returns (M, N) f32.
    M, K = a.shape
    N = w.shape[1]
    tm, n_chunks, m_pad = _balanced_tile(M, _MAX_TILE_ROWS)
    if m_pad != M:
        a = jnp.pad(a, ((0, m_pad - M), (0, 0)))

    cost = pl.CostEstimate(
        flops=2 * m_pad * K * N,
        transcendentals=0,
        bytes_accessed=4 * (m_pad * K + K * N + N + m_pad * N))
    out = pl.pallas_call(
        _matmul_bias_relu_kernel,
        out_shape=jax.ShapeDtypeStruct((m_pad, N), jnp.float32),
        grid=(n_chunks,),
        in_specs=[pl.BlockSpec((tm, K), lambda i: (i, 0)),
                  pl.BlockSpec((K, N), lambda i: (0, 0)),
                  pl.BlockSpec((1, N), lambda i: (0, 0))],
        out_specs=pl.BlockSpec((tm, N), lambda i: (i, 0)),
        compiler_params=pltpu.CompilerParams(
            dimension_semantics=("parallel",),
            vmem_limit_bytes=_VMEM_LIMIT),
        cost_estimate=cost,
    )(a, w, b)
    return out[:M]


def lpips_layer_distance(feats, lin_w, nb):
    # feats: (2*nb, Ho, Wo, C) with rows [0:nb]=pred, [nb:]=tgt features.
    twoB, Ho, Wo, C = feats.shape
    P = Ho * Wo
    fr = feats.reshape(twoB, P, C)

    # Spatial tile sized so the double-buffered input block stays well under
    # the per-generation VMEM budget regardless of batch size.
    tp_cap = max(8, min(_MAX_TILE_ROWS,
                        (_VMEM_LIMIT // 4) // (2 * twoB * C * 4) // 8 * 8))
    tp, n_chunks, p_pad = _balanced_tile(P, tp_cap)
    if p_pad != P:
        fr = jnp.pad(fr, ((0, 0), (0, p_pad - P), (0, 0)))   # zero pixels inert

    kernel = functools.partial(_lpips_layer_kernel, nb=nb)
    partials = pl.pallas_call(
        kernel,
        out_shape=jax.ShapeDtypeStruct((n_chunks, nb, C), jnp.float32),
        grid=(n_chunks,),
        in_specs=[pl.BlockSpec((twoB, tp, C), lambda p: (0, p, 0))],
        out_specs=pl.BlockSpec((1, nb, C), lambda p: (p, 0, 0)),
        compiler_params=pltpu.CompilerParams(
            dimension_semantics=("parallel",),
            vmem_limit_bytes=_VMEM_LIMIT),
    )(fr)
    chan_sums = jnp.sum(partials, axis=0)                    # (nb, C)
    return jnp.sum(chan_sums * lin_w, axis=-1) / jnp.float32(P)   # (nb,)


# ----------------------------------------------------------------------------
# Synthetic LPIPS params: ScalingLayer folded into layer-1 conv; output
# channels zero-padded to 128 lanes (inert); contraction dims NOT padded.
# ----------------------------------------------------------------------------
def init_lpips_params(seed=42, c1=16, c2=32, c_pad=_LANES):
    k1, k2, k3, k4 = jax.random.split(jax.random.PRNGKey(seed), 4)
    # Layer 1: rows are channel-major, tap-minor (matches _im2col_nchw).
    w1 = 0.10 * jax.random.normal(k1, (3 * 9, c1), jnp.float32)
    b1 = jnp.zeros((c1,), jnp.float32)
    # Layer 2: rows are tap-major, channel-minor (matches _im2col_nhwc).
    w2 = 0.05 * jax.random.normal(k2, (9 * c1, c2), jnp.float32)
    b2 = jnp.zeros((c2,), jnp.float32)
    lin1 = 0.1 * jnp.abs(jax.random.normal(k3, (c1,), jnp.float32))
    lin2 = 0.1 * jnp.abs(jax.random.normal(k4, (c2,), jnp.float32))

    # Fold the LPIPS ScalingLayer (x - shift) / scale into layer-1 weights/bias.
    scale_rows = jnp.repeat(_LPIPS_SCALE, 9)[:, None]        # (27, 1) channel-major
    shift_rows = jnp.repeat(_LPIPS_SHIFT, 9)[:, None]
    w1f = w1 / scale_rows
    b1f = b1 - jnp.sum(w1 * (shift_rows / scale_rows), axis=0)

    w1p = jnp.zeros((27, c_pad), jnp.float32).at[:, :c1].set(w1f)
    b1p = jnp.zeros((1, c_pad), jnp.float32).at[0, :c1].set(b1f)
    w2p = jnp.zeros((9 * c1, c_pad), jnp.float32).at[:, :c2].set(w2)
    b2p = jnp.zeros((1, c_pad), jnp.float32).at[0, :c2].set(b2)
    lin1p = jnp.zeros((1, c_pad), jnp.float32).at[0, :c1].set(lin1)
    lin2p = jnp.zeros((1, c_pad), jnp.float32).at[0, :c2].set(lin2)
    return {"w1": w1p, "b1": b1p, "w2": w2p, "b2": b2p,
            "lin1": lin1p, "lin2": lin2p}


def lpips_features(x_nchw, params):
    # Layer 1 (ScalingLayer folded in); patches come straight from NCHW input.
    a1, (B, H1, W1) = _im2col_nchw(x_nchw)
    f1 = _conv_matmul_relu(a1, params["w1"], params["b1"]).reshape(B, H1, W1, -1)
    # Layer 2: contract only over the real c1 channels of f1 (K de-pad).
    c1 = params["w2"].shape[0] // 9
    a2, (B, H2, W2) = _im2col_nhwc(f1, c1)
    f2 = _conv_matmul_relu(a2, params["w2"], params["b2"]).reshape(B, H2, W2, -1)
    return [f1, f2]


def lpips_distance(pred_nchw, tgt_nchw, params):
    nb = pred_nchw.shape[0]
    # pred and tgt go through the feature stack in ONE batched pass.
    x = jnp.concatenate([pred_nchw, tgt_nchw], axis=0)       # (2B, 3, H, W)
    feats = lpips_features(x, params)
    d = None
    for f, lin in zip(feats, (params["lin1"], params["lin2"])):
        layer_d = lpips_layer_distance(f, lin, nb)
        d = layer_d if d is None else d + layer_d
    return d                                                 # (B,) per-sample LPIPS


# ----------------------------------------------------------------------------
# ReconstructionLoss.forward equivalent
# ----------------------------------------------------------------------------
@functools.partial(jax.jit, static_argnames=("lambda_value",))
def reconstruction_loss(pred_nchw, tgt_nchw, params, lambda_value=2.0):
    mse = mse_loss(pred_nchw, tgt_nchw)                      # scalar, raw NCHW
    lp = lpips_distance(pred_nchw, tgt_nchw, params)         # (B,)
    combined = mse + lambda_value * lp                       # broadcast, like torch
    return jnp.mean(combined)


if __name__ == "__main__":
    B, C, H, W = 2, 3, 16, 16
    kp, kt = jax.random.split(jax.random.PRNGKey(0))
    predicted_images = jax.random.uniform(kp, (B, C, H, W), jnp.float32, -1.0, 1.0)
    target_images = jax.random.uniform(kt, (B, C, H, W), jnp.float32, -1.0, 1.0)

    params = init_lpips_params(seed=42)
    loss = reconstruction_loss(predicted_images, target_images, params,
                               lambda_value=2.0)
    loss = jax.block_until_ready(loss)
    assert loss.shape == () and bool(jnp.isfinite(loss))
    print("KERNEL_OK")
</pallas_src>

<mosaic_0001>
module attributes {stable_mosaic.version = 11 : i64} {
  func.func @_mse_partial_kernel(%arg0: i32, %arg1: memref<16x128xf32, #tpu.memory_space<vmem>>, %arg2: memref<16x128xf32, #tpu.memory_space<vmem>>, %arg3: memref<1x128xf32, #tpu.memory_space<vmem>>) attributes {dimension_semantics = [#tpu.dimension_semantics<parallel>], iteration_bounds = array<i64: 1>, scalar_prefetch = 0 : i64, scratch_operands = 0 : i64, tpu.core_type = #tpu.core_type<tc>, window_params = [{transform_indices = @transform_0, window_bounds = array<i64: 16, 128>}, {transform_indices = @transform_1, window_bounds = array<i64: 16, 128>}, {transform_indices = @transform_2, window_bounds = array<i64: 1, 128>}]} {
    %c0 = arith.constant 0 : index
    %c0_0 = arith.constant 0 : index
    %0 = vector.load %arg1[%c0, %c0_0] : memref<16x128xf32, #tpu.memory_space<vmem>>, vector<16x128xf32>
    %c0_1 = arith.constant 0 : index
    %c0_2 = arith.constant 0 : index
    %1 = vector.load %arg2[%c0_1, %c0_2] : memref<16x128xf32, #tpu.memory_space<vmem>>, vector<16x128xf32>
    %2 = arith.subf %0, %1 : vector<16x128xf32>
    %3 = arith.mulf %2, %2 : vector<16x128xf32>
    %cst = arith.constant dense<0.000000e+00> : vector<128xf32>
    %4 = vector.multi_reduction <add>, %3, %cst [0] : vector<16x128xf32> to vector<128xf32>
    %5 = vector.shape_cast %4 : vector<128xf32> to vector<1x128xf32>
    %c0_3 = arith.constant 0 : index
    %c0_4 = arith.constant 0 : index
    %6 = vector.load %arg3[%c0_3, %c0_4] : memref<1x128xf32, #tpu.memory_space<vmem>>, vector<1x128xf32>
    tpu.vector_store %arg3[%c0_3, %c0_4], %5 {strides = array<i32>} : memref<1x128xf32, #tpu.memory_space<vmem>>, vector<1x128xf32>,
    return
  }
  func.func @transform_0(%arg0: i32) -> (i32, i32) {
    %c0_i32 = arith.constant 0 : i32
    %c0_i32_0 = arith.constant 0 : i32
    return %arg0, %c0_i32 : i32, i32
  }
  func.func @transform_1(%arg0: i32) -> (i32, i32) {
    %c0_i32 = arith.constant 0 : i32
    %c0_i32_0 = arith.constant 0 : i32
    return %arg0, %c0_i32 : i32, i32
  }
  func.func @transform_2(%arg0: i32) -> (i32, i32) {
    %c0_i32 = arith.constant 0 : i32
    %c0_i32_0 = arith.constant 0 : i32
    return %c0_i32, %arg0 : i32, i32
  }
}

module attributes {stable_mosaic.version = 11 : i64} {
  func.func @_matmul_bias_relu_kernel(%arg0: i32, %arg1: memref<784x27xf32, #tpu.memory_space<vmem>>, %arg2: memref<27x128xf32, #tpu.memory_space<vmem>>, %arg3: memref<1x128xf32, #tpu.memory_space<vmem>>, %arg4: memref<784x128xf32, #tpu.memory_space<vmem>>) attributes {dimension_semantics = [#tpu.dimension_semantics<parallel>], iteration_bounds = array<i64: 1>, scalar_prefetch = 0 : i64, scratch_operands = 0 : i64, tpu.core_type = #tpu.core_type<tc>, window_params = [{transform_indices = @transform_0, window_bounds = array<i64: 784, 27>}, {pipeline_mode = #tpu.pipeline_mode<synchronous>, transform_indices = @transform_1, window_bounds = array<i64: 27, 128>}, {pipeline_mode = #tpu.pipeline_mode<synchronous>, transform_indices = @transform_2, window_bounds = array<i64: 1, 128>}, {transform_indices = @transform_3, window_bounds = array<i64: 784, 128>}]} {
    %c0 = arith.constant 0 : index
    %c0_0 = arith.constant 0 : index
    %0 = vector.load %arg1[%c0, %c0_0] : memref<784x27xf32, #tpu.memory_space<vmem>>, vector<784x27xf32>
    %c0_1 = arith.constant 0 : index
    %c0_2 = arith.constant 0 : index
    %1 = vector.load %arg2[%c0_1, %c0_2] : memref<27x128xf32, #tpu.memory_space<vmem>>, vector<27x128xf32>
    %cst = arith.constant dense<0.000000e+00> : vector<784x128xf32>
    %2 = tpu.matmul %0, %1, %cst {dimension_numbers = #tpu.dot_dimension_numbers<[1], [0], [0], [1], [0, 0, 1, 1], [], []>} : vector<784x27xf32>, vector<27x128xf32>, vector<784x128xf32> -> vector<784x128xf32>
    %c0_3 = arith.constant 0 : index
    %c0_4 = arith.constant 0 : index
    %3 = vector.load %arg3[%c0_3, %c0_4] : memref<1x128xf32, #tpu.memory_space<vmem>>, vector<1x128xf32>
    %4 = vector.broadcast %3 : vector<1x128xf32> to vector<784x128xf32>
    %5 = arith.addf %2, %4 : vector<784x128xf32>
    %cst_5 = arith.constant 0.000000e+00 : f32
    %6 = vector.broadcast %cst_5 : f32 to vector<784x128xf32>
    %7 = arith.maximumf %5, %6 : vector<784x128xf32>
    %c0_6 = arith.constant 0 : index
    %c0_7 = arith.constant 0 : index
    %8 = vector.load %arg4[%c0_6, %c0_7] : memref<784x128xf32, #tpu.memory_space<vmem>>, vector<784x128xf32>
    tpu.vector_store %arg4[%c0_6, %c0_7], %7 {strides = array<i32>} : memref<784x128xf32, #tpu.memory_space<vmem>>, vector<784x128xf32>,
    return
  }
  func.func @transform_0(%arg0: i32) -> (i32, i32) {
    %c0_i32 = arith.constant 0 : i32
    %c0_i32_0 = arith.constant 0 : i32
    return %arg0, %c0_i32 : i32, i32
  }
  func.func @transform_1(%arg0: i32) -> (i32, i32) {
    %c0_i32 = arith.constant 0 : i32
    %c0_i32_0 = arith.constant 0 : i32
    %c0_i32_1 = arith.constant 0 : i32
    return %c0_i32, %c0_i32_0 : i32, i32
  }
  func.func @transform_2(%arg0: i32) -> (i32, i32) {
    %c0_i32 = arith.constant 0 : i32
    %c0_i32_0 = arith.constant 0 : i32
    %c0_i32_1 = arith.constant 0 : i32
    return %c0_i32, %c0_i32_0 : i32, i32
  }
  func.func @transform_3(%arg0: i32) -> (i32, i32) {
    %c0_i32 = arith.constant 0 : i32
    %c0_i32_0 = arith.constant 0 : i32
    return %arg0, %c0_i32 : i32, i32
  }
}

module attributes {stable_mosaic.version = 11 : i64} {
  func.func @_lpips_layer_kernel(%arg0: i32, %arg1: memref<4x200x128xf32, #tpu.memory_space<vmem>>, %arg2: memref<1x2x128xf32, #tpu.memory_space<vmem>>) attributes {dimension_semantics = [#tpu.dimension_semantics<parallel>], iteration_bounds = array<i64: 1>, scalar_prefetch = 0 : i64, scratch_operands = 0 : i64, tpu.core_type = #tpu.core_type<tc>, window_params = [{transform_indices = @transform_0, window_bounds = array<i64: 4, 200, 128>}, {transform_indices = @transform_1, window_bounds = array<i64: 1, 2, 128>}]} {
    %c0 = arith.constant 0 : index
    %c0_0 = arith.constant 0 : index
    %c0_1 = arith.constant 0 : index
    %0 = vector.load %arg1[%c0, %c0_0, %c0_1] : memref<4x200x128xf32, #tpu.memory_space<vmem>>, vector<2x200x128xf32>
    %c2 = arith.constant 2 : index
    %c0_2 = arith.constant 0 : index
    %c0_3 = arith.constant 0 : index
    %1 = vector.load %arg1[%c2, %c0_2, %c0_3] : memref<4x200x128xf32, #tpu.memory_space<vmem>>, vector<2x200x128xf32>
    %2 = arith.mulf %0, %0 : vector<2x200x128xf32>
    %cst = arith.constant dense<0.000000e+00> : vector<2x200xf32>
    %3 = vector.multi_reduction <add>, %2, %cst [2] : vector<2x200x128xf32> to vector<2x200xf32>
    %4 = vector.shape_cast %3 : vector<2x200xf32> to vector<2x200x1xf32>
    %cst_4 = arith.constant 9.99999968E-21 : f32
    %5 = vector.broadcast %cst_4 : f32 to vector<2x200x1xf32>
    %6 = arith.addf %4, %5 : vector<2x200x1xf32>
    %7 = math.rsqrt %6 : vector<2x200x1xf32>
    %8 = arith.mulf %1, %1 : vector<2x200x128xf32>
    %cst_5 = arith.constant dense<0.000000e+00> : vector<2x200xf32>
    %9 = vector.multi_reduction <add>, %8, %cst_5 [2] : vector<2x200x128xf32> to vector<2x200xf32>
    %10 = vector.shape_cast %9 : vector<2x200xf32> to vector<2x200x1xf32>
    %cst_6 = arith.constant 9.99999968E-21 : f32
    %11 = vector.broadcast %cst_6 : f32 to vector<2x200x1xf32>
    %12 = arith.addf %10, %11 : vector<2x200x1xf32>
    %13 = math.rsqrt %12 : vector<2x200x1xf32>
    %14 = vector.broadcast %7 : vector<2x200x1xf32> to vector<2x200x128xf32>
    %15 = arith.mulf %0, %14 : vector<2x200x128xf32>
    %16 = vector.broadcast %13 : vector<2x200x1xf32> to vector<2x200x128xf32>
    %17 = arith.mulf %1, %16 : vector<2x200x128xf32>
    %18 = arith.subf %15, %17 : vector<2x200x128xf32>
    %19 = arith.mulf %18, %18 : vector<2x200x128xf32>
    %cst_7 = arith.constant dense<0.000000e+00> : vector<2x128xf32>
    %20 = vector.multi_reduction <add>, %19, %cst_7 [1] : vector<2x200x128xf32> to vector<2x128xf32>
    %21 = vector.shape_cast %20 : vector<2x128xf32> to vector<1x2x128xf32>
    %c0_8 = arith.constant 0 : index
    %c0_9 = arith.constant 0 : index
    %c0_10 = arith.constant 0 : index
    %22 = vector.load %arg2[%c0_8, %c0_9, %c0_10] : memref<1x2x128xf32, #tpu.memory_space<vmem>>, vector<1x2x128xf32>
    tpu.vector_store %arg2[%c0_8, %c0_9, %c0_10], %21 {strides = array<i32>} : memref<1x2x128xf32, #tpu.memory_space<vmem>>, vector<1x2x128xf32>,
    return
  }
  func.func @transform_0(%arg0: i32) -> (i32, i32, i32) {
    %c0_i32 = arith.constant 0 : i32
    %c0_i32_0 = arith.constant 0 : i32
    %c0_i32_1 = arith.constant 0 : i32
    return %c0_i32, %arg0, %c0_i32_0 : i32, i32, i32
  }
  func.func @transform_1(%arg0: i32) -> (i32, i32, i32) {
    %c0_i32 = arith.constant 0 : i32
    %c0_i32_0 = arith.constant 0 : i32
    %c0_i32_1 = arith.constant 0 : i32
    return %arg0, %c0_i32, %c0_i32_0 : i32, i32, i32
  }
}

module attributes {stable_mosaic.version = 11 : i64} {
  func.func @_matmul_bias_relu_kernel(%arg0: i32, %arg1: memref<576x144xf32, #tpu.memory_space<vmem>>, %arg2: memref<144x128xf32, #tpu.memory_space<vmem>>, %arg3: memref<1x128xf32, #tpu.memory_space<vmem>>, %arg4: memref<576x128xf32, #tpu.memory_space<vmem>>) attributes {dimension_semantics = [#tpu.dimension_semantics<parallel>], iteration_bounds = array<i64: 1>, scalar_prefetch = 0 : i64, scratch_operands = 0 : i64, tpu.core_type = #tpu.core_type<tc>, window_params = [{transform_indices = @transform_0, window_bounds = array<i64: 576, 144>}, {pipeline_mode = #tpu.pipeline_mode<synchronous>, transform_indices = @transform_1, window_bounds = array<i64: 144, 128>}, {pipeline_mode = #tpu.pipeline_mode<synchronous>, transform_indices = @transform_2, window_bounds = array<i64: 1, 128>}, {transform_indices = @transform_3, window_bounds = array<i64: 576, 128>}]} {
    %c0 = arith.constant 0 : index
    %c0_0 = arith.constant 0 : index
    %0 = vector.load %arg1[%c0, %c0_0] : memref<576x144xf32, #tpu.memory_space<vmem>>, vector<576x144xf32>
    %c0_1 = arith.constant 0 : index
    %c0_2 = arith.constant 0 : index
    %1 = vector.load %arg2[%c0_1, %c0_2] : memref<144x128xf32, #tpu.memory_space<vmem>>, vector<144x128xf32>
    %cst = arith.constant dense<0.000000e+00> : vector<576x128xf32>
    %2 = tpu.matmul %0, %1, %cst {dimension_numbers = #tpu.dot_dimension_numbers<[1], [0], [0], [1], [0, 0, 1, 1], [], []>} : vector<576x144xf32>, vector<144x128xf32>, vector<576x128xf32> -> vector<576x128xf32>
    %c0_3 = arith.constant 0 : index
    %c0_4 = arith.constant 0 : index
    %3 = vector.load %arg3[%c0_3, %c0_4] : memref<1x128xf32, #tpu.memory_space<vmem>>, vector<1x128xf32>
    %4 = vector.broadcast %3 : vector<1x128xf32> to vector<576x128xf32>
    %5 = arith.addf %2, %4 : vector<576x128xf32>
    %cst_5 = arith.constant 0.000000e+00 : f32
    %6 = vector.broadcast %cst_5 : f32 to vector<576x128xf32>
    %7 = arith.maximumf %5, %6 : vector<576x128xf32>
    %c0_6 = arith.constant 0 : index
    %c0_7 = arith.constant 0 : index
    %8 = vector.load %arg4[%c0_6, %c0_7] : memref<576x128xf32, #tpu.memory_space<vmem>>, vector<576x128xf32>
    tpu.vector_store %arg4[%c0_6, %c0_7], %7 {strides = array<i32>} : memref<576x128xf32, #tpu.memory_space<vmem>>, vector<576x128xf32>,
    return
  }
  func.func @transform_0(%arg0: i32) -> (i32, i32) {
    %c0_i32 = arith.constant 0 : i32
    %c0_i32_0 = arith.constant 0 : i32
    return %arg0, %c0_i32 : i32, i32
  }
  func.func @transform_1(%arg0: i32) -> (i32, i32) {
    %c0_i32 = arith.constant 0 : i32
    %c0_i32_0 = arith.constant 0 : i32
    %c0_i32_1 = arith.constant 0 : i32
    return %c0_i32, %c0_i32_0 : i32, i32
  }
  func.func @transform_2(%arg0: i32) -> (i32, i32) {
    %c0_i32 = arith.constant 0 : i32
    %c0_i32_0 = arith.constant 0 : i32
    %c0_i32_1 = arith.constant 0 : i32
    return %c0_i32, %c0_i32_0 : i32, i32
  }
  func.func @transform_3(%arg0: i32) -> (i32, i32) {
    %c0_i32 = arith.constant 0 : i32
    %c0_i32_0 = arith.constant 0 : i32
    return %arg0, %c0_i32 : i32, i32
  }
}

module attributes {stable_mosaic.version = 11 : i64} {
  func.func @_lpips_layer_kernel(%arg0: i32, %arg1: memref<4x144x128xf32, #tpu.memory_space<vmem>>, %arg2: memref<1x2x128xf32, #tpu.memory_space<vmem>>) attributes {dimension_semantics = [#tpu.dimension_semantics<parallel>], iteration_bounds = array<i64: 1>, scalar_prefetch = 0 : i64, scratch_operands = 0 : i64, tpu.core_type = #tpu.core_type<tc>, window_params = [{transform_indices = @transform_0, window_bounds = array<i64: 4, 144, 128>}, {transform_indices = @transform_1, window_bounds = array<i64: 1, 2, 128>}]} {
    %c0 = arith.constant 0 : index
    %c0_0 = arith.constant 0 : index
    %c0_1 = arith.constant 0 : index
    %0 = vector.load %arg1[%c0, %c0_0, %c0_1] : memref<4x144x128xf32, #tpu.memory_space<vmem>>, vector<2x144x128xf32>
    %c2 = arith.constant 2 : index
    %c0_2 = arith.constant 0 : index
    %c0_3 = arith.constant 0 : index
    %1 = vector.load %arg1[%c2, %c0_2, %c0_3] : memref<4x144x128xf32, #tpu.memory_space<vmem>>, vector<2x144x128xf32>
    %2 = arith.mulf %0, %0 : vector<2x144x128xf32>
    %cst = arith.constant dense<0.000000e+00> : vector<2x144xf32>
    %3 = vector.multi_reduction <add>, %2, %cst [2] : vector<2x144x128xf32> to vector<2x144xf32>
    %4 = vector.shape_cast %3 : vector<2x144xf32> to vector<2x144x1xf32>
    %cst_4 = arith.constant 9.99999968E-21 : f32
    %5 = vector.broadcast %cst_4 : f32 to vector<2x144x1xf32>
    %6 = arith.addf %4, %5 : vector<2x144x1xf32>
    %7 = math.rsqrt %6 : vector<2x144x1xf32>
    %8 = arith.mulf %1, %1 : vector<2x144x128xf32>
    %cst_5 = arith.constant dense<0.000000e+00> : vector<2x144xf32>
    %9 = vector.multi_reduction <add>, %8, %cst_5 [2] : vector<2x144x128xf32> to vector<2x144xf32>
    %10 = vector.shape_cast %9 : vector<2x144xf32> to vector<2x144x1xf32>
    %cst_6 = arith.constant 9.99999968E-21 : f32
    %11 = vector.broadcast %cst_6 : f32 to vector<2x144x1xf32>
    %12 = arith.addf %10, %11 : vector<2x144x1xf32>
    %13 = math.rsqrt %12 : vector<2x144x1xf32>
    %14 = vector.broadcast %7 : vector<2x144x1xf32> to vector<2x144x128xf32>
    %15 = arith.mulf %0, %14 : vector<2x144x128xf32>
    %16 = vector.broadcast %13 : vector<2x144x1xf32> to vector<2x144x128xf32>
    %17 = arith.mulf %1, %16 : vector<2x144x128xf32>
    %18 = arith.subf %15, %17 : vector<2x144x128xf32>
    %19 = arith.mulf %18, %18 : vector<2x144x128xf32>
    %cst_7 = arith.constant dense<0.000000e+00> : vector<2x128xf32>
    %20 = vector.multi_reduction <add>, %19, %cst_7 [1] : vector<2x144x128xf32> to vector<2x128xf32>
    %21 = vector.shape_cast %20 : vector<2x128xf32> to vector<1x2x128xf32>
    %c0_8 = arith.constant 0 : index
    %c0_9 = arith.constant 0 : index
    %c0_10 = arith.constant 0 : index
    %22 = vector.load %arg2[%c0_8, %c0_9, %c0_10] : memref<1x2x128xf32, #tpu.memory_space<vmem>>, vector<1x2x128xf32>
    tpu.vector_store %arg2[%c0_8, %c0_9, %c0_10], %21 {strides = array<i32>} : memref<1x2x128xf32, #tpu.memory_space<vmem>>, vector<1x2x128xf32>,
    return
  }
  func.func @transform_0(%arg0: i32) -> (i32, i32, i32) {
    %c0_i32 = arith.constant 0 : i32
    %c0_i32_0 = arith.constant 0 : i32
    %c0_i32_1 = arith.constant 0 : i32
    return %c0_i32, %arg0, %c0_i32_0 : i32, i32, i32
  }
  func.func @transform_1(%arg0: i32) -> (i32, i32, i32) {
    %c0_i32 = arith.constant 0 : i32
    %c0_i32_0 = arith.constant 0 : i32
    %c0_i32_1 = arith.constant 0 : i32
    return %arg0, %c0_i32, %c0_i32_0 : i32, i32, i32
  }
}

</mosaic_0001>

<bundles_post_ra>
// kernel: reconstruction_loss.5
= control target key start
LH: loop header
LB: loop body
LE: loop exit
PB: predicated region body
PF: predicated region fallthrough
CT: control target
= control target key end

     0   :  { %s61_s0 = inlined_call_operand.vmem [shape: f32[16,128], index: 0, kind: input, shape index: {}]   ;;  %s62_s1 = inlined_call_operand.vmem [shape: f32[16,128], index: 1, kind: input, shape index: {}]   ;;  %s63_s2 = inlined_call_operand.vmem [shape: f32[1,128], index: 2, kind: output, shape index: {}]  }
   0x1   :  { %v11_v0 = vld [vmem:[%s61_s0] sm:$0xff]  ;;  %v12_v1 = vld [vmem:[%s61_s0 + $0x8] sm:$0xff] }
   0x2   :  { %v13_v2 = vld [vmem:[%s62_s1] sm:$0xff]  ;;  %v14_v3 = vld [vmem:[%s62_s1 + $0x8] sm:$0xff] }
   0x3   :  { %v15_v4 = vsub.f32 %v11_v0, %v13_v2  ;;  %v16_v5 = vsub.f32 %v12_v1, %v14_v3 }
   0x5   :  { %v17_v6 = vmul.f32 %v15_v4, %v15_v4  ;;  %v18_v7 = vmul.f32 %v16_v5, %v16_v5 }
   0x7   :  { %v19_v8 = vadd.f32 %v18_v7, %v17_v6 }
   0x9   :  { %v20_v9 = vrot.slane %v19_v8, 4 }
   0xb   :  { %v21_v10 = vadd.f32 %v20_v9, %v19_v8 }
   0xd   :  { %v22_v11 = vrot.slane %v21_v10, 2 }
   0xf   :  { %v23_v12 = vadd.f32 %v22_v11, %v21_v10 }
  0x11   :  { %v24_v13 = vrot.slane %v23_v12, 1 }
  0x13   :  { %v25_v14 = vadd.f32 %v24_v13, %v23_v12 }
  0x15   :  { %26 = vst [vmem:[%s63_s2] sm:$0x1] %v25_v14 }

// kernel: reconstruction_loss.6
= control target key start
LH: loop header
LB: loop body
LE: loop exit
PB: predicated region body
PF: predicated region fallthrough
CT: control target
= control target key end

     0   :  { %vm418_vm0 = vcmask 1042432   ;;  %vm123_vm1 = vcmask 220160   ;;  %vm1549_vm2 = vmmov 1   ;;  %s2371_s1 = inlined_call_operand.vmem [shape: f32[27,128], index: 1, kind: input, shape index: {}]   ;;  %s2372_s0 = inlined_call_operand.vmem [shape: f32[784,27], index: 0, kind: input, shape index: {}]   ;;  %s2373_s2 = inlined_call_operand.vmem [shape: f32[1,128], index: 2, kind: input, shape index: {}]   ;;  %s2374_s3 = inlined_call_operand.vmem [shape: f32[784,128], index: 3, kind: output, shape index: {}]  }
   0x1   :  { %v112_v0 = vld [vmem:[%s2371_s1] sm:$0xff]  ;;  %v113_v1 = vld [vmem:[%s2371_s1 + $0x8] sm:$0xff]  ;;  %v114_v2 = vld [vmem:[%s2371_s1 + $0x10] sm:$0xff] }
   0x2   :  { %v1534_v3 = vpack.c.bf16 %v113_v1, %v112_v0  ;;  %v115_v4 = vld [vmem:[%s2371_s1 + $0x18] sm:$0x7]  ;;  %v14_v5 = vld [vmem:[%s2372_s0] sm:$0xff]  ;;  %vm1539_vm3 = vmpackc.low %vm418_vm0, %vm1549_vm2 }
   0x3   :  { %v1538_v6 = vpack.c.bf16 %v115_v4, %v114_v2  ;;  %1387 = vmatprep.mubr.msk.f32.mxu0 %vm123_vm1, %v14_v5  ;;  %v64_v7 = vld [vmem:[%s2372_s0 + $0x190] sm:$0xff]  ;;  %v15_v8 = vld [vmem:[%s2372_s0 + $0x8] sm:$0xff]  ;;  %v65_v9 = vld [vmem:[%s2372_s0 + $0x198] sm:$0xff] }
   0x4   :  { %1535 = vmatprep.subr.bf16.mxu0 %v1534_v3  ;;  %1544 = vmatprep.subr.bf16.mxu1 %v1534_v3  ;;  %v16_v10 = vld [vmem:[%s2372_s0 + $0x10] sm:$0xff]  ;;  %v66_v11 = vld [vmem:[%s2372_s0 + $0x1a0] sm:$0xff]  ;;  %v17_v12 = vld [vmem:[%s2372_s0 + $0x18] sm:$0xff] }
   0x5   :  { %1537 = vmatpush3.bf16.msra.mxu0 %v1534_v3  ;;  %1546 = vmatpush3.bf16.msra.mxu1 %v1534_v3  ;;  %v67_v13 = vld [vmem:[%s2372_s0 + $0x1a8] sm:$0xff]  ;;  %v18_v14 = vld [vmem:[%s2372_s0 + $0x20] sm:$0xff]  ;;  %v68_v15 = vld [vmem:[%s2372_s0 + $0x1b0] sm:$0xff] }
   0x6   :  { %1540 = vmatprep.subr.msk.bf16.mxu0 %vm1539_vm3, %v1538_v6  ;;  %1545 = vmatprep.subr.msk.bf16.mxu1 %vm1539_vm3, %v1538_v6  ;;  %v19_v16 = vld [vmem:[%s2372_s0 + $0x28] sm:$0xff]  ;;  %v69_v17 = vld [vmem:[%s2372_s0 + $0x1b8] sm:$0xff]  ;;  %v20_v18 = vld [vmem:[%s2372_s0 + $0x30] sm:$0xff] }
   0x7   :  { %1462 = vmatprep.mubr.msk.f32.mxu1 %vm123_vm1, %v64_v7  ;;  %v70_v19 = vld [vmem:[%s2372_s0 + $0x1c0] sm:$0xff]  ;;  %v21_v20 = vld [vmem:[%s2372_s0 + $0x38] sm:$0xff]  ;;  %v71_v21 = vld [vmem:[%s2372_s0 + $0x1c8] sm:$0xff] }
   0x8   :  { %v22_v22 = vld [vmem:[%s2372_s0 + $0x40] sm:$0xff]  ;;  %v72_v23 = vld [vmem:[%s2372_s0 + $0x1d0] sm:$0xff]  ;;  %v23_v24 = vld [vmem:[%s2372_s0 + $0x48] sm:$0xff] }
   0x9   :  { %1543 = vmatpush3.bf16.msk.msra.mxu0 %vm1539_vm3, %v1538_v6  ;;  %1547 = vmatpush3.bf16.msk.msra.mxu1 %vm1539_vm3, %v1538_v6  ;;  %v73_v25 = vld [vmem:[%s2372_s0 + $0x1d8] sm:$0xff]  ;;  %v24_v26 = vld [vmem:[%s2372_s0 + $0x50] sm:$0xff]  ;;  %v74_v27 = vld [vmem:[%s2372_s0 + $0x1e0] sm:$0xff] }
   0xa   :  { %v25_v28 = vld [vmem:[%s2372_s0 + $0x58] sm:$0xff]  ;;  %v75_v29 = vld [vmem:[%s2372_s0 + $0x1e8] sm:$0xff]  ;;  %v26_v30 = vld [vmem:[%s2372_s0 + $0x60] sm:$0xff] }
   0xb   :  { %v76_v31 = vld [vmem:[%s2372_s0 + $0x1f0] sm:$0xff]  ;;  %v27_v32 = vld [vmem:[%s2372_s0 + $0x68] sm:$0xff]  ;;  %v77_v33 = vld [vmem:[%s2372_s0 + $0x1f8] sm:$0xff] }
   0xc   :  { %1388 = vmatmul.mubr.msk.f32.vlgmr.msra.gmra.mrb[0].mxu0 %vm123_vm1, %v15_v8  ;;  %1463 = vmatmul.mubr.msk.f32.vlgmr.msra.gmra.mrb[0].mxu1 %vm123_vm1, %v65_v9  ;;  %v28_v34 = vld [vmem:[%s2372_s0 + $0x70] sm:$0xff]  ;;  %v78_v35 = vld [vmem:[%s2372_s0 + $0x200] sm:$0xff]  ;;  %v29_v36 = vld [vmem:[%s2372_s0 + $0x78] sm:$0xff] }
   0xd   :  { %1390 = vmatprep.mubr.msk.f32.mxu0 %vm123_vm1, %v16_v10  ;;  %1465 = vmatprep.mubr.msk.f32.mxu1 %vm123_vm1, %v66_v11  ;;  %v79_v37 = vld [vmem:[%s2372_s0 + $0x208] sm:$0xff]  ;;  %v30_v38 = vld [vmem:[%s2372_s0 + $0x80] sm:$0xff]  ;;  %v80_v39 = vld [vmem:[%s2372_s0 + $0x210] sm:$0xff] }
   0xe   :  { %v31_v40 = vld [vmem:[%s2372_s0 + $0x88] sm:$0xff]  ;;  %v81_v41 = vld [vmem:[%s2372_s0 + $0x218] sm:$0xff]  ;;  %v32_v42 = vld [vmem:[%s2372_s0 + $0x90] sm:$0xff] }
   0xf   :  { %v82_v43 = vld [vmem:[%s2372_s0 + $0x220] sm:$0xff]  ;;  %v33_v44 = vld [vmem:[%s2372_s0 + $0x98] sm:$0xff]  ;;  %v83_v45 = vld [vmem:[%s2372_s0 + $0x228] sm:$0xff] }
  0x10   :  { %1391 = vmatmul.mubr.msk.f32.gmra.mrb[2].mxu0 %vm123_vm1, %v17_v12  ;;  %1466 = vmatmul.mubr.msk.f32.gmra.mrb[2].mxu1 %vm123_vm1, %v67_v13  ;;  %v34_v46 = vld [vmem:[%s2372_s0 + $0xa0] sm:$0xff]  ;;  %v84_v47 = vld [vmem:[%s2372_s0 + $0x230] sm:$0xff]  ;;  %v35_v48 = vld [vmem:[%s2372_s0 + $0xa8] sm:$0xff] }
  0x11   :  { %1393 = vmatprep.mubr.msk.f32.mxu0 %vm123_vm1, %v18_v14  ;;  %1468 = vmatprep.mubr.msk.f32.mxu1 %vm123_vm1, %v68_v15  ;;  %v85_v49 = vld [vmem:[%s2372_s0 + $0x238] sm:$0xff]  ;;  %v36_v50 = vld [vmem:[%s2372_s0 + $0xb0] sm:$0xff]  ;;  %v86_v51 = vld [vmem:[%s2372_s0 + $0x240] sm:$0xff] }
  0x12   :  { %v37_v52 = vld [vmem:[%s2372_s0 + $0xb8] sm:$0xff]  ;;  %v87_v53 = vld [vmem:[%s2372_s0 + $0x248] sm:$0xff]  ;;  %v38_v54 = vld [vmem:[%s2372_s0 + $0xc0] sm:$0xff] }
  0x13   :  { %v88_v55 = vld [vmem:[%s2372_s0 + $0x250] sm:$0xff]  ;;  %v39_v56 = vld [vmem:[%s2372_s0 + $0xc8] sm:$0xff]  ;;  %v89_v57 = vld [vmem:[%s2372_s0 + $0x258] sm:$0xff] }
  0x14   :  { %1394 = vmatmul.mubr.msk.f32.gmra.mrb[4].mxu0 %vm123_vm1, %v19_v16  ;;  %1469 = vmatmul.mubr.msk.f32.gmra.mrb[4].mxu1 %vm123_vm1, %v69_v17  ;;  %v40_v58 = vld [vmem:[%s2372_s0 + $0xd0] sm:$0xff]  ;;  %v90_v59 = vld [vmem:[%s2372_s0 + $0x260] sm:$0xff]  ;;  %v41_v60 = vld [vmem:[%s2372_s0 + $0xd8] sm:$0xff] }
  0x15   :  { %1396 = vmatprep.mubr.msk.f32.mxu0 %vm123_vm1, %v20_v18  ;;  %1471 = vmatprep.mubr.msk.f32.mxu1 %vm123_vm1, %v70_v19  ;;  %v91_v61 = vld [vmem:[%s2372_s0 + $0x268] sm:$0xff]  ;;  %v42_v62 = vld [vmem:[%s2372_s0 + $0xe0] sm:$0xff]  ;;  %v92_v63 = vld [vmem:[%s2372_s0 + $0x270] sm:$0xff] }
  0x16   :  { %v43_v0 = vld [vmem:[%s2372_s0 + $0xe8] sm:$0xff]  ;;  %v93_v1 = vld [vmem:[%s2372_s0 + $0x278] sm:$0xff]  ;;  %v44_v2 = vld [vmem:[%s2372_s0 + $0xf0] sm:$0xff] }
  0x17   :  { %v94_v3 = vld [vmem:[%s2372_s0 + $0x280] sm:$0xff]  ;;  %v45_v4 = vld [vmem:[%s2372_s0 + $0xf8] sm:$0xff]  ;;  %v95_v5 = vld [vmem:[%s2372_s0 + $0x288] sm:$0xff] }
  0x18   :  { %1397 = vmatmul.mubr.msk.f32.gmra.mrb[6].mxu0 %vm123_vm1, %v21_v20  ;;  %1472 = vmatmul.mubr.msk.f32.gmra.mrb[6].mxu1 %vm123_vm1, %v71_v21  ;;  %v46_v6 = vld [vmem:[%s2372_s0 + $0x100] sm:$0xff]  ;;  %v96_v7 = vld [vmem:[%s2372_s0 + $0x290] sm:$0xff]  ;;  %v47_v8 = vld [vmem:[%s2372_s0 + $0x108] sm:$0xff] }
  0x19   :  { %1399 = vmatprep.mubr.msk.f32.mxu0 %vm123_vm1, %v22_v22  ;;  %1474 = vmatprep.mubr.msk.f32.mxu1 %vm123_vm1, %v72_v23  ;;  %v97_v9 = vld [vmem:[%s2372_s0 + $0x298] sm:$0xff]  ;;  %v48_v10 = vld [vmem:[%s2372_s0 + $0x110] sm:$0xff]  ;;  %v98_v11 = vld [vmem:[%s2372_s0 + $0x2a0] sm:$0xff] }
  0x1a   :  { %v49_v12 = vld [vmem:[%s2372_s0 + $0x118] sm:$0xff]  ;;  %v99_v13 = vld [vmem:[%s2372_s0 + $0x2a8] sm:$0xff]  ;;  %v50_v14 = vld [vmem:[%s2372_s0 + $0x120] sm:$0xff] }
  0x1b   :  { %v100_v15 = vld [vmem:[%s2372_s0 + $0x2b0] sm:$0xff]  ;;  %v51_v16 = vld [vmem:[%s2372_s0 + $0x128] sm:$0xff]  ;;  %v101_v17 = vld [vmem:[%s2372_s0 + $0x2b8] sm:$0xff] }
  0x1c   :  { %1400 = vmatmul.mubr.msk.f32.gmra.mrb[8].mxu0 %vm123_vm1, %v23_v24  ;;  %1475 = vmatmul.mubr.msk.f32.gmra.mrb[8].mxu1 %vm123_vm1, %v73_v25  ;;  %v52_v18 = vld [vmem:[%s2372_s0 + $0x130] sm:$0xff]  ;;  %v102_v19 = vld [vmem:[%s2372_s0 + $0x2c0] sm:$0xff]  ;;  %v53_v20 = vld [vmem:[%s2372_s0 + $0x138] sm:$0xff] }
  0x1d   :  { %1402 = vmatprep.mubr.msk.f32.mxu0 %vm123_vm1, %v24_v26  ;;  %1477 = vmatprep.mubr.msk.f32.mxu1 %vm123_vm1, %v74_v27  ;;  %v103_v21 = vld [vmem:[%s2372_s0 + $0x2c8] sm:$0xff]  ;;  %v54_v22 = vld [vmem:[%s2372_s0 + $0x140] sm:$0xff]  ;;  %v104_v23 = vld [vmem:[%s2372_s0 + $0x2d0] sm:$0xff] }
  0x1e   :  { %v55_v24 = vld [vmem:[%s2372_s0 + $0x148] sm:$0xff]  ;;  %v105_v25 = vld [vmem:[%s2372_s0 + $0x2d8] sm:$0xff]  ;;  %v56_v26 = vld [vmem:[%s2372_s0 + $0x150] sm:$0xff] }
  0x1f   :  { %v106_v27 = vld [vmem:[%s2372_s0 + $0x2e0] sm:$0xff] }
  0x20   :  { %1403 = vmatmul.mubr.msk.f32.gmra.mrb[10].mxu0 %vm123_vm1, %v25_v28  ;;  %1478 = vmatmul.mubr.msk.f32.gmra.mrb[10].mxu1 %vm123_vm1, %v75_v29  ;;  %v57_v28 = vld [vmem:[%s2372_s0 + $0x158] sm:$0xff]  ;;  %v107_v29 = vld [vmem:[%s2372_s0 + $0x2e8] sm:$0xff] }
  0x21   :  { %1405 = vmatprep.mubr.msk.f32.mxu0 %vm123_vm1, %v26_v30  ;;  %1480 = vmatprep.mubr.msk.f32.mxu1 %vm123_vm1, %v76_v31  ;;  %v58_v30 = vld [vmem:[%s2372_s0 + $0x160] sm:$0xff]  ;;  %v108_v31 = vld [vmem:[%s2372_s0 + $0x2f0] sm:$0xff] }
  0x24   :  { %1406 = vmatmul.mubr.msk.f32.gmra.mrb[12].mxu0 %vm123_vm1, %v27_v32  ;;  %1481 = vmatmul.mubr.msk.f32.gmra.mrb[12].mxu1 %vm123_vm1, %v77_v33  ;;  %v59_v32 = vld [vmem:[%s2372_s0 + $0x168] sm:$0xff]  ;;  %v109_v33 = vld [vmem:[%s2372_s0 + $0x2f8] sm:$0xff] }
  0x25   :  { %1408 = vmatprep.mubr.msk.f32.mxu0 %vm123_vm1, %v28_v34  ;;  %1483 = vmatprep.mubr.msk.f32.mxu1 %vm123_vm1, %v78_v35  ;;  %v60_v34 = vld [vmem:[%s2372_s0 + $0x170] sm:$0xff]  ;;  %v110_v35 = vld [vmem:[%s2372_s0 + $0x300] sm:$0xff] }
  0x28   :  { %1409 = vmatmul.mubr.msk.f32.gmra.mrb[14].mxu0 %vm123_vm1, %v29_v36  ;;  %1484 = vmatmul.mubr.msk.f32.gmra.mrb[14].mxu1 %vm123_vm1, %v79_v37  ;;  %v61_v36 = vld [vmem:[%s2372_s0 + $0x178] sm:$0xff]  ;;  %v111_v37 = vld [vmem:[%s2372_s0 + $0x308] sm:$0xff] }
  0x29   :  { %1411 = vmatprep.mubr.msk.f32.mxu0 %vm123_vm1, %v30_v38  ;;  %1486 = vmatprep.mubr.msk.f32.mxu1 %vm123_vm1, %v80_v39  ;;  %v62_v38 = vld [vmem:[%s2372_s0 + $0x180] sm:$0xff]  ;;  %v63_v39 = vld [vmem:[%s2372_s0 + $0x188] sm:$0xff] }
  0x2c   :  { %1412 = vmatmul.mubr.msk.f32.gmra.mrb[16].mxu0 %vm123_vm1, %v31_v40  ;;  %1487 = vmatmul.mubr.msk.f32.gmra.mrb[16].mxu1 %vm123_vm1, %v81_v41  ;;  %v1977_v40 = vld [vmem:[%s2373_s2] ss:$0 sm:$0xff] }
  0x2d   :  { %1414 = vmatprep.mubr.msk.f32.mxu0 %vm123_vm1, %v32_v42  ;;  %1489 = vmatprep.mubr.msk.f32.mxu1 %vm123_vm1, %v82_v43 }
  0x30   :  { %1415 = vmatmul.mubr.msk.f32.gmra.mrb[18].mxu0 %vm123_vm1, %v33_v44  ;;  %1490 = vmatmul.mubr.msk.f32.gmra.mrb[18].mxu1 %vm123_vm1, %v83_v45 }
  0x31   :  { %1417 = vmatprep.mubr.msk.f32.mxu0 %vm123_vm1, %v34_v46  ;;  %1492 = vmatprep.mubr.msk.f32.mxu1 %vm123_vm1, %v84_v47 }
  0x34   :  { %1418 = vmatmul.mubr.msk.f32.gmra.mrb[20].mxu0 %vm123_vm1, %v35_v48  ;;  %1493 = vmatmul.mubr.msk.f32.gmra.mrb[20].mxu1 %vm123_vm1, %v85_v49 }
  0x35   :  { %1420 = vmatprep.mubr.msk.f32.mxu0 %vm123_vm1, %v36_v50  ;;  %1495 = vmatprep.mubr.msk.f32.mxu1 %vm123_vm1, %v86_v51 }
  0x38   :  { %1421 = vmatmul.mubr.msk.f32.gmra.mrb[22].mxu0 %vm123_vm1, %v37_v52  ;;  %1496 = vmatmul.mubr.msk.f32.gmra.mrb[22].mxu1 %vm123_vm1, %v87_v53 }
  0x39   :  { %1423 = vmatprep.mubr.msk.f32.mxu0 %vm123_vm1, %v38_v54  ;;  %1498 = vmatprep.mubr.msk.f32.mxu1 %vm123_vm1, %v88_v55 }
  0x3c   :  { %1424 = vmatmul.mubr.msk.f32.gmra.mrb[24].mxu0 %vm123_vm1, %v39_v56  ;;  %1499 = vmatmul.mubr.msk.f32.gmra.mrb[24].mxu1 %vm123_vm1, %v89_v57 }
  0x3d   :  { %1426 = vmatprep.mubr.msk.f32.mxu0 %vm123_vm1, %v40_v58  ;;  %1501 = vmatprep.mubr.msk.f32.mxu1 %vm123_vm1, %v90_v59 }
  0x40   :  { %1427 = vmatmul.mubr.msk.f32.gmra.mrb[26].mxu0 %vm123_vm1, %v41_v60  ;;  %1502 = vmatmul.mubr.msk.f32.gmra.mrb[26].mxu1 %vm123_vm1, %v91_v61 }
  0x41   :  { %1429 = vmatprep.mubr.msk.f32.mxu0 %vm123_vm1, %v42_v62  ;;  %1504 = vmatprep.mubr.msk.f32.mxu1 %vm123_vm1, %v92_v63 }
  0x44   :  { %1430 = vmatmul.mubr.msk.f32.gmra.mrb[28].mxu0 %vm123_vm1, %v43_v0  ;;  %1505 = vmatmul.mubr.msk.f32.gmra.mrb[28].mxu1 %vm123_vm1, %v93_v1 }
  0x45   :  { %1432 = vmatprep.mubr.msk.f32.mxu0 %vm123_vm1, %v44_v2  ;;  %1507 = vmatprep.mubr.msk.f32.mxu1 %vm123_vm1, %v94_v3 }
  0x48   :  { %1433 = vmatmul.mubr.msk.f32.gmra.mrb[30].mxu0 %vm123_vm1, %v45_v4  ;;  %1508 = vmatmul.mubr.msk.f32.gmra.mrb[30].mxu1 %vm123_vm1, %v95_v5 }
  0x49   :  { %1435 = vmatprep.mubr.msk.f32.mxu0 %vm123_vm1, %v46_v6  ;;  %1510 = vmatprep.mubr.msk.f32.mxu1 %vm123_vm1, %v96_v7 }
  0x4c   :  { %1436 = vmatmul.mubr.msk.f32.gmra.mrb[32].mxu0 %vm123_vm1, %v47_v8  ;;  %1511 = vmatmul.mubr.msk.f32.gmra.mrb[32].mxu1 %vm123_vm1, %v97_v9 }
  0x4d   :  { %1438 = vmatprep.mubr.msk.f32.mxu0 %vm123_vm1, %v48_v10  ;;  %1513 = vmatprep.mubr.msk.f32.mxu1 %vm123_vm1, %v98_v11 }
  0x50   :  { %1439 = vmatmul.mubr.msk.f32.gmra.mrb[34].mxu0 %vm123_vm1, %v49_v12  ;;  %1514 = vmatmul.mubr.msk.f32.gmra.mrb[34].mxu1 %vm123_vm1, %v99_v13 }
  0x51   :  { %1441 = vmatprep.mubr.msk.f32.mxu0 %vm123_vm1, %v50_v14  ;;  %1516 = vmatprep.mubr.msk.f32.mxu1 %vm123_vm1, %v100_v15 }
  0x54   :  { %1442 = vmatmul.mubr.msk.f32.gmra.mrb[36].mxu0 %vm123_vm1, %v51_v16  ;;  %1517 = vmatmul.mubr.msk.f32.gmra.mrb[36].mxu1 %vm123_vm1, %v101_v17 }
  0x55   :  { %1444 = vmatprep.mubr.msk.f32.mxu0 %vm123_vm1, %v52_v18  ;;  %1519 = vmatprep.mubr.msk.f32.mxu1 %vm123_vm1, %v102_v19 }
  0x58   :  { %1445 = vmatmul.mubr.msk.f32.gmra.mrb[38].mxu0 %vm123_vm1, %v53_v20  ;;  %1520 = vmatmul.mubr.msk.f32.gmra.mrb[38].mxu1 %vm123_vm1, %v103_v21 }
  0x59   :  { %1447 = vmatprep.mubr.msk.f32.mxu0 %vm123_vm1, %v54_v22  ;;  %1522 = vmatprep.mubr.msk.f32.mxu1 %vm123_vm1, %v104_v23 }
  0x5c   :  { %1448 = vmatmul.mubr.msk.f32.gmra.mrb[40].mxu0 %vm123_vm1, %v55_v24  ;;  %1523 = vmatmul.mubr.msk.f32.gmra.mrb[40].mxu1 %vm123_vm1, %v105_v25 }
  0x5d   :  { %1450 = vmatprep.mubr.msk.f32.mxu0 %vm123_vm1, %v56_v26  ;;  %1525 = vmatprep.mubr.msk.f32.mxu1 %vm123_vm1, %v106_v27 }
  0x60   :  { %1451 = vmatmul.mubr.msk.f32.gmra.mrb[42].mxu0 %vm123_vm1, %v57_v28  ;;  %1526 = vmatmul.mubr.msk.f32.gmra.mrb[42].mxu1 %vm123_vm1, %v107_v29 }
  0x61   :  { %1453 = vmatprep.mubr.msk.f32.mxu0 %vm123_vm1, %v58_v30  ;;  %1528 = vmatprep.mubr.msk.f32.mxu1 %vm123_vm1, %v108_v31 }
  0x64   :  { %1454 = vmatmul.mubr.msk.f32.gmra.mrb[44].mxu0 %vm123_vm1, %v59_v32  ;;  %1529 = vmatmul.mubr.msk.f32.gmra.mrb[44].mxu1 %vm123_vm1, %v109_v33 }
  0x65   :  { %1456 = vmatprep.mubr.msk.f32.mxu0 %vm123_vm1, %v60_v34  ;;  %1531 = vmatprep.mubr.msk.f32.mxu1 %vm123_vm1, %v110_v35 }
  0x68   :  { %1457 = vmatmul.mubr.msk.f32.gmra.mrb[46].mxu0 %vm123_vm1, %v61_v36  ;;  %1532 = vmatmul.mubr.msk.f32.gmra.mrb[46].mxu1 %vm123_vm1, %v111_v37 }
  0x69   :  { %1459 = vmatprep.mubr.msk.f32.mxu0 %vm123_vm1, %v62_v38 }
  0x6c   :  { %1460 = vmatmul.mubr.msk.f32.gmra.mrb[48].mxu0 %vm123_vm1, %v63_v39 }
  0xdf   :  { %v1389_v41 = vpop.f32.mrb[0].mxu0  ;;  %v1464_v42 = vpop.f32.mrb[0].mxu1 }
  0xe0   :  { %v494_v43 = vadd.f32 %v1389_v41, %v1977_v40  ;;  %v488_v44 = vpop.f32.mrb[1].mxu0  ;;  %v744_v45 = vadd.f32 %v1464_v42, %v1977_v40  ;;  %v738_v46 = vpop.f32.mrb[1].mxu1 }
  0xe1   :  { %v489_v47 = vadd.f32 %v1977_v40, %v488_v44  ;;  %v739_v48 = vadd.f32 %v1977_v40, %v738_v46 }
  0xe2   :  { %v978_v49 = vmax.f32 %v494_v43, 0.0  ;;  %v1028_v50 = vmax.f32 %v744_v45, 0.0 }
  0xe3   :  { %v977_v51 = vmax.f32 %v489_v47, 0.0  ;;  %v1392_v52 = vpop.f32.mrb[2].mxu0  ;;  %v1027_v53 = vmax.f32 %v739_v48, 0.0  ;;  %v1467_v54 = vpop.f32.mrb[2].mxu1 }
  0xe4   :  { %1076 = vst [vmem:[%s2374_s3 + $0x8] sm:$0xff] %v978_v49  ;;  %1126 = vst [vmem:[%s2374_s3 + $0x198] sm:$0xff] %v1028_v50  ;;  %v504_v55 = vadd.f32 %v1392_v52, %v1977_v40  ;;  %v498_v56 = vpop.f32.mrb[3].mxu0  ;;  %v754_v57 = vadd.f32 %v1467_v54, %v1977_v40  ;;  %v748_v58 = vpop.f32.mrb[3].mxu1 }
  0xe5   :  { %1075 = vst [vmem:[%s2374_s3] sm:$0xff] %v977_v51  ;;  %1125 = vst [vmem:[%s2374_s3 + $0x190] sm:$0xff] %v1027_v53  ;;  %v499_v59 = vadd.f32 %v1977_v40, %v498_v56  ;;  %v749_v60 = vadd.f32 %v1977_v40, %v748_v58 }
  0xe6   :  { %v980_v61 = vmax.f32 %v504_v55, 0.0  ;;  %v1030_v62 = vmax.f32 %v754_v57, 0.0 }
  0xe7   :  { %v979_v63 = vmax.f32 %v499_v59, 0.0  ;;  %v1395_v0 = vpop.f32.mrb[4].mxu0  ;;  %v1029_v1 = vmax.f32 %v749_v60, 0.0  ;;  %v1470_v2 = vpop.f32.mrb[4].mxu1 }
  0xe8   :  { %1078 = vst [vmem:[%s2374_s3 + $0x18] sm:$0xff] %v980_v61  ;;  %1128 = vst [vmem:[%s2374_s3 + $0x1a8] sm:$0xff] %v1030_v62  ;;  %v514_v3 = vadd.f32 %v1395_v0, %v1977_v40  ;;  %v508_v4 = vpop.f32.mrb[5].mxu0  ;;  %v764_v5 = vadd.f32 %v1470_v2, %v1977_v40  ;;  %v758_v6 = vpop.f32.mrb[5].mxu1 }
  0xe9   :  { %1077 = vst [vmem:[%s2374_s3 + $0x10] sm:$0xff] %v979_v63  ;;  %1127 = vst [vmem:[%s2374_s3 + $0x1a0] sm:$0xff] %v1029_v1  ;;  %v509_v7 = vadd.f32 %v1977_v40, %v508_v4  ;;  %v759_v8 = vadd.f32 %v1977_v40, %v758_v6 }
  0xea   :  { %v982_v9 = vmax.f32 %v514_v3, 0.0  ;;  %v1032_v10 = vmax.f32 %v764_v5, 0.0 }
  0xeb   :  { %v981_v11 = vmax.f32 %v509_v7, 0.0  ;;  %v1398_v12 = vpop.f32.mrb[6].mxu0  ;;  %v1031_v13 = vmax.f32 %v759_v8, 0.0  ;;  %v1473_v14 = vpop.f32.mrb[6].mxu1 }
  0xec   :  { %1080 = vst [vmem:[%s2374_s3 + $0x28] sm:$0xff] %v982_v9  ;;  %1130 = vst [vmem:[%s2374_s3 + $0x1b8] sm:$0xff] %v1032_v10  ;;  %v524_v15 = vadd.f32 %v1398_v12, %v1977_v40  ;;  %v518_v16 = vpop.f32.mrb[7].mxu0  ;;  %v774_v17 = vadd.f32 %v1473_v14, %v1977_v40  ;;  %v768_v18 = vpop.f32.mrb[7].mxu1 }
  0xed   :  { %1079 = vst [vmem:[%s2374_s3 + $0x20] sm:$0xff] %v981_v11  ;;  %1129 = vst [vmem:[%s2374_s3 + $0x1b0] sm:$0xff] %v1031_v13  ;;  %v519_v19 = vadd.f32 %v1977_v40, %v518_v16  ;;  %v769_v20 = vadd.f32 %v1977_v40, %v768_v18 }
  0xee   :  { %v984_v21 = vmax.f32 %v524_v15, 0.0  ;;  %v1034_v22 = vmax.f32 %v774_v17, 0.0 }
  0xef   :  { %v983_v23 = vmax.f32 %v519_v19, 0.0  ;;  %v1401_v24 = vpop.f32.mrb[8].mxu0  ;;  %v1033_v25 = vmax.f32 %v769_v20, 0.0  ;;  %v1476_v26 = vpop.f32.mrb[8].mxu1 }
  0xf0   :  { %1082 = vst [vmem:[%s2374_s3 + $0x38] sm:$0xff] %v984_v21  ;;  %1132 = vst [vmem:[%s2374_s3 + $0x1c8] sm:$0xff] %v1034_v22  ;;  %v534_v27 = vadd.f32 %v1401_v24, %v1977_v40  ;;  %v528_v28 = vpop.f32.mrb[9].mxu0  ;;  %v784_v29 = vadd.f32 %v1476_v26, %v1977_v40  ;;  %v778_v30 = vpop.f32.mrb[9].mxu1 }
  0xf1   :  { %1081 = vst [vmem:[%s2374_s3 + $0x30] sm:$0xff] %v983_v23  ;;  %1131 = vst [vmem:[%s2374_s3 + $0x1c0] sm:$0xff] %v1033_v25  ;;  %v529_v31 = vadd.f32 %v1977_v40, %v528_v28  ;;  %v779_v32 = vadd.f32 %v1977_v40, %v778_v30 }
  0xf2   :  { %v986_v33 = vmax.f32 %v534_v27, 0.0  ;;  %v1036_v34 = vmax.f32 %v784_v29, 0.0 }
  0xf3   :  { %v985_v35 = vmax.f32 %v529_v31, 0.0  ;;  %v1404_v36 = vpop.f32.mrb[10].mxu0  ;;  %v1035_v37 = vmax.f32 %v779_v32, 0.0  ;;  %v1479_v38 = vpop.f32.mrb[10].mxu1 }
  0xf4   :  { %1084 = vst [vmem:[%s2374_s3 + $0x48] sm:$0xff] %v986_v33  ;;  %1134 = vst [vmem:[%s2374_s3 + $0x1d8] sm:$0xff] %v1036_v34  ;;  %v544_v39 = vadd.f32 %v1404_v36, %v1977_v40  ;;  %v538_v41 = vpop.f32.mrb[11].mxu0  ;;  %v794_v42 = vadd.f32 %v1479_v38, %v1977_v40  ;;  %v788_v43 = vpop.f32.mrb[11].mxu1 }
  0xf5   :  { %1083 = vst [vmem:[%s2374_s3 + $0x40] sm:$0xff] %v985_v35  ;;  %1133 = vst [vmem:[%s2374_s3 + $0x1d0] sm:$0xff] %v1035_v37  ;;  %v539_v44 = vadd.f32 %v1977_v40, %v538_v41  ;;  %v789_v45 = vadd.f32 %v1977_v40, %v788_v43 }
  0xf6   :  { %v988_v46 = vmax.f32 %v544_v39, 0.0  ;;  %v1038_v47 = vmax.f32 %v794_v42, 0.0 }
  0xf7   :  { %v987_v48 = vmax.f32 %v539_v44, 0.0  ;;  %v1407_v49 = vpop.f32.mrb[12].mxu0  ;;  %v1037_v50 = vmax.f32 %v789_v45, 0.0  ;;  %v1482_v51 = vpop.f32.mrb[12].mxu1 }
  0xf8   :  { %1086 = vst [vmem:[%s2374_s3 + $0x58] sm:$0xff] %v988_v46  ;;  %1136 = vst [vmem:[%s2374_s3 + $0x1e8] sm:$0xff] %v1038_v47  ;;  %v554_v52 = vadd.f32 %v1407_v49, %v1977_v40  ;;  %v548_v53 = vpop.f32.mrb[13].mxu0  ;;  %v804_v54 = vadd.f32 %v1482_v51, %v1977_v40  ;;  %v798_v55 = vpop.f32.mrb[13].mxu1 }
  0xf9   :  { %1085 = vst [vmem:[%s2374_s3 + $0x50] sm:$0xff] %v987_v48  ;;  %1135 = vst [vmem:[%s2374_s3 + $0x1e0] sm:$0xff] %v1037_v50  ;;  %v549_v56 = vadd.f32 %v1977_v40, %v548_v53  ;;  %v799_v57 = vadd.f32 %v1977_v40, %v798_v55 }
  0xfa   :  { %v990_v58 = vmax.f32 %v554_v52, 0.0  ;;  %v1040_v59 = vmax.f32 %v804_v54, 0.0 }
  0xfb   :  { %v989_v60 = vmax.f32 %v549_v56, 0.0  ;;  %v1410_v61 = vpop.f32.mrb[14].mxu0  ;;  %v1039_v62 = vmax.f32 %v799_v57, 0.0  ;;  %v1485_v63 = vpop.f32.mrb[14].mxu1 }
  0xfc   :  { %1088 = vst [vmem:[%s2374_s3 + $0x68] sm:$0xff] %v990_v58  ;;  %1138 = vst [vmem:[%s2374_s3 + $0x1f8] sm:$0xff] %v1040_v59  ;;  %v564_v0 = vadd.f32 %v1410_v61, %v1977_v40  ;;  %v558_v1 = vpop.f32.mrb[15].mxu0  ;;  %v814_v2 = vadd.f32 %v1485_v63, %v1977_v40  ;;  %v808_v3 = vpop.f32.mrb[15].mxu1 }
  0xfd   :  { %1087 = vst [vmem:[%s2374_s3 + $0x60] sm:$0xff] %v989_v60  ;;  %1137 = vst [vmem:[%s2374_s3 + $0x1f0] sm:$0xff] %v1039_v62  ;;  %v559_v4 = vadd.f32 %v1977_v40, %v558_v1  ;;  %v809_v5 = vadd.f32 %v1977_v40, %v808_v3 }
  0xfe   :  { %v992_v6 = vmax.f32 %v564_v0, 0.0  ;;  %v1042_v7 = vmax.f32 %v814_v2, 0.0 }
  0xff   :  { %v991_v8 = vmax.f32 %v559_v4, 0.0  ;;  %v1413_v9 = vpop.f32.mrb[16].mxu0  ;;  %v1041_v10 = vmax.f32 %v809_v5, 0.0  ;;  %v1488_v11 = vpop.f32.mrb[16].mxu1 }
 0x100   :  { %1090 = vst [vmem:[%s2374_s3 + $0x78] sm:$0xff] %v992_v6  ;;  %1140 = vst [vmem:[%s2374_s3 + $0x208] sm:$0xff] %v1042_v7  ;;  %v574_v12 = vadd.f32 %v1413_v9, %v1977_v40  ;;  %v568_v13 = vpop.f32.mrb[17].mxu0  ;;  %v824_v14 = vadd.f32 %v1488_v11, %v1977_v40  ;;  %v818_v15 = vpop.f32.mrb[17].mxu1 }
 0x101   :  { %1089 = vst [vmem:[%s2374_s3 + $0x70] sm:$0xff] %v991_v8  ;;  %1139 = vst [vmem:[%s2374_s3 + $0x200] sm:$0xff] %v1041_v10  ;;  %v569_v16 = vadd.f32 %v1977_v40, %v568_v13  ;;  %v819_v17 = vadd.f32 %v1977_v40, %v818_v15 }
 0x102   :  { %v994_v18 = vmax.f32 %v574_v12, 0.0  ;;  %v1044_v19 = vmax.f32 %v824_v14, 0.0 }
 0x103   :  { %v993_v20 = vmax.f32 %v569_v16, 0.0  ;;  %v1416_v21 = vpop.f32.mrb[18].mxu0  ;;  %v1043_v22 = vmax.f32 %v819_v17, 0.0  ;;  %v1491_v23 = vpop.f32.mrb[18].mxu1 }
 0x104   :  { %1092 = vst [vmem:[%s2374_s3 + $0x88] sm:$0xff] %v994_v18  ;;  %1142 = vst [vmem:[%s2374_s3 + $0x218] sm:$0xff] %v1044_v19  ;;  %v584_v24 = vadd.f32 %v1416_v21, %v1977_v40  ;;  %v578_v25 = vpop.f32.mrb[19].mxu0  ;;  %v834_v26 = vadd.f32 %v1491_v23, %v1977_v40  ;;  %v828_v27 = vpop.f32.mrb[19].mxu1 }
 0x105   :  { %1091 = vst [vmem:[%s2374_s3 + $0x80] sm:$0xff] %v993_v20  ;;  %1141 = vst [vmem:[%s2374_s3 + $0x210] sm:$0xff] %v1043_v22  ;;  %v579_v28 = vadd.f32 %v1977_v40, %v578_v25  ;;  %v829_v29 = vadd.f32 %v1977_v40, %v828_v27 }
 0x106   :  { %v996_v30 = vmax.f32 %v584_v24, 0.0  ;;  %v1046_v31 = vmax.f32 %v834_v26, 0.0 }
 0x107   :  { %v995_v32 = vmax.f32 %v579_v28, 0.0  ;;  %v1419_v33 = vpop.f32.mrb[20].mxu0  ;;  %v1045_v34 = vmax.f32 %v829_v29, 0.0  ;;  %v1494_v35 = vpop.f32.mrb[20].mxu1 }
 0x108   :  { %1094 = vst [vmem:[%s2374_s3 + $0x98] sm:$0xff] %v996_v30  ;;  %1144 = vst [vmem:[%s2374_s3 + $0x228] sm:$0xff] %v1046_v31  ;;  %v594_v36 = vadd.f32 %v1419_v33, %v1977_v40  ;;  %v588_v37 = vpop.f32.mrb[21].mxu0  ;;  %v844_v38 = vadd.f32 %v1494_v35, %v1977_v40  ;;  %v838_v39 = vpop.f32.mrb[21].mxu1 }
 0x109   :  { %1093 = vst [vmem:[%s2374_s3 + $0x90] sm:$0xff] %v995_v32  ;;  %1143 = vst [vmem:[%s2374_s3 + $0x220] sm:$0xff] %v1045_v34  ;;  %v589_v41 = vadd.f32 %v1977_v40, %v588_v37  ;;  %v839_v42 = vadd.f32 %v1977_v40, %v838_v39 }
 0x10a   :  { %v998_v43 = vmax.f32 %v594_v36, 0.0  ;;  %v1048_v44 = vmax.f32 %v844_v38, 0.0 }
 0x10b   :  { %v997_v45 = vmax.f32 %v589_v41, 0.0  ;;  %v1422_v46 = vpop.f32.mrb[22].mxu0  ;;  %v1047_v47 = vmax.f32 %v839_v42, 0.0  ;;  %v1497_v48 = vpop.f32.mrb[22].mxu1 }
 0x10c   :  { %1096 = vst [vmem:[%s2374_s3 + $0xa8] sm:$0xff] %v998_v43  ;;  %1146 = vst [vmem:[%s2374_s3 + $0x238] sm:$0xff] %v1048_v44  ;;  %v604_v49 = vadd.f32 %v1422_v46, %v1977_v40  ;;  %v598_v50 = vpop.f32.mrb[23].mxu0  ;;  %v854_v51 = vadd.f32 %v1497_v48, %v1977_v40  ;;  %v848_v52 = vpop.f32.mrb[23].mxu1 }
 0x10d   :  { %1095 = vst [vmem:[%s2374_s3 + $0xa0] sm:$0xff] %v997_v45  ;;  %1145 = vst [vmem:[%s2374_s3 + $0x230] sm:$0xff] %v1047_v47  ;;  %v599_v53 = vadd.f32 %v1977_v40, %v598_v50  ;;  %v849_v54 = vadd.f32 %v1977_v40, %v848_v52 }
 0x10e   :  { %v1000_v55 = vmax.f32 %v604_v49, 0.0  ;;  %v1050_v56 = vmax.f32 %v854_v51, 0.0 }
 0x10f   :  { %v999_v57 = vmax.f32 %v599_v53, 0.0  ;;  %v1425_v58 = vpop.f32.mrb[24].mxu0  ;;  %v1049_v59 = vmax.f32 %v849_v54, 0.0  ;;  %v1500_v60 = vpop.f32.mrb[24].mxu1 }
 0x110   :  { %1098 = vst [vmem:[%s2374_s3 + $0xb8] sm:$0xff] %v1000_v55  ;;  %1148 = vst [vmem:[%s2374_s3 + $0x248] sm:$0xff] %v1050_v56  ;;  %v614_v61 = vadd.f32 %v1425_v58, %v1977_v40  ;;  %v608_v62 = vpop.f32.mrb[25].mxu0  ;;  %v864_v63 = vadd.f32 %v1500_v60, %v1977_v40  ;;  %v858_v0 = vpop.f32.mrb[25].mxu1 }
 0x111   :  { %1097 = vst [vmem:[%s2374_s3 + $0xb0] sm:$0xff] %v999_v57  ;;  %1147 = vst [vmem:[%s2374_s3 + $0x240] sm:$0xff] %v1049_v59  ;;  %v609_v1 = vadd.f32 %v1977_v40, %v608_v62  ;;  %v859_v2 = vadd.f32 %v1977_v40, %v858_v0 }
 0x112   :  { %v1002_v3 = vmax.f32 %v614_v61, 0.0  ;;  %v1052_v4 = vmax.f32 %v864_v63, 0.0 }
 0x113   :  { %v1001_v5 = vmax.f32 %v609_v1, 0.0  ;;  %v1428_v6 = vpop.f32.mrb[26].mxu0  ;;  %v1051_v7 = vmax.f32 %v859_v2, 0.0  ;;  %v1503_v8 = vpop.f32.mrb[26].mxu1 }
 0x114   :  { %1100 = vst [vmem:[%s2374_s3 + $0xc8] sm:$0xff] %v1002_v3  ;;  %1150 = vst [vmem:[%s2374_s3 + $0x258] sm:$0xff] %v1052_v4  ;;  %v624_v9 = vadd.f32 %v1428_v6, %v1977_v40  ;;  %v618_v10 = vpop.f32.mrb[27].mxu0  ;;  %v874_v11 = vadd.f32 %v1503_v8, %v1977_v40  ;;  %v868_v12 = vpop.f32.mrb[27].mxu1 }
 0x115   :  { %1099 = vst [vmem:[%s2374_s3 + $0xc0] sm:$0xff] %v1001_v5  ;;  %1149 = vst [vmem:[%s2374_s3 + $0x250] sm:$0xff] %v1051_v7  ;;  %v619_v13 = vadd.f32 %v1977_v40, %v618_v10  ;;  %v869_v14 = vadd.f32 %v1977_v40, %v868_v12 }
 0x116   :  { %v1004_v15 = vmax.f32 %v624_v9, 0.0  ;;  %v1054_v16 = vmax.f32 %v874_v11, 0.0 }
 0x117   :  { %v1003_v17 = vmax.f32 %v619_v13, 0.0  ;;  %v1431_v18 = vpop.f32.mrb[28].mxu0  ;;  %v1053_v19 = vmax.f32 %v869_v14, 0.0  ;;  %v1506_v20 = vpop.f32.mrb[28].mxu1 }
 0x118   :  { %1102 = vst [vmem:[%s2374_s3 + $0xd8] sm:$0xff] %v1004_v15  ;;  %1152 = vst [vmem:[%s2374_s3 + $0x268] sm:$0xff] %v1054_v16  ;;  %v634_v21 = vadd.f32 %v1431_v18, %v1977_v40  ;;  %v628_v22 = vpop.f32.mrb[29].mxu0  ;;  %v884_v23 = vadd.f32 %v1506_v20, %v1977_v40  ;;  %v878_v24 = vpop.f32.mrb[29].mxu1 }
 0x119   :  { %1101 = vst [vmem:[%s2374_s3 + $0xd0] sm:$0xff] %v1003_v17  ;;  %1151 = vst [vmem:[%s2374_s3 + $0x260] sm:$0xff] %v1053_v19  ;;  %v629_v25 = vadd.f32 %v1977_v40, %v628_v22  ;;  %v879_v26 = vadd.f32 %v1977_v40, %v878_v24 }
 0x11a   :  { %v1006_v27 = vmax.f32 %v634_v21, 0.0  ;;  %v1056_v28 = vmax.f32 %v884_v23, 0.0 }
 0x11b   :  { %v1005_v29 = vmax.f32 %v629_v25, 0.0  ;;  %v1434_v30 = vpop.f32.mrb[30].mxu0  ;;  %v1055_v31 = vmax.f32 %v879_v26, 0.0  ;;  %v1509_v32 = vpop.f32.mrb[30].mxu1 }
 0x11c   :  { %1104 = vst [vmem:[%s2374_s3 + $0xe8] sm:$0xff] %v1006_v27  ;;  %1154 = vst [vmem:[%s2374_s3 + $0x278] sm:$0xff] %v1056_v28  ;;  %v644_v33 = vadd.f32 %v1434_v30, %v1977_v40  ;;  %v638_v34 = vpop.f32.mrb[31].mxu0  ;;  %v894_v35 = vadd.f32 %v1509_v32, %v1977_v40  ;;  %v888_v36 = vpop.f32.mrb[31].mxu1 }
 0x11d   :  { %1103 = vst [vmem:[%s2374_s3 + $0xe0] sm:$0xff] %v1005_v29  ;;  %1153 = vst [vmem:[%s2374_s3 + $0x270] sm:$0xff] %v1055_v31  ;;  %v639_v37 = vadd.f32 %v1977_v40, %v638_v34  ;;  %v889_v38 = vadd.f32 %v1977_v40, %v888_v36 }
 0x11e   :  { %v1008_v39 = vmax.f32 %v644_v33, 0.0  ;;  %v1058_v41 = vmax.f32 %v894_v35, 0.0 }
 0x11f   :  { %v1007_v42 = vmax.f32 %v639_v37, 0.0  ;;  %v1437_v43 = vpop.f32.mrb[32].mxu0  ;;  %v1057_v44 = vmax.f32 %v889_v38, 0.0  ;;  %v1512_v45 = vpop.f32.mrb[32].mxu1 }
 0x120   :  { %1106 = vst [vmem:[%s2374_s3 + $0xf8] sm:$0xff] %v1008_v39  ;;  %1156 = vst [vmem:[%s2374_s3 + $0x288] sm:$0xff] %v1058_v41  ;;  %v654_v46 = vadd.f32 %v1437_v43, %v1977_v40  ;;  %v648_v47 = vpop.f32.mrb[33].mxu0  ;;  %v904_v48 = vadd.f32 %v1512_v45, %v1977_v40  ;;  %v898_v49 = vpop.f32.mrb[33].mxu1 }
 0x121   :  { %1105 = vst [vmem:[%s2374_s3 + $0xf0] sm:$0xff] %v1007_v42  ;;  %1155 = vst [vmem:[%s2374_s3 + $0x280] sm:$0xff] %v1057_v44  ;;  %v649_v50 = vadd.f32 %v1977_v40, %v648_v47  ;;  %v899_v51 = vadd.f32 %v1977_v40, %v898_v49 }
 0x122   :  { %v1010_v52 = vmax.f32 %v654_v46, 0.0  ;;  %v1060_v53 = vmax.f32 %v904_v48, 0.0 }
 0x123   :  { %v1009_v54 = vmax.f32 %v649_v50, 0.0  ;;  %v1440_v55 = vpop.f32.mrb[34].mxu0  ;;  %v1059_v56 = vmax.f32 %v899_v51, 0.0  ;;  %v1515_v57 = vpop.f32.mrb[34].mxu1 }
 0x124   :  { %1108 = vst [vmem:[%s2374_s3 + $0x108] sm:$0xff] %v1010_v52  ;;  %1158 = vst [vmem:[%s2374_s3 + $0x298] sm:$0xff] %v1060_v53  ;;  %v664_v58 = vadd.f32 %v1440_v55, %v1977_v40  ;;  %v658_v59 = vpop.f32.mrb[35].mxu0  ;;  %v914_v60 = vadd.f32 %v1515_v57, %v1977_v40  ;;  %v908_v61 = vpop.f32.mrb[35].mxu1 }
 0x125   :  { %1107 = vst [vmem:[%s2374_s3 + $0x100] sm:$0xff] %v1009_v54  ;;  %1157 = vst [vmem:[%s2374_s3 + $0x290] sm:$0xff] %v1059_v56  ;;  %v659_v62 = vadd.f32 %v1977_v40, %v658_v59  ;;  %v909_v63 = vadd.f32 %v1977_v40, %v908_v61 }
 0x126   :  { %v1012_v0 = vmax.f32 %v664_v58, 0.0  ;;  %v1062_v1 = vmax.f32 %v914_v60, 0.0 }
 0x127   :  { %v1011_v2 = vmax.f32 %v659_v62, 0.0  ;;  %v1443_v3 = vpop.f32.mrb[36].mxu0  ;;  %v1061_v4 = vmax.f32 %v909_v63, 0.0  ;;  %v1518_v5 = vpop.f32.mrb[36].mxu1 }
 0x128   :  { %1110 = vst [vmem:[%s2374_s3 + $0x118] sm:$0xff] %v1012_v0  ;;  %1160 = vst [vmem:[%s2374_s3 + $0x2a8] sm:$0xff] %v1062_v1  ;;  %v674_v6 = vadd.f32 %v1443_v3, %v1977_v40  ;;  %v668_v7 = vpop.f32.mrb[37].mxu0  ;;  %v924_v8 = vadd.f32 %v1518_v5, %v1977_v40  ;;  %v918_v9 = vpop.f32.mrb[37].mxu1 }
 0x129   :  { %1109 = vst [vmem:[%s2374_s3 + $0x110] sm:$0xff] %v1011_v2  ;;  %1159 = vst [vmem:[%s2374_s3 + $0x2a0] sm:$0xff] %v1061_v4  ;;  %v669_v10 = vadd.f32 %v1977_v40, %v668_v7  ;;  %v919_v11 = vadd.f32 %v1977_v40, %v918_v9 }
 0x12a   :  { %v1014_v12 = vmax.f32 %v674_v6, 0.0  ;;  %v1064_v13 = vmax.f32 %v924_v8, 0.0 }
 0x12b   :  { %v1013_v14 = vmax.f32 %v669_v10, 0.0  ;;  %v1446_v15 = vpop.f32.mrb[38].mxu0  ;;  %v1063_v16 = vmax.f32 %v919_v11, 0.0  ;;  %v1521_v17 = vpop.f32.mrb[38].mxu1 }
 0x12c   :  { %1112 = vst [vmem:[%s2374_s3 + $0x128] sm:$0xff] %v1014_v12  ;;  %1162 = vst [vmem:[%s2374_s3 + $0x2b8] sm:$0xff] %v1064_v13  ;;  %v684_v18 = vadd.f32 %v1446_v15, %v1977_v40  ;;  %v678_v19 = vpop.f32.mrb[39].mxu0  ;;  %v934_v20 = vadd.f32 %v1521_v17, %v1977_v40  ;;  %v928_v21 = vpop.f32.mrb[39].mxu1 }
 0x12d   :  { %1111 = vst [vmem:[%s2374_s3 + $0x120] sm:$0xff] %v1013_v14  ;;  %1161 = vst [vmem:[%s2374_s3 + $0x2b0] sm:$0xff] %v1063_v16  ;;  %v679_v22 = vadd.f32 %v1977_v40, %v678_v19  ;;  %v929_v23 = vadd.f32 %v1977_v40, %v928_v21 }
 0x12e   :  { %v1016_v24 = vmax.f32 %v684_v18, 0.0  ;;  %v1066_v25 = vmax.f32 %v934_v20, 0.0 }
 0x12f   :  { %v1015_v26 = vmax.f32 %v679_v22, 0.0  ;;  %v1449_v27 = vpop.f32.mrb[40].mxu0  ;;  %v1065_v28 = vmax.f32 %v929_v23, 0.0  ;;  %v1524_v29 = vpop.f32.mrb[40].mxu1 }
 0x130   :  { %1114 = vst [vmem:[%s2374_s3 + $0x138] sm:$0xff] %v1016_v24  ;;  %1164 = vst [vmem:[%s2374_s3 + $0x2c8] sm:$0xff] %v1066_v25  ;;  %v694_v30 = vadd.f32 %v1449_v27, %v1977_v40  ;;  %v688_v31 = vpop.f32.mrb[41].mxu0  ;;  %v944_v32 = vadd.f32 %v1524_v29, %v1977_v40  ;;  %v938_v33 = vpop.f32.mrb[41].mxu1 }
 0x131   :  { %1113 = vst [vmem:[%s2374_s3 + $0x130] sm:$0xff] %v1015_v26  ;;  %1163 = vst [vmem:[%s2374_s3 + $0x2c0] sm:$0xff] %v1065_v28  ;;  %v689_v34 = vadd.f32 %v1977_v40, %v688_v31  ;;  %v939_v35 = vadd.f32 %v1977_v40, %v938_v33 }
 0x132   :  { %v1018_v36 = vmax.f32 %v694_v30, 0.0  ;;  %v1068_v37 = vmax.f32 %v944_v32, 0.0 }
 0x133   :  { %v1017_v38 = vmax.f32 %v689_v34, 0.0  ;;  %v1452_v39 = vpop.f32.mrb[42].mxu0  ;;  %v1067_v41 = vmax.f32 %v939_v35, 0.0  ;;  %v1527_v42 = vpop.f32.mrb[42].mxu1 }
 0x134   :  { %1116 = vst [vmem:[%s2374_s3 + $0x148] sm:$0xff] %v1018_v36  ;;  %1166 = vst [vmem:[%s2374_s3 + $0x2d8] sm:$0xff] %v1068_v37  ;;  %v704_v43 = vadd.f32 %v1452_v39, %v1977_v40  ;;  %v698_v44 = vpop.f32.mrb[43].mxu0  ;;  %v954_v45 = vadd.f32 %v1527_v42, %v1977_v40  ;;  %v948_v46 = vpop.f32.mrb[43].mxu1 }
 0x135   :  { %1115 = vst [vmem:[%s2374_s3 + $0x140] sm:$0xff] %v1017_v38  ;;  %1165 = vst [vmem:[%s2374_s3 + $0x2d0] sm:$0xff] %v1067_v41  ;;  %v699_v47 = vadd.f32 %v1977_v40, %v698_v44  ;;  %v949_v48 = vadd.f32 %v1977_v40, %v948_v46 }
 0x136   :  { %v1020_v49 = vmax.f32 %v704_v43, 0.0  ;;  %v1070_v50 = vmax.f32 %v954_v45, 0.0 }
 0x137   :  { %v1019_v51 = vmax.f32 %v699_v47, 0.0  ;;  %v1455_v52 = vpop.f32.mrb[44].mxu0  ;;  %v1069_v53 = vmax.f32 %v949_v48, 0.0  ;;  %v1530_v54 = vpop.f32.mrb[44].mxu1 }
 0x138   :  { %1118 = vst [vmem:[%s2374_s3 + $0x158] sm:$0xff] %v1020_v49  ;;  %1168 = vst [vmem:[%s2374_s3 + $0x2e8] sm:$0xff] %v1070_v50  ;;  %v714_v55 = vadd.f32 %v1455_v52, %v1977_v40  ;;  %v708_v56 = vpop.f32.mrb[45].mxu0  ;;  %v964_v57 = vadd.f32 %v1530_v54, %v1977_v40  ;;  %v958_v58 = vpop.f32.mrb[45].mxu1 }
 0x139   :  { %1117 = vst [vmem:[%s2374_s3 + $0x150] sm:$0xff] %v1019_v51  ;;  %1167 = vst [vmem:[%s2374_s3 + $0x2e0] sm:$0xff] %v1069_v53  ;;  %v709_v59 = vadd.f32 %v1977_v40, %v708_v56  ;;  %v959_v60 = vadd.f32 %v1977_v40, %v958_v58 }
 0x13a   :  { %v1022_v61 = vmax.f32 %v714_v55, 0.0  ;;  %v1072_v62 = vmax.f32 %v964_v57, 0.0 }
 0x13b   :  { %v1021_v63 = vmax.f32 %v709_v59, 0.0  ;;  %v1458_v0 = vpop.f32.mrb[46].mxu0  ;;  %v1071_v1 = vmax.f32 %v959_v60, 0.0  ;;  %v1533_v2 = vpop.f32.mrb[46].mxu1 }
 0x13c   :  { %1120 = vst [vmem:[%s2374_s3 + $0x168] sm:$0xff] %v1022_v61  ;;  %1170 = vst [vmem:[%s2374_s3 + $0x2f8] sm:$0xff] %v1072_v62  ;;  %v724_v3 = vadd.f32 %v1458_v0, %v1977_v40  ;;  %v718_v4 = vpop.f32.mrb[47].mxu0  ;;  %v974_v5 = vadd.f32 %v1533_v2, %v1977_v40  ;;  %v968_v6 = vpop.f32.mrb[47].mxu1 }
 0x13d   :  { %1119 = vst [vmem:[%s2374_s3 + $0x160] sm:$0xff] %v1021_v63  ;;  %1169 = vst [vmem:[%s2374_s3 + $0x2f0] sm:$0xff] %v1071_v1  ;;  %v719_v7 = vadd.f32 %v1977_v40, %v718_v4  ;;  %v969_v8 = vadd.f32 %v1977_v40, %v968_v6 }
 0x13e   :  { %v1024_v9 = vmax.f32 %v724_v3, 0.0  ;;  %v1074_v10 = vmax.f32 %v974_v5, 0.0 }
 0x13f   :  { %v1023_v11 = vmax.f32 %v719_v7, 0.0  ;;  %v1461_v12 = vpop.f32.mrb[48].mxu0  ;;  %v1073_v13 = vmax.f32 %v969_v8, 0.0 }
 0x140   :  { %1122 = vst [vmem:[%s2374_s3 + $0x178] sm:$0xff] %v1024_v9  ;;  %1172 = vst [vmem:[%s2374_s3 + $0x308] sm:$0xff] %v1074_v10  ;;  %v734_v14 = vadd.f32 %v1461_v12, %v1977_v40  ;;  %v728_v15 = vpop.f32.mrb[49].mxu0 }
 0x141   :  { %1121 = vst [vmem:[%s2374_s3 + $0x170] sm:$0xff] %v1023_v11  ;;  %1171 = vst [vmem:[%s2374_s3 + $0x300] sm:$0xff] %v1073_v13  ;;  %v729_v16 = vadd.f32 %v1977_v40, %v728_v15 }
 0x142   :  { %v1026_v17 = vmax.f32 %v734_v14, 0.0 }
 0x143   :  { %v1025_v18 = vmax.f32 %v729_v16, 0.0 }
 0x144   :  { %1124 = vst [vmem:[%s2374_s3 + $0x188] sm:$0xff] %v1026_v17 }
 0x145   :  { %1123 = vst [vmem:[%s2374_s3 + $0x180] sm:$0xff] %v1025_v18 }

// kernel: reconstruction_loss.8
= control target key start
LH: loop header
LB: loop body
LE: loop exit
PB: predicated region body
PF: predicated region fallthrough
CT: control target
= control target key end

     0   :  { %vm871_vm0 = vcmask 1041409   ;;  %s2038_s0 = inlined_call_operand.vmem [shape: f32[4,200,128], index: 0, kind: input, shape index: {}]   ;;  %s2039_s1 = inlined_call_operand.vmem [shape: f32[1,2,128], index: 1, kind: output, shape index: {}]  }
   0x1   :  { %v1196_v0 = vld [vmem:[%s2038_s0 + $0x10] sm:$0xff]  ;;  %v1201_v1 = vld [vmem:[%s2038_s0] sm:$0xff]  ;;  %v1206_v2 = vld [vmem:[%s2038_s0 + $0x18] sm:$0xff] }
   0x2   :  { %v111_v3 = vmul.f32 %v1196_v0, %v1196_v0  ;;  %v109_v4 = vmul.f32 %v1201_v1, %v1201_v1  ;;  %v1215_v5 = vld [vmem:[%s2038_s0 + $0x8] sm:$0xff]  ;;  %v112_v6 = vmul.f32 %v1206_v2, %v1206_v2  ;;  %v1229_v9 = vld [vmem:[%s2038_s0 + $0x20] sm:$0xff]  ;;  %v15_v12 = vld [vmem:[%s2038_s0 + $0x38] sm:$0xff] }
   0x3   :  { %v110_v7 = vmul.f32 %v1215_v5, %v1215_v5  ;;  %v1224_v8 = vld [vmem:[%s2038_s0 + $0x28] sm:$0xff]  ;;  %v113_v11 = vmul.f32 %v1229_v9, %v1229_v9  ;;  %v1241_v13 = vld [vmem:[%s2038_s0 + $0x30] sm:$0xff]  ;;  %v116_v14 = vmul.f32 %v15_v12, %v15_v12  ;;  %v16_v17 = vld [vmem:[%s2038_s0 + $0x40] sm:$0xff] }
   0x4   :  { %163 = vadd.xlane.f32.xlu1 %v111_v3  ;;  %159 = vadd.xlane.f32.xlu0 %v109_v4  ;;  %v114_v10 = vmul.f32 %v1224_v8, %v1224_v8  ;;  %v115_v15 = vmul.f32 %v1241_v13, %v1241_v13  ;;  %v17_v16 = vld [vmem:[%s2038_s0 + $0x48] sm:$0xff]  ;;  %v117_v19 = vmul.f32 %v16_v17, %v16_v17  ;;  %v19_v20 = vld [vmem:[%s2038_s0 + $0x58] sm:$0xff]  ;;  %v18_v21 = vld [vmem:[%s2038_s0 + $0x50] sm:$0xff] }
   0x5   :  { %v118_v18 = vmul.f32 %v17_v16, %v17_v16  ;;  %v120_v22 = vmul.f32 %v19_v20, %v19_v20  ;;  %v119_v23 = vmul.f32 %v18_v21, %v18_v21  ;;  %v21_v24 = vld [vmem:[%s2038_s0 + $0x68] sm:$0xff]  ;;  %v20_v25 = vld [vmem:[%s2038_s0 + $0x60] sm:$0xff]  ;;  %v23_v28 = vld [vmem:[%s2038_s0 + $0x78] sm:$0xff] }
   0x6   :  { %v122_v26 = vmul.f32 %v21_v24, %v21_v24  ;;  %v121_v27 = vmul.f32 %v20_v25, %v20_v25  ;;  %v22_v29 = vld [vmem:[%s2038_s0 + $0x70] sm:$0xff]  ;;  %v124_v30 = vmul.f32 %v23_v28, %v23_v28  ;;  %v25_v32 = vld [vmem:[%s2038_s0 + $0x88] sm:$0xff]  ;;  %v24_v33 = vld [vmem:[%s2038_s0 + $0x80] sm:$0xff] }
   0x7   :  { %v123_v31 = vmul.f32 %v22_v29, %v22_v29  ;;  %v126_v34 = vmul.f32 %v25_v32, %v25_v32  ;;  %v125_v35 = vmul.f32 %v24_v33, %v24_v33  ;;  %v27_v36 = vld [vmem:[%s2038_s0 + $0x98] sm:$0xff]  ;;  %v26_v37 = vld [vmem:[%s2038_s0 + $0x90] sm:$0xff]  ;;  %v29_v40 = vld [vmem:[%s2038_s0 + $0xa8] sm:$0xff] }
   0x8   :  { %165 = vadd.xlane.f32.xlu1 %v112_v6  ;;  %161 = vadd.xlane.f32.xlu0 %v110_v7  ;;  %v128_v38 = vmul.f32 %v27_v36, %v27_v36  ;;  %v127_v39 = vmul.f32 %v26_v37, %v26_v37  ;;  %v28_v41 = vld [vmem:[%s2038_s0 + $0xa0] sm:$0xff]  ;;  %v130_v42 = vmul.f32 %v29_v40, %v29_v40  ;;  %v31_v44 = vld [vmem:[%s2038_s0 + $0xb8] sm:$0xff]  ;;  %v30_v45 = vld [vmem:[%s2038_s0 + $0xb0] sm:$0xff] }
   0x9   :  { %v129_v43 = vmul.f32 %v28_v41, %v28_v41  ;;  %v132_v46 = vmul.f32 %v31_v44, %v31_v44  ;;  %v131_v47 = vmul.f32 %v30_v45, %v30_v45  ;;  %v1296_v48 = vld [vmem:[%s2038_s0 + $0xd0] sm:$0xff]  ;;  %v1301_v49 = vld [vmem:[%s2038_s0 + $0xc8] sm:$0xff]  ;;  %v1310_v52 = vld [vmem:[%s2038_s0 + $0x198] sm:$0xff] }
   0xa   :  { %v135_v50 = vmul.f32 %v1296_v48, %v1296_v48  ;;  %v134_v51 = vmul.f32 %v1301_v49, %v1301_v49  ;;  %v1315_v53 = vld [vmem:[%s2038_s0 + $0x190] sm:$0xff]  ;;  %v360_v54 = vmul.f32 %v1310_v52, %v1310_v52  ;;  %v1324_v56 = vld [vmem:[%s2038_s0 + $0x260] sm:$0xff]  ;;  %v1329_v57 = vld [vmem:[%s2038_s0 + $0x258] sm:$0xff] }
   0xb   :  { %v359_v55 = vmul.f32 %v1315_v53, %v1315_v53  ;;  %v385_v58 = vmul.f32 %v1324_v56, %v1324_v56  ;;  %v384_v59 = vmul.f32 %v1329_v57, %v1329_v57  ;;  %v1338_v60 = vld [vmem:[%s2038_s0 + $0x1a0] sm:$0xff]  ;;  %v1343_v61 = vld [vmem:[%s2038_s0 + $0xd8] sm:$0xff]  ;;  %v1357_v4 = vld [vmem:[%s2038_s0 + $0x268] sm:$0xff] }
   0xc   :  { %169 = vadd.xlane.f32.xlu1 %v114_v10  ;;  %167 = vadd.xlane.f32.xlu0 %v113_v11  ;;  %v361_v62 = vmul.f32 %v1338_v60, %v1338_v60  ;;  %v136_v63 = vmul.f32 %v1343_v61, %v1343_v61  ;;  %v1352_v3 = vld [vmem:[%s2038_s0 + $0xe0] sm:$0xff]  ;;  %v386_v7 = vmul.f32 %v1357_v4, %v1357_v4  ;;  %v1366_v10 = vld [vmem:[%s2038_s0 + $0x270] sm:$0xff]  ;;  %v1371_v11 = vld [vmem:[%s2038_s0 + $0x1a8] sm:$0xff] }
   0xd   :  { %v137_v6 = vmul.f32 %v1352_v3, %v1352_v3  ;;  %v387_v12 = vmul.f32 %v1366_v10, %v1366_v10  ;;  %v1385_v16 = vld [vmem:[%s2038_s0 + $0xe8] sm:$0xff]  ;;  %v1399_v20 = vld [vmem:[%s2038_s0 + $0x278] sm:$0xff] }
   0xe   :  { %v1413_v24 = vld [vmem:[%s2038_s0 + $0x1b8] sm:$0xff]  ;;  %v1441_v32 = vld [vmem:[%s2038_s0 + $0x288] sm:$0xff] }
   0xf   :  { %v1427_v28 = vld [vmem:[%s2038_s0 + $0xf8] sm:$0xff]  ;;  %v1455_v36 = vld [vmem:[%s2038_s0 + $0x1c8] sm:$0xff] }
  0x10   :  { %173 = vadd.xlane.f32.xlu1 %v116_v14  ;;  %171 = vadd.xlane.f32.xlu0 %v115_v15  ;;  %v362_v14 = vmul.f32 %v1371_v11, %v1371_v11  ;;  %v1380_v15 = vld [vmem:[%s2038_s0 + $0x1b0] sm:$0xff]  ;;  %v1469_v40 = vld [vmem:[%s2038_s0 + $0x108] sm:$0xff]  ;;  %v1483_v44 = vld [vmem:[%s2038_s0 + $0x298] sm:$0xff] }
  0x11   :  { %v363_v17 = vmul.f32 %v1380_v15, %v1380_v15 }
  0x14   :  { %177 = vadd.xlane.f32.xlu1 %v118_v18  ;;  %175 = vadd.xlane.f32.xlu0 %v117_v19  ;;  %v138_v18 = vmul.f32 %v1385_v16, %v1385_v16  ;;  %v1394_v19 = vld [vmem:[%s2038_s0 + $0xf0] sm:$0xff] }
  0x15   :  { %v139_v21 = vmul.f32 %v1394_v19, %v1394_v19 }
  0x18   :  { %181 = vadd.xlane.f32.xlu1 %v120_v22  ;;  %179 = vadd.xlane.f32.xlu0 %v119_v23  ;;  %v388_v22 = vmul.f32 %v1399_v20, %v1399_v20  ;;  %v1408_v23 = vld [vmem:[%s2038_s0 + $0x280] sm:$0xff] }
  0x19   :  { %v389_v25 = vmul.f32 %v1408_v23, %v1408_v23 }
  0x1c   :  { %185 = vadd.xlane.f32.xlu1 %v122_v26  ;;  %183 = vadd.xlane.f32.xlu0 %v121_v27  ;;  %v364_v26 = vmul.f32 %v1413_v24, %v1413_v24  ;;  %v1422_v27 = vld [vmem:[%s2038_s0 + $0x1c0] sm:$0xff] }
  0x1d   :  { %v365_v29 = vmul.f32 %v1422_v27, %v1422_v27 }
  0x20   :  { %189 = vadd.xlane.f32.xlu1 %v124_v30  ;;  %187 = vadd.xlane.f32.xlu0 %v123_v31  ;;  %v140_v30 = vmul.f32 %v1427_v28, %v1427_v28  ;;  %v1436_v31 = vld [vmem:[%s2038_s0 + $0x100] sm:$0xff] }
  0x21   :  { %v141_v33 = vmul.f32 %v1436_v31, %v1436_v31 }
  0x24   :  { %193 = vadd.xlane.f32.xlu1 %v126_v34  ;;  %191 = vadd.xlane.f32.xlu0 %v125_v35  ;;  %v390_v34 = vmul.f32 %v1441_v32, %v1441_v32  ;;  %v1450_v35 = vld [vmem:[%s2038_s0 + $0x290] sm:$0xff] }
  0x25   :  { %v391_v37 = vmul.f32 %v1450_v35, %v1450_v35 }
  0x28   :  { %197 = vadd.xlane.f32.xlu1 %v128_v38  ;;  %195 = vadd.xlane.f32.xlu0 %v127_v39  ;;  %v366_v38 = vmul.f32 %v1455_v36, %v1455_v36  ;;  %v1464_v39 = vld [vmem:[%s2038_s0 + $0x1d0] sm:$0xff] }
  0x29   :  { %v367_v41 = vmul.f32 %v1464_v39, %v1464_v39 }
  0x2c   :  { %201 = vadd.xlane.f32.xlu1 %v130_v42  ;;  %199 = vadd.xlane.f32.xlu0 %v129_v43  ;;  %v142_v42 = vmul.f32 %v1469_v40, %v1469_v40  ;;  %v1478_v43 = vld [vmem:[%s2038_s0 + $0x110] sm:$0xff] }
  0x2d   :  { %2052 = vst [vmem:[#allocation2_spill] sm:$0xff] %v1478_v43  ;;  %v143_v45 = vmul.f32 %v1478_v43, %v1478_v43 }
  0x30   :  { %205 = vadd.xlane.f32.xlu1 %v132_v46  ;;  %203 = vadd.xlane.f32.xlu0 %v131_v47  ;;  %v392_v46 = vmul.f32 %v1483_v44, %v1483_v44  ;;  %v1492_v47 = vld [vmem:[%s2038_s0 + $0x2a0] sm:$0xff] }
  0x31   :  { %2053 = vst [vmem:[#allocation3_spill] sm:$0xff] %v1492_v47 }
  0x34   :  { %211 = vadd.xlane.f32.xlu1 %v135_v50  ;;  %209 = vadd.xlane.f32.xlu0 %v134_v51  ;;  %v1497_v50 = vld [vmem:[%s2038_s0 + $0x1d8] sm:$0xff]  ;;  %v393_v51 = vmul.f32 %v1492_v47, %v1492_v47 }
  0x35   :  { %2054 = vst [vmem:[#allocation4_spill] sm:$0xff] %v1497_v50 }
  0x38   :  { %411 = vadd.xlane.f32.xlu1 %v360_v54  ;;  %409 = vadd.xlane.f32.xlu0 %v359_v55  ;;  %v368_v54 = vmul.f32 %v1497_v50, %v1497_v50  ;;  %v1506_v55 = vld [vmem:[%s2038_s0 + $0x1e0] sm:$0xff] }
  0x39   :  { %2055 = vst [vmem:[#allocation5_spill] sm:$0xff] %v1506_v55 }
  0x3c   :  { %461 = vadd.xlane.f32.xlu1 %v385_v58  ;;  %459 = vadd.xlane.f32.xlu0 %v384_v59  ;;  %v43_v58 = vld [vmem:[%s2038_s0 + $0x118] sm:$0xff]  ;;  %v369_v59 = vmul.f32 %v1506_v55, %v1506_v55 }
  0x40   :  { %413 = vadd.xlane.f32.xlu1 %v361_v62  ;;  %213 = vadd.xlane.f32.xlu0 %v136_v63  ;;  %v144_v62 = vmul.f32 %v43_v58, %v43_v58  ;;  %v44_v63 = vld [vmem:[%s2038_s0 + $0x120] sm:$0xff] }
  0x44   :  { %215 = vadd.xlane.f32.xlu1 %v137_v6  ;;  %463 = vadd.xlane.f32.xlu0 %v386_v7  ;;  %v914_v6 = vld [vmem:[%s2038_s0 + $0x2a8] sm:$0xff]  ;;  %v145_v7 = vmul.f32 %v44_v63, %v44_v63 }
  0x48   :  { %465 = vadd.xlane.f32.xlu1 %v387_v12  ;;  %415 = vadd.xlane.f32.xlu0 %v362_v14  ;;  %v394_v12 = vmul.f32 %v914_v6, %v914_v6  ;;  %v915_v14 = vld [vmem:[%s2038_s0 + $0x2b0] sm:$0xff] }
  0x4c   :  { %417 = vadd.xlane.f32.xlu1 %v363_v17  ;;  %217 = vadd.xlane.f32.xlu0 %v138_v18  ;;  %v1525_v17 = vld [vmem:[%s2038_s0 + $0x1e8] sm:$0xff]  ;;  %v395_v18 = vmul.f32 %v915_v14, %v915_v14 }
  0x4d   :  { %2056 = vst [vmem:[#allocation6_spill] sm:$0xff] %v1525_v17 }
  0x50   :  { %219 = vadd.xlane.f32.xlu1 %v139_v21  ;;  %467 = vadd.xlane.f32.xlu0 %v388_v22  ;;  %v370_v21 = vmul.f32 %v1525_v17, %v1525_v17  ;;  %v1532_v22 = vld [vmem:[%s2038_s0 + $0x1f0] sm:$0xff] }
  0x51   :  { %2057 = vst [vmem:[#allocation7_spill] sm:$0xff] %v1532_v22 }
  0x54   :  { %469 = vadd.xlane.f32.xlu1 %v389_v25  ;;  %419 = vadd.xlane.f32.xlu0 %v364_v26  ;;  %v45_v25 = vld [vmem:[%s2038_s0 + $0x128] sm:$0xff]  ;;  %v371_v26 = vmul.f32 %v1532_v22, %v1532_v22 }
  0x58   :  { %421 = vadd.xlane.f32.xlu1 %v365_v29  ;;  %221 = vadd.xlane.f32.xlu0 %v140_v30  ;;  %v146_v29 = vmul.f32 %v45_v25, %v45_v25  ;;  %v46_v30 = vld [vmem:[%s2038_s0 + $0x130] sm:$0xff]  ;;  %v49_v25 = vld [vmem:[%s2038_s0 + $0x148] sm:$0xff] }
  0x5c   :  { %223 = vadd.xlane.f32.xlu1 %v141_v33  ;;  %471 = vadd.xlane.f32.xlu0 %v390_v34  ;;  %v916_v33 = vld [vmem:[%s2038_s0 + $0x2b8] sm:$0xff]  ;;  %v147_v34 = vmul.f32 %v46_v30, %v46_v30 }
  0x60   :  { %473 = vadd.xlane.f32.xlu1 %v391_v37  ;;  %423 = vadd.xlane.f32.xlu0 %v366_v38  ;;  %v396_v37 = vmul.f32 %v916_v33, %v916_v33  ;;  %v917_v38 = vld [vmem:[%s2038_s0 + $0x2c0] sm:$0xff] }
  0x64   :  { %425 = vadd.xlane.f32.xlu1 %v367_v41  ;;  %225 = vadd.xlane.f32.xlu0 %v142_v42  ;;  %v1551_v41 = vld [vmem:[%s2038_s0 + $0x1f8] sm:$0xff]  ;;  %v397_v42 = vmul.f32 %v917_v38, %v917_v38 }
  0x65   :  { %2058 = vst [vmem:[#allocation8_spill] sm:$0xff] %v1551_v41 }
  0x68   :  { %227 = vadd.xlane.f32.xlu1 %v143_v45  ;;  %475 = vadd.xlane.f32.xlu0 %v392_v46  ;;  %v372_v45 = vmul.f32 %v1551_v41, %v1551_v41  ;;  %v1558_v46 = vld [vmem:[%s2038_s0 + $0x200] sm:$0xff] }
  0x69   :  { %2059 = vst [vmem:[#allocation9_spill] sm:$0xff] %v1558_v46 }
  0x6c   :  { %477 = vadd.xlane.f32.xlu1 %v393_v51  ;;  %427 = vadd.xlane.f32.xlu0 %v368_v54  ;;  %v47_v51 = vld [vmem:[%s2038_s0 + $0x138] sm:$0xff]  ;;  %v373_v54 = vmul.f32 %v1558_v46, %v1558_v46 }
  0x6d   :  { %v148_v58 = vmul.f32 %v47_v51, %v47_v51 }
  0x70   :  { %429 = vadd.xlane.f32.xlu1 %v369_v59  ;;  %229 = vadd.xlane.f32.xlu0 %v144_v62  ;;  %v48_v59 = vld [vmem:[%s2038_s0 + $0x140] sm:$0xff]  ;;  %v918_v62 = vld [vmem:[%s2038_s0 + $0x2c8] sm:$0xff] }
  0x71   :  { %v149_v63 = vmul.f32 %v48_v59, %v48_v59  ;;  %v398_v6 = vmul.f32 %v918_v62, %v918_v62 }
  0x74   :  { %231 = vadd.xlane.f32.xlu1 %v145_v7  ;;  %479 = vadd.xlane.f32.xlu0 %v394_v12  ;;  %v919_v7 = vld [vmem:[%s2038_s0 + $0x2d0] sm:$0xff]  ;;  %v1577_v12 = vld [vmem:[%s2038_s0 + $0x208] sm:$0xff] }
  0x75   :  { %2060 = vst [vmem:[#allocation10_spill] sm:$0xff] %v1577_v12  ;;  %v399_v14 = vmul.f32 %v919_v7, %v919_v7  ;;  %v1622_v7 = vld [vmem:[%s2038_s0 + $0x220] sm:$0xff] }
  0x76   :  { %2063 = vst [vmem:[#allocation13_spill] sm:$0xff] %v1622_v7 }
  0x78   :  { %481 = vadd.xlane.f32.xlu1 %v395_v18  ;;  %431 = vadd.xlane.f32.xlu0 %v370_v21  ;;  %v374_v18 = vmul.f32 %v1577_v12, %v1577_v12  ;;  %v1584_v21 = vld [vmem:[%s2038_s0 + $0x210] sm:$0xff] }
  0x79   :  { %2061 = vst [vmem:[#allocation11_spill] sm:$0xff] %v1584_v21 }
  0x7c   :  { %433 = vadd.xlane.f32.xlu1 %v371_v26  ;;  %233 = vadd.xlane.f32.xlu0 %v146_v29  ;;  %v375_v26 = vmul.f32 %v1584_v21, %v1584_v21  ;;  %v150_v29 = vmul.f32 %v49_v25, %v49_v25 }
  0x80   :  { %235 = vadd.xlane.f32.xlu1 %v147_v34  ;;  %483 = vadd.xlane.f32.xlu0 %v396_v37  ;;  %v50_v34 = vld [vmem:[%s2038_s0 + $0x150] sm:$0xff]  ;;  %v920_v37 = vld [vmem:[%s2038_s0 + $0x2d8] sm:$0xff] }
  0x81   :  { %v151_v38 = vmul.f32 %v50_v34, %v50_v34  ;;  %v52_v34 = vld [vmem:[%s2038_s0 + $0x160] sm:$0xff] }
  0x84   :  { %485 = vadd.xlane.f32.xlu1 %v397_v42  ;;  %435 = vadd.xlane.f32.xlu0 %v372_v45  ;;  %v400_v42 = vmul.f32 %v920_v37, %v920_v37  ;;  %v922_v37 = vld [vmem:[%s2038_s0 + $0x2e8] sm:$0xff] }
  0x88   :  { %437 = vadd.xlane.f32.xlu1 %v373_v54  ;;  %237 = vadd.xlane.f32.xlu0 %v148_v58  ;;  %v921_v54 = vld [vmem:[%s2038_s0 + $0x2e0] sm:$0xff]  ;;  %v1611_v58 = vld [vmem:[%s2038_s0 + $0x218] sm:$0xff] }
  0x89   :  { %2062 = vst [vmem:[#allocation12_spill] sm:$0xff] %v1611_v58  ;;  %v401_v59 = vmul.f32 %v921_v54, %v921_v54  ;;  %v376_v62 = vmul.f32 %v1611_v58, %v1611_v58 }
  0x8c   :  { %239 = vadd.xlane.f32.xlu1 %v149_v63  ;;  %487 = vadd.xlane.f32.xlu0 %v398_v6 }
  0x90   :  { %489 = vadd.xlane.f32.xlu1 %v399_v14  ;;  %439 = vadd.xlane.f32.xlu0 %v374_v18  ;;  %v51_v14 = vld [vmem:[%s2038_s0 + $0x158] sm:$0xff]  ;;  %v377_v18 = vmul.f32 %v1622_v7, %v1622_v7 }
  0x91   :  { %v1591_v30 = vpop.xlane.xlu1 %163  ;;  %v1593_v33 = vpop.xlane.xlu0 %159  ;;  %v152_v25 = vmul.f32 %v51_v14, %v51_v14  ;;  %v898_v14 = vld [vmem:[%s2038_s0 + $0x228] sm:$0xff] }
  0x92   :  { %v378_v58 = vmul.f32 %v898_v14, %v898_v14  ;;  %v924_v14 = vld [vmem:[%s2038_s0 + $0x2f8] sm:$0xff] }
  0x93   :  { %v404_v41 = vmul.f32 %v924_v14, %v924_v14  ;;  %v55_v14 = vld [vmem:[%s2038_s0 + $0x178] sm:$0xff] }
  0x94   :  { %441 = vadd.xlane.f32.xlu1 %v375_v26  ;;  %241 = vadd.xlane.f32.xlu0 %v150_v29 }
  0x95   :  { %v1601_v45 = vpop.xlane.xlu1 %165  ;;  %v1603_v51 = vpop.xlane.xlu0 %161 }
  0x98   :  { %243 = vadd.xlane.f32.xlu1 %v151_v38  ;;  %491 = vadd.xlane.f32.xlu0 %v400_v42  ;;  %v153_v38 = vmul.f32 %v52_v34, %v52_v34  ;;  %v402_v42 = vmul.f32 %v922_v37, %v922_v37  ;;  %v899_v34 = vld [vmem:[%s2038_s0 + $0x230] sm:$0xff]  ;;  %v53_v37 = vld [vmem:[%s2038_s0 + $0x168] sm:$0xff] }
  0x99   :  { %v1615_v63 = vpop.xlane.xlu1 %169  ;;  %v1617_v6 = vpop.xlane.xlu0 %167  ;;  %v379_v21 = vmul.f32 %v899_v34, %v899_v34  ;;  %v154_v12 = vmul.f32 %v53_v37, %v53_v37  ;;  %v925_v34 = vld [vmem:[%s2038_s0 + $0x300] sm:$0xff]  ;;  %v900_v37 = vld [vmem:[%s2038_s0 + $0x238] sm:$0xff] }
  0x9a   :  { %v405_v22 = vmul.f32 %v925_v34, %v925_v34  ;;  %v380_v17 = vmul.f32 %v900_v37, %v900_v37  ;;  %v56_v34 = vld [vmem:[%s2038_s0 + $0x180] sm:$0xff]  ;;  %v926_v37 = vld [vmem:[%s2038_s0 + $0x308] sm:$0xff] }
  0x9c   :  { %493 = vadd.xlane.f32.xlu1 %v401_v59  ;;  %443 = vadd.xlane.f32.xlu0 %v376_v62  ;;  %v923_v62 = vld [vmem:[%s2038_s0 + $0x2f0] sm:$0xff] }
  0x9d   :  { %v1629_v26 = vpop.xlane.xlu1 %173  ;;  %v1631_v29 = vpop.xlane.xlu0 %171  ;;  %v403_v7 = vmul.f32 %v923_v62, %v923_v62  ;;  %v54_v62 = vld [vmem:[%s2038_s0 + $0x170] sm:$0xff] }
  0x9e   :  { %v155_v46 = vmul.f32 %v54_v62, %v54_v62  ;;  %v901_v62 = vld [vmem:[%s2038_s0 + $0x240] sm:$0xff] }
  0xa0   :  { %445 = vadd.xlane.f32.xlu1 %v377_v18  ;;  %245 = vadd.xlane.f32.xlu0 %v152_v25 }
  0xa1   :  { %v1639_v54 = vpop.xlane.xlu1 %177  ;;  %v1641_v59 = vpop.xlane.xlu0 %175 }
  0xa4   :  { %247 = vadd.xlane.f32.xlu1 %v153_v38  ;;  %495 = vadd.xlane.f32.xlu0 %v402_v42 }
  0xa5   :  { %v1649_v18 = vpop.xlane.xlu1 %181  ;;  %v1651_v25 = vpop.xlane.xlu0 %179 }
  0xa8   :  { %497 = vadd.xlane.f32.xlu1 %v403_v7  ;;  %447 = vadd.xlane.f32.xlu0 %v378_v58 }
  0xa9   :  { %v1659_v38 = vpop.xlane.xlu1 %185  ;;  %v1661_v42 = vpop.xlane.xlu0 %183 }
  0xaa   :  { %2064 = vst [vmem:[#allocation14_spill] sm:$0xff] %v1659_v38 }
  0xac   :  { %449 = vadd.xlane.f32.xlu1 %v379_v21  ;;  %249 = vadd.xlane.f32.xlu0 %v154_v12 }
  0xad   :  { %v1669_v7 = vpop.xlane.xlu1 %189  ;;  %v1671_v58 = vpop.xlane.xlu0 %187 }
  0xae   :  { %2065 = vst [vmem:[#allocation15_spill] sm:$0xff] %v1669_v7  ;;  %2066 = vst [vmem:[#allocation16_spill] sm:$0xff] %v1671_v58  ;;  %v381_v7 = vmul.f32 %v901_v62, %v901_v62  ;;  %v156_v58 = vmul.f32 %v55_v14, %v55_v14  ;;  %v927_v62 = vld [vmem:[%s2038_s0 + $0x310] sm:$0xff]  ;;  %v902_v14 = vld [vmem:[%s2038_s0 + $0x248] sm:$0xff] }
  0xb0   :  { %251 = vadd.xlane.f32.xlu1 %v155_v46  ;;  %499 = vadd.xlane.f32.xlu0 %v404_v41 }
  0xb1   :  { %v1679_v21 = vpop.xlane.xlu1 %193  ;;  %v1681_v12 = vpop.xlane.xlu0 %191 }
  0xb2   :  { %2067 = vst [vmem:[#allocation17_spill] sm:$0xff] %v1679_v21  ;;  %2068 = vst [vmem:[#allocation18_spill] sm:$0xff] %v1681_v12  ;;  %v157_v21 = vmul.f32 %v56_v34, %v56_v34  ;;  %v406_v12 = vmul.f32 %v926_v37, %v926_v37  ;;  %v57_v34 = vld [vmem:[%s2038_s0 + $0x188] sm:$0xff]  ;;  %v32_v37 = vld [vmem:[%s2038_s0 + $0xc0] sm:$0xff] }
  0xb4   :  { %501 = vadd.xlane.f32.xlu1 %v405_v22  ;;  %451 = vadd.xlane.f32.xlu0 %v380_v17 }
  0xb5   :  { %v1689_v46 = vpop.xlane.xlu1 %197  ;;  %v1691_v41 = vpop.xlane.xlu0 %195 }
  0xb6   :  { %2069 = vst [vmem:[#allocation19_spill] sm:$0xff] %v1689_v46  ;;  %2070 = vst [vmem:[#allocation20_spill] sm:$0xff] %v1691_v41  ;;  %v407_v46 = vmul.f32 %v927_v62, %v927_v62  ;;  %v382_v41 = vmul.f32 %v902_v14, %v902_v14  ;;  %v928_v62 = vld [vmem:[%s2038_s0 + $0x318] sm:$0xff]  ;;  %v903_v14 = vld [vmem:[%s2038_s0 + $0x250] sm:$0xff] }
  0xb8   :  { %453 = vadd.xlane.f32.xlu1 %v381_v7  ;;  %253 = vadd.xlane.f32.xlu0 %v156_v58 }
  0xb9   :  { %v1699_v22 = vpop.xlane.xlu1 %201  ;;  %v1701_v17 = vpop.xlane.xlu0 %199 }
  0xba   :  { %2071 = vst [vmem:[#allocation21_spill] sm:$0xff] %v1699_v22  ;;  %2072 = vst [vmem:[#allocation22_spill] sm:$0xff] %v1701_v17  ;;  %v158_v17 = vmul.f32 %v57_v34, %v57_v34  ;;  %v133_v22 = vmul.f32 %v32_v37, %v32_v37 }
  0xbc   :  { %255 = vadd.xlane.f32.xlu1 %v157_v21  ;;  %503 = vadd.xlane.f32.xlu0 %v406_v12 }
  0xbd   :  { %v1709_v7 = vpop.xlane.xlu1 %205  ;;  %v1711_v58 = vpop.xlane.xlu0 %203 }
  0xbe   :  { %2073 = vst [vmem:[#allocation23_spill] sm:$0xff] %v1709_v7  ;;  %2074 = vst [vmem:[#allocation24_spill] sm:$0xff] %v1711_v58  ;;  %v260_v7 = vadd.f32 1e-20, %v1603_v51  ;;  %v259_v58 = vadd.f32 1e-20, %v1593_v33 }
  0xbf   :  { %v261_v33 = vadd.f32 1e-20, %v1591_v30 }
  0xc0   :  { %505 = vadd.xlane.f32.xlu1 %v407_v46  ;;  %455 = vadd.xlane.f32.xlu0 %v382_v41  ;;  %v408_v46 = vmul.f32 %v928_v62, %v928_v62  ;;  %v383_v41 = vmul.f32 %v903_v14, %v903_v14  ;;  %929 = vrsqrt.f32 %v260_v7 }
  0xc1   :  { %v212_v21 = vpop.xlane.xlu1 %211  ;;  %v210_v12 = vpop.xlane.xlu0 %209  ;;  %931 = vrsqrt.f32 %v259_v58 }
  0xc2   :  { %v285_v38 = vadd.f32 1e-20, %v212_v21  ;;  %v284_v47 = vadd.f32 1e-20, %v210_v12 }
  0xc4   :  { %257 = vadd.xlane.f32.xlu1 %v158_v17  ;;  %207 = vadd.xlane.f32.xlu0 %v133_v22 }
  0xc5   :  { %v412_v34 = vpop.xlane.xlu1 %411  ;;  %v410_v37 = vpop.xlane.xlu0 %409 }
  0xc6   :  { %v510_v55 = vadd.f32 1e-20, %v412_v34  ;;  %v509_v50 = vadd.f32 1e-20, %v410_v37 }
  0xc8   :  { %933 = vrsqrt.f32 %v510_v55  ;;  %507 = vadd.xlane.f32.xlu1 %v408_v46  ;;  %457 = vadd.xlane.f32.xlu0 %v383_v41 }
  0xc9   :  { %935 = vrsqrt.f32 %v509_v50  ;;  %v462_v43 = vpop.xlane.xlu1 %461  ;;  %v460_v51 = vpop.xlane.xlu0 %459 }
  0xca   :  { %937 = vrsqrt.f32 %v285_v38  ;;  %v535_v22 = vadd.f32 1e-20, %v462_v43  ;;  %v534_v17 = vadd.f32 1e-20, %v460_v51  ;;  %v930_v12 = vpop.eup %929  ;;  %v262_v43 = vadd.f32 1e-20, %v1601_v45 }
  0xcb   :  { %939 = vrsqrt.f32 %v284_v47  ;;  %v932_v55 = vpop.eup %931  ;;  %v610_v47 = vmul.f32 %v930_v12, %v1215_v5 }
  0xcc   :  { %941 = vrsqrt.f32 %v535_v22  ;;  %v609_v51 = vmul.f32 %v932_v55, %v1201_v1 }
  0xcd   :  { %943 = vrsqrt.f32 %v534_v17  ;;  %v414_v7 = vpop.xlane.xlu1 %413  ;;  %v214_v21 = vpop.xlane.xlu0 %213  ;;  %v263_v17 = vadd.f32 1e-20, %v1617_v6 }
  0xce   :  { %945 = vrsqrt.f32 %v261_v33  ;;  %v511_v62 = vadd.f32 1e-20, %v414_v7  ;;  %v286_v58 = vadd.f32 1e-20, %v214_v21 }
  0xd0   :  { %947 = vrsqrt.f32 %v511_v62 }
  0xd1   :  { %v216_v14 = vpop.xlane.xlu1 %215  ;;  %v464_v50 = vpop.xlane.xlu0 %463  ;;  %949 = vrsqrt.f32 %v286_v58 }
  0xd2   :  { %v934_v46 = vpop.eup %933  ;;  %v287_v41 = vadd.f32 1e-20, %v216_v14  ;;  %v536_v34 = vadd.f32 1e-20, %v464_v50 }
  0xd3   :  { %v936_v30 = vpop.eup %935  ;;  %v660_v38 = vmul.f32 %v934_v46, %v1310_v52 }
  0xd4   :  { %v938_v37 = vpop.eup %937  ;;  %v659_v33 = vmul.f32 %v936_v30, %v1315_v53  ;;  %951 = vrsqrt.f32 %v536_v34 }
  0xd5   :  { %v940_v22 = vpop.eup %939  ;;  %v710_v7 = vsub.f32 %v610_v47, %v660_v38  ;;  %v466_v21 = vpop.xlane.xlu1 %465  ;;  %953 = vrsqrt.f32 %v287_v41  ;;  %v635_v52 = vmul.f32 %v938_v37, %v1296_v48 }
  0xd6   :  { %v416_v62 = vpop.xlane.xlu0 %415  ;;  %v942_v14 = vpop.eup %941  ;;  %v709_v50 = vsub.f32 %v609_v51, %v659_v33  ;;  %v537_v45 = vadd.f32 1e-20, %v466_v21  ;;  %955 = vrsqrt.f32 %v262_v43  ;;  %v634_v55 = vmul.f32 %v940_v22, %v1301_v49 }
  0xd7   :  { %v512_v5 = vadd.f32 1e-20, %v416_v62  ;;  %v944_v12 = vpop.eup %943  ;;  %v760_v58 = vmul.f32 %v710_v7, %v710_v7  ;;  %v685_v1 = vmul.f32 %v942_v14, %v1324_v56 }
  0xd8   :  { %v946_v53 = vpop.eup %945  ;;  %v759_v6 = vmul.f32 %v709_v50, %v709_v50  ;;  %v684_v46 = vmul.f32 %v944_v12, %v1329_v57  ;;  %957 = vrsqrt.f32 %v537_v45 }
  0xd9   :  { %v735_v34 = vsub.f32 %v635_v52, %v685_v1  ;;  %959 = vrsqrt.f32 %v512_v5  ;;  %v418_v30 = vpop.xlane.xlu1 %417  ;;  %v611_v48 = vmul.f32 %v946_v53, %v1196_v0 }
  0xda   :  { %v218_v41 = vpop.xlane.xlu0 %217  ;;  %v948_v47 = vpop.eup %947  ;;  %961 = vrsqrt.f32 %v263_v17  ;;  %v809_v38 = vadd.f32 %v760_v58, %v759_v6  ;;  %v734_v43 = vsub.f32 %v634_v55, %v684_v46  ;;  %v513_v51 = vadd.f32 1e-20, %v418_v30 }
  0xdb   :  { %v785_v37 = vmul.f32 %v735_v34, %v735_v34  ;;  %v661_v56 = vmul.f32 %v948_v47, %v1338_v60  ;;  %v288_v33 = vadd.f32 1e-20, %v218_v41  ;;  %v950_v22 = vpop.eup %949  ;;  %v264_v17 = vadd.f32 1e-20, %v1615_v63 }
  0xdc   :  { %v784_v49 = vmul.f32 %v734_v43, %v734_v43  ;;  %963 = vrsqrt.f32 %v513_v51  ;;  %v636_v0 = vmul.f32 %v950_v22, %v1343_v61  ;;  %v265_v58 = vadd.f32 1e-20, %v1631_v29 }
  0xdd   :  { %v711_v57 = vsub.f32 %v611_v48, %v661_v56  ;;  %v220_v7 = vpop.xlane.xlu1 %219  ;;  %965 = vrsqrt.f32 %v288_v33 }
  0xde   :  { %v468_v21 = vpop.xlane.xlu0 %467  ;;  %v839_v62 = vadd.f32 %v785_v37, %v784_v49  ;;  %v289_v14 = vadd.f32 1e-20, %v220_v7  ;;  %v952_v45 = vpop.eup %951 }
  0xdf   :  { %v538_v50 = vadd.f32 1e-20, %v468_v21  ;;  %v761_v5 = vmul.f32 %v711_v57, %v711_v57  ;;  %v954_v12 = vpop.eup %953  ;;  %v686_v60 = vmul.f32 %v952_v45, %v1357_v4 }
  0xe0   :  { %v956_v52 = vpop.eup %955  ;;  %v637_v41 = vmul.f32 %v954_v12, %v1352_v3 }
  0xe1   :  { %v810_v1 = vadd.f32 %v809_v38, %v761_v5  ;;  %967 = vrsqrt.f32 %v538_v50  ;;  %v470_v53 = vpop.xlane.xlu1 %469  ;;  %v736_v46 = vsub.f32 %v636_v0, %v686_v60  ;;  %v612_v4 = vmul.f32 %v956_v52, %v1206_v2 }
  0xe2   :  { %v420_v55 = vpop.xlane.xlu0 %419  ;;  %v958_v6 = vpop.eup %957  ;;  %969 = vrsqrt.f32 %v289_v14  ;;  %v539_v34 = vadd.f32 1e-20, %v470_v53 }
  0xe3   :  { %v514_v30 = vadd.f32 1e-20, %v420_v55  ;;  %v960_v63 = vpop.eup %959  ;;  %971 = vrsqrt.f32 %v264_v17  ;;  %v687_v61 = vmul.f32 %v958_v6, %v1366_v10  ;;  %v786_v43 = vmul.f32 %v736_v46, %v736_v46 }
  0xe4   :  { %v962_v47 = vpop.eup %961  ;;  %v662_v29 = vmul.f32 %v960_v63, %v1371_v11  ;;  %973 = vrsqrt.f32 %v539_v34 }
  0xe5   :  { %v737_v38 = vsub.f32 %v637_v41, %v687_v61  ;;  %975 = vrsqrt.f32 %v514_v30  ;;  %v422_v51 = vpop.xlane.xlu1 %421  ;;  %v840_v56 = vadd.f32 %v839_v62, %v786_v43  ;;  %v613_v3 = vmul.f32 %v962_v47, %v1229_v9 }
  0xe6   :  { %v222_v48 = vpop.xlane.xlu0 %221  ;;  %v964_v37 = vpop.eup %963  ;;  %977 = vrsqrt.f32 %v265_v58  ;;  %v712_v33 = vsub.f32 %v612_v4, %v662_v29  ;;  %v515_v49 = vadd.f32 1e-20, %v422_v51  ;;  %v266_v62 = vadd.f32 1e-20, %v1629_v26 }
  0xe7   :  { %v787_v22 = vmul.f32 %v737_v38, %v737_v38  ;;  %v663_v10 = vmul.f32 %v964_v37, %v1380_v15  ;;  %v290_v57 = vadd.f32 1e-20, %v222_v48  ;;  %v966_v7 = vpop.eup %965  ;;  %v267_v58 = vadd.f32 1e-20, %v1641_v59 }
  0xe8   :  { %v762_v2 = vmul.f32 %v712_v33, %v712_v33  ;;  %979 = vrsqrt.f32 %v515_v49  ;;  %v638_v60 = vmul.f32 %v966_v7, %v1385_v16 }
  0xe9   :  { %v841_v11 = vadd.f32 %v840_v56, %v787_v22  ;;  %v713_v21 = vsub.f32 %v613_v3, %v663_v10  ;;  %v224_v14 = vpop.xlane.xlu1 %223  ;;  %981 = vrsqrt.f32 %v290_v57 }
  0xea   :  { %v472_v50 = vpop.xlane.xlu0 %471  ;;  %v811_v45 = vadd.f32 %v810_v1, %v762_v2  ;;  %v291_v17 = vadd.f32 1e-20, %v224_v14 }
  0xeb   :  { %v540_v5 = vadd.f32 1e-20, %v472_v50  ;;  %v968_v12 = vpop.eup %967  ;;  %v763_v0 = vmul.f32 %v713_v21, %v713_v21 }
  0xec   :  { %v970_v9 = vpop.eup %969  ;;  %v688_v15 = vmul.f32 %v968_v12, %v1399_v20 }
  0xed   :  { %v972_v52 = vpop.eup %971  ;;  %v812_v53 = vadd.f32 %v811_v45, %v763_v0  ;;  %983 = vrsqrt.f32 %v540_v5  ;;  %v474_v55 = vpop.xlane.xlu1 %473  ;;  %v639_v63 = vmul.f32 %v970_v9, %v1394_v19  ;;  %v269_v45 = vadd.f32 1e-20, %v1651_v25 }
  0xee   :  { %v424_v6 = vpop.xlane.xlu0 %423  ;;  %v974_v1 = vpop.eup %973  ;;  %v738_v46 = vsub.f32 %v638_v60, %v688_v15  ;;  %985 = vrsqrt.f32 %v291_v17  ;;  %v541_v34 = vadd.f32 1e-20, %v474_v55  ;;  %v614_v20 = vmul.f32 %v972_v52, %v1224_v8 }
  0xef   :  { %v516_v30 = vadd.f32 1e-20, %v424_v6  ;;  %v976_v26 = vpop.eup %975  ;;  %987 = vrsqrt.f32 %v266_v62  ;;  %v689_v16 = vmul.f32 %v974_v1, %v1408_v23 }
  0xf0   :  { %v978_v41 = vpop.eup %977  ;;  %v788_v61 = vmul.f32 %v738_v46, %v738_v46  ;;  %v664_v59 = vmul.f32 %v976_v26, %v1413_v24  ;;  %989 = vrsqrt.f32 %v541_v34 }
  0xf1   :  { %v739_v47 = vsub.f32 %v639_v63, %v689_v16  ;;  %991 = vrsqrt.f32 %v516_v30  ;;  %v426_v4 = vpop.xlane.xlu1 %425  ;;  %v615_v19 = vmul.f32 %v978_v41, %v1241_v13  ;;  %v1130_v30 = vld [vmem:[%s2038_s0 + $0x40] sm:$0xff] }
  0xf2   :  { %v226_v43 = vpop.xlane.xlu0 %225  ;;  %v980_v29 = vpop.eup %979  ;;  %993 = vrsqrt.f32 %v267_v58  ;;  %v842_v38 = vadd.f32 %v841_v11, %v788_v61  ;;  %v714_v51 = vsub.f32 %v614_v20, %v664_v59  ;;  %v517_v48 = vadd.f32 1e-20, %v426_v4 }
  0xf3   :  { %v789_v37 = vmul.f32 %v739_v47, %v739_v47  ;;  %v665_v23 = vmul.f32 %v980_v29, %v1422_v27  ;;  %v292_v56 = vadd.f32 1e-20, %v226_v43  ;;  %v982_v33 = vpop.eup %981  ;;  %v268_v11 = vadd.f32 1e-20, %v1639_v54 }
  0xf4   :  { %v764_v8 = vmul.f32 %v714_v51, %v714_v51  ;;  %995 = vrsqrt.f32 %v517_v48  ;;  %v640_v14 = vmul.f32 %v982_v33, %v1427_v28  ;;  %v270_v29 = vadd.f32 1e-20, %v1649_v18 }
  0xf5   :  { %v843_v24 = vadd.f32 %v842_v38, %v789_v37  ;;  %v715_v49 = vsub.f32 %v615_v19, %v665_v23  ;;  %v228_v3 = vpop.xlane.xlu1 %227  ;;  %997 = vrsqrt.f32 %v292_v56  ;;  %v271_v33 = vadd.f32 1e-20, %v1661_v42 }
  0xf6   :  { %v476_v22 = vpop.xlane.xlu0 %475  ;;  %v813_v10 = vadd.f32 %v812_v53, %v764_v8  ;;  %v293_v57 = vadd.f32 1e-20, %v228_v3 }
  0xf7   :  { %v542_v2 = vadd.f32 1e-20, %v476_v22  ;;  %v984_v7 = vpop.eup %983  ;;  %v765_v21 = vmul.f32 %v715_v49, %v715_v49  ;;  %v2075_v22 = vld [vmem:[#allocation2_spill] sm:$0xff] }
  0xf8   :  { %v986_v13 = vpop.eup %985  ;;  %v690_v27 = vmul.f32 %v984_v7, %v1441_v32  ;;  %v1129_v32 = vld [vmem:[%s2038_s0 + $0x38] sm:$0xff] }
  0xf9   :  { %v988_v50 = vpop.eup %987  ;;  %v814_v17 = vadd.f32 %v813_v10, %v765_v21  ;;  %999 = vrsqrt.f32 %v542_v2  ;;  %v478_v5 = vpop.xlane.xlu1 %477  ;;  %v641_v15 = vmul.f32 %v986_v13, %v1436_v31  ;;  %v2076_v10 = vld [vmem:[#allocation3_spill] sm:$0xff] }
  0xfa   :  { %v428_v12 = vpop.xlane.xlu0 %427  ;;  %v990_v62 = vpop.eup %989  ;;  %v740_v0 = vsub.f32 %v640_v14, %v690_v27  ;;  %1001 = vrsqrt.f32 %v293_v57  ;;  %v543_v9 = vadd.f32 1e-20, %v478_v5  ;;  %v616_v25 = vmul.f32 %v1129_v32, %v988_v50  ;;  %v1132_v5 = vld [vmem:[%s2038_s0 + $0x50] sm:$0xff] }
  0xfb   :  { %v518_v60 = vadd.f32 1e-20, %v428_v12  ;;  %v992_v54 = vpop.eup %991  ;;  %1003 = vrsqrt.f32 %v268_v11  ;;  %v691_v28 = vmul.f32 %v990_v62, %v1450_v35  ;;  %v2077_v11 = vld [vmem:[#allocation4_spill] sm:$0xff] }
  0xfc   :  { %v994_v52 = vpop.eup %993  ;;  %v790_v58 = vmul.f32 %v740_v0, %v740_v0  ;;  %v666_v53 = vmul.f32 %v992_v54, %v1455_v36  ;;  %1005 = vrsqrt.f32 %v543_v9  ;;  %v2078_v0 = vld [vmem:[#allocation5_spill] sm:$0xff] }
  0xfd   :  { %v741_v55 = vsub.f32 %v641_v15, %v691_v28  ;;  %1007 = vrsqrt.f32 %v518_v60  ;;  %v430_v6 = vpop.xlane.xlu1 %429  ;;  %v617_v26 = vmul.f32 %v1130_v30, %v994_v52 }
  0xfe   :  { %v1770_v1 = vpop.xlane.xlu0 %229  ;;  %v996_v46 = vpop.eup %995  ;;  %1009 = vrsqrt.f32 %v269_v45  ;;  %v844_v31 = vadd.f32 %v843_v24, %v790_v58  ;;  %v716_v34 = vsub.f32 %v616_v25, %v666_v53  ;;  %v519_v35 = vadd.f32 1e-20, %v430_v6  ;;  %v2079_v25 = vld [vmem:[#allocation14_spill] sm:$0xff] }
  0xff   :  { %v791_v63 = vmul.f32 %v741_v55, %v741_v55  ;;  %v667_v16 = vmul.f32 %v996_v46, %v1464_v39  ;;  %v998_v41 = vpop.eup %997  ;;  %v272_v58 = vadd.f32 1e-20, %v2079_v25 }
 0x100   :  { %v766_v36 = vmul.f32 %v716_v34, %v716_v34  ;;  %1011 = vrsqrt.f32 %v519_v35  ;;  %v642_v48 = vmul.f32 %v998_v41, %v1469_v40  ;;  %v1131_v40 = vld [vmem:[%s2038_s0 + $0x48] sm:$0xff]  ;;  %v2080_v34 = vld [vmem:[#allocation16_spill] sm:$0xff]  ;;  %v2081_v41 = vld [vmem:[#allocation6_spill] sm:$0xff] }
 0x101   :  { %v845_v20 = vadd.f32 %v844_v31, %v791_v63  ;;  %v717_v61 = vsub.f32 %v617_v26, %v667_v16  ;;  %v1776_v59 = vpop.xlane.xlu1 %231  ;;  %1013 = vrsqrt.f32 %v270_v29  ;;  %v273_v35 = vadd.f32 1e-20, %v2080_v34  ;;  %v1133_v16 = vld [vmem:[%s2038_s0 + $0x58] sm:$0xff] }
 0x102   :  { %v1778_v47 = vpop.xlane.xlu0 %479  ;;  %v815_v4 = vadd.f32 %v814_v17, %v766_v36 }
 0x103   :  { %v1000_v43 = vpop.eup %999  ;;  %v767_v38 = vmul.f32 %v717_v61, %v717_v61 }
 0x104   :  { %v1002_v51 = vpop.eup %1001  ;;  %v692_v19 = vmul.f32 %v1000_v43, %v1483_v44 }
 0x105   :  { %v1004_v39 = vpop.eup %1003  ;;  %v816_v37 = vadd.f32 %v815_v4, %v767_v38  ;;  %v1783_v23 = vpop.xlane.xlu1 %481  ;;  %v643_v18 = vmul.f32 %v1002_v51, %v2075_v22  ;;  %v1134_v51 = vld [vmem:[%s2038_s0 + $0x60] sm:$0xff] }
 0x106   :  { %v432_v56 = vpop.xlane.xlu0 %431  ;;  %v1006_v8 = vpop.eup %1005  ;;  %v742_v24 = vsub.f32 %v642_v48, %v692_v19  ;;  %v618_v44 = vmul.f32 %v1131_v40, %v1004_v39  ;;  %v2082_v19 = vld [vmem:[#allocation7_spill] sm:$0xff]  ;;  %v2084_v40 = vld [vmem:[#allocation18_spill] sm:$0xff] }
 0x107   :  { %v520_v49 = vadd.f32 1e-20, %v432_v56  ;;  %v1008_v3 = vpop.eup %1007  ;;  %v693_v57 = vmul.f32 %v1006_v8, %v2076_v10 }
 0x108   :  { %v1010_v2 = vpop.eup %1009  ;;  %v792_v7 = vmul.f32 %v742_v24, %v742_v24  ;;  %v668_v21 = vmul.f32 %v1008_v3, %v2077_v11 }
 0x109   :  { %v743_v13 = vsub.f32 %v643_v18, %v693_v57  ;;  %1015 = vrsqrt.f32 %v520_v49  ;;  %v434_v42 = vpop.xlane.xlu1 %433  ;;  %v619_v12 = vmul.f32 %v1132_v5, %v1010_v2  ;;  %v2083_v49 = vld [vmem:[#allocation15_spill] sm:$0xff] }
 0x10a   :  { %v1792_v14 = vpop.xlane.xlu0 %233  ;;  %v1012_v27 = vpop.eup %1011  ;;  %1017 = vrsqrt.f32 %v271_v33  ;;  %v846_v50 = vadd.f32 %v845_v20, %v792_v7  ;;  %v718_v45 = vsub.f32 %v618_v44, %v668_v21  ;;  %v521_v17 = vadd.f32 1e-20, %v434_v42 }
 0x10b   :  { %v793_v62 = vmul.f32 %v743_v13, %v743_v13  ;;  %v669_v9 = vmul.f32 %v1012_v27, %v2078_v0  ;;  %v1014_v55 = vpop.eup %1013  ;;  %v274_v3 = vadd.f32 1e-20, %v2083_v49  ;;  %v275_v44 = vadd.f32 1e-20, %v2084_v40  ;;  %v1135_v13 = vld [vmem:[%s2038_s0 + $0x68] sm:$0xff]  ;;  %v2085_v27 = vld [vmem:[#allocation8_spill] sm:$0xff] }
 0x10c   :  { %v768_v60 = vmul.f32 %v718_v45, %v718_v45  ;;  %1019 = vrsqrt.f32 %v521_v17  ;;  %v620_v36 = vmul.f32 %v1133_v16, %v1014_v55  ;;  %v1136_v0 = vld [vmem:[%s2038_s0 + $0x70] sm:$0xff]  ;;  %v294_v55 = vadd.f32 1e-20, %v1770_v1 }
 0x10d   :  { %v1798_v54 = vadd.f32 %v846_v50, %v793_v62  ;;  %v719_v15 = vsub.f32 %v619_v12, %v669_v9  ;;  %v1800_v28 = vpop.xlane.xlu1 %235  ;;  %1021 = vrsqrt.f32 %v272_v58  ;;  %v544_v58 = vadd.f32 1e-20, %v1778_v47 }
 0x10e   :  { %v1802_v52 = vpop.xlane.xlu0 %483  ;;  %v817_v32 = vadd.f32 %v816_v37, %v768_v60  ;;  %v2086_v60 = vld [vmem:[#allocation17_spill] sm:$0xff] }
 0x10f   :  { %v769_v53 = vmul.f32 %v719_v15, %v719_v15  ;;  %v276_v15 = vadd.f32 1e-20, %v2086_v60 }
 0x111   :  { %v818_v6 = vadd.f32 %v817_v32, %v769_v53  ;;  %v1805_v46 = vpop.xlane.xlu1 %485  ;;  %v2087_v32 = vld [vmem:[#allocation9_spill] sm:$0xff] }
 0x112   :  { %v436_v31 = vpop.xlane.xlu0 %435  ;;  %v547_v40 = vadd.f32 1e-20, %v1805_v46 }
 0x113   :  { %v522_v30 = vadd.f32 1e-20, %v436_v31  ;;  %v1016_v26 = vpop.eup %1015 }
 0x114   :  { %v1018_v63 = vpop.eup %1017  ;;  %v670_v20 = vmul.f32 %v1016_v26, %v2081_v41  ;;  %v2088_v26 = vld [vmem:[#allocation20_spill] sm:$0xff] }
 0x115   :  { %1023 = vrsqrt.f32 %v522_v30  ;;  %v438_v61 = vpop.xlane.xlu1 %437  ;;  %v621_v48 = vmul.f32 %v1134_v51, %v1018_v63  ;;  %v277_v63 = vadd.f32 1e-20, %v2088_v26  ;;  %v1137_v51 = vld [vmem:[%s2038_s0 + $0x78] sm:$0xff]  ;;  %v1141_v26 = vld [vmem:[%s2038_s0 + $0x2b0] sm:$0xff] }
 0x116   :  { %v1812_v4 = vpop.xlane.xlu0 %237  ;;  %v1020_v43 = vpop.eup %1019  ;;  %1025 = vrsqrt.f32 %v273_v35  ;;  %v720_v29 = vsub.f32 %v620_v36, %v670_v20  ;;  %v523_v38 = vadd.f32 1e-20, %v438_v61  ;;  %v545_v35 = vadd.f32 1e-20, %v1783_v23 }
 0x117   :  { %v671_v39 = vmul.f32 %v1020_v43, %v2082_v19  ;;  %v1022_v18 = vpop.eup %1021  ;;  %v295_v36 = vadd.f32 1e-20, %v1776_v59  ;;  %v2090_v59 = vld [vmem:[#allocation10_spill] sm:$0xff] }
 0x118   :  { %v770_v37 = vmul.f32 %v720_v29, %v720_v29  ;;  %1027 = vrsqrt.f32 %v523_v38  ;;  %v622_v42 = vmul.f32 %v1135_v13, %v1022_v18  ;;  %v2089_v29 = vld [vmem:[#allocation19_spill] sm:$0xff] }
 0x119   :  { %v721_v56 = vsub.f32 %v621_v48, %v671_v39  ;;  %v1818_v8 = vpop.xlane.xlu1 %239  ;;  %1029 = vrsqrt.f32 %v274_v3  ;;  %v278_v38 = vadd.f32 1e-20, %v2089_v29  ;;  %v2091_v39 = vld [vmem:[#allocation21_spill] sm:$0xff]  ;;  %v546_v3 = vadd.f32 1e-20, %v1802_v52  ;;  %v1143_v29 = vld [vmem:[%s2038_s0 + $0x90] sm:$0xff] }
 0x11a   :  { %v1820_v33 = vpop.xlane.xlu0 %487  ;;  %v819_v24 = vadd.f32 %v818_v6, %v770_v37  ;;  %v280_v37 = vadd.f32 1e-20, %v2091_v39  ;;  %v297_v52 = vadd.f32 1e-20, %v1800_v28 }
 0x11b   :  { %v771_v22 = vmul.f32 %v721_v56, %v721_v56  ;;  %v548_v60 = vadd.f32 1e-20, %v1820_v33  ;;  %v1140_v33 = vld [vmem:[%s2038_s0 + $0x118] sm:$0xff] }
 0x11d   :  { %v820_v10 = vadd.f32 %v819_v24, %v771_v22  ;;  %v1823_v57 = vpop.xlane.xlu1 %489 }
 0x11e   :  { %v440_v2 = vpop.xlane.xlu0 %439 }
 0x11f   :  { %v524_v7 = vadd.f32 1e-20, %v440_v2  ;;  %v1024_v11 = vpop.eup %1023 }
 0x120   :  { %v1026_v21 = vpop.eup %1025  ;;  %v672_v50 = vmul.f32 %v1024_v11, %v2085_v27  ;;  %v296_v11 = vadd.f32 1e-20, %v1792_v14  ;;  %v298_v14 = vadd.f32 1e-20, %v1812_v4  ;;  %v549_v4 = vadd.f32 1e-20, %v1823_v57 }
 0x121   :  { %1031 = vrsqrt.f32 %v524_v7  ;;  %v442_v45 = vpop.xlane.xlu1 %441  ;;  %v623_v9 = vmul.f32 %v1136_v0, %v1026_v21 }
 0x122   :  { %v1830_v17 = vpop.xlane.xlu0 %241  ;;  %v1028_v5 = vpop.eup %1027  ;;  %1033 = vrsqrt.f32 %v275_v44  ;;  %v722_v12 = vsub.f32 %v622_v42, %v672_v50  ;;  %v525_v62 = vadd.f32 1e-20, %v442_v45  ;;  %v2092_v44 = vld [vmem:[#allocation11_spill] sm:$0xff] }
 0x123   :  { %v673_v25 = vmul.f32 %v1028_v5, %v2087_v32  ;;  %v1030_v47 = vpop.eup %1029  ;;  %v2093_v5 = vld [vmem:[#allocation22_spill] sm:$0xff]  ;;  %v300_v39 = vadd.f32 1e-20, %v1830_v17 }
 0x124   :  { %v772_v53 = vmul.f32 %v722_v12, %v722_v12  ;;  %1035 = vrsqrt.f32 %v525_v62  ;;  %v624_v48 = vmul.f32 %v1137_v51, %v1030_v47  ;;  %v279_v12 = vadd.f32 1e-20, %v2093_v5  ;;  %v2094_v47 = vld [vmem:[#allocation24_spill] sm:$0xff]  ;;  %v1145_v5 = vld [vmem:[%s2038_s0 + $0x98] sm:$0xff] }
 0x125   :  { %v723_v6 = vsub.f32 %v623_v9, %v673_v25  ;;  %v1839_v31 = vpop.xlane.xlu1 %243  ;;  %1037 = vrsqrt.f32 %v276_v15  ;;  %v1139_v15 = vld [vmem:[%s2038_s0 + $0x2a8] sm:$0xff] }
 0x126   :  { %v1841_v34 = vpop.xlane.xlu0 %491  ;;  %v821_v30 = vadd.f32 %v820_v10, %v772_v53  ;;  %1039 = vrsqrt.f32 %v544_v58  ;;  %v1138_v10 = vld [vmem:[%s2038_s0 + $0x80] sm:$0xff] }
 0x127   :  { %v773_v16 = vmul.f32 %v723_v6, %v723_v6  ;;  %1041 = vrsqrt.f32 %v294_v55 }
 0x128   :  { %1043 = vrsqrt.f32 %v545_v35 }
 0x129   :  { %v822_v41 = vadd.f32 %v821_v30, %v773_v16  ;;  %v1846_v20 = vpop.xlane.xlu1 %493  ;;  %1045 = vrsqrt.f32 %v277_v63  ;;  %v299_v16 = vadd.f32 1e-20, %v1818_v8  ;;  %v1144_v8 = vld [vmem:[%s2038_s0 + $0x120] sm:$0xff] }
 0x12a   :  { %v444_v1 = vpop.xlane.xlu0 %443  ;;  %1047 = vrsqrt.f32 %v295_v36  ;;  %v1142_v36 = vld [vmem:[%s2038_s0 + $0x88] sm:$0xff] }
 0x12b   :  { %v526_v61 = vadd.f32 1e-20, %v444_v1  ;;  %v1032_v43 = vpop.eup %1031  ;;  %v2095_v1 = vld [vmem:[#allocation12_spill] sm:$0xff] }
 0x12c   :  { %v1034_v23 = vpop.eup %1033  ;;  %v674_v19 = vmul.f32 %v1032_v43, %v2090_v59 }
 0x12d   :  { %1049 = vrsqrt.f32 %v526_v61  ;;  %v446_v56 = vpop.xlane.xlu1 %445  ;;  %v625_v2 = vmul.f32 %v1138_v10, %v1034_v23 }
 0x12e   :  { %v1854_v24 = vpop.xlane.xlu0 %245  ;;  %v1036_v49 = vpop.eup %1035  ;;  %v724_v22 = vsub.f32 %v624_v48, %v674_v19  ;;  %v527_v18 = vadd.f32 1e-20, %v446_v56  ;;  %1051 = vrsqrt.f32 %v278_v38 }
 0x12f   :  { %v675_v7 = vmul.f32 %v1036_v49, %v2092_v44  ;;  %v1038_v13 = vpop.eup %1037 }
 0x130   :  { %v774_v21 = vmul.f32 %v724_v22, %v724_v22  ;;  %1053 = vrsqrt.f32 %v527_v18  ;;  %v1040_v45 = vpop.eup %1039  ;;  %v626_v57 = vmul.f32 %v1142_v36, %v1038_v13  ;;  %v550_v22 = vadd.f32 1e-20, %v1841_v34  ;;  %v2096_v18 = vld [vmem:[#allocation13_spill] sm:$0xff] }
 0x131   :  { %1055 = vrsqrt.f32 %v280_v37  ;;  %v725_v42 = vsub.f32 %v625_v2, %v675_v7  ;;  %v1864_v27 = vpop.xlane.xlu1 %247  ;;  %v1042_v62 = vpop.eup %1041  ;;  %v694_v32 = vmul.f32 %v1139_v15, %v1040_v45  ;;  %v551_v7 = vadd.f32 1e-20, %v1846_v20  ;;  %v1147_v15 = vld [vmem:[%s2038_s0 + $0x2c0] sm:$0xff] }
 0x132   :  { %v1866_v50 = vpop.xlane.xlu0 %495  ;;  %1057 = vrsqrt.f32 %v546_v3  ;;  %v823_v46 = vadd.f32 %v822_v41, %v774_v21  ;;  %v1044_v9 = vpop.eup %1043  ;;  %v644_v30 = vmul.f32 %v1140_v33, %v1042_v62  ;;  %v281_v41 = vadd.f32 1e-20, %v2094_v47 }
 0x133   :  { %1059 = vrsqrt.f32 %v547_v40  ;;  %v775_v0 = vmul.f32 %v725_v42, %v725_v42  ;;  %v1046_v28 = vpop.eup %1045  ;;  %v695_v63 = vmul.f32 %v1141_v26, %v1044_v9  ;;  %v2097_v40 = vld [vmem:[#allocation23_spill] sm:$0xff]  ;;  %v301_v13 = vadd.f32 1e-20, %v1839_v31 }
 0x134   :  { %1061 = vrsqrt.f32 %v296_v11  ;;  %v1048_v55 = vpop.eup %1047  ;;  %v627_v38 = vmul.f32 %v1143_v29, %v1046_v28  ;;  %v744_v51 = vsub.f32 %v644_v30, %v694_v32  ;;  %v1903_v44 = vadd.f32 1e-20, %v2097_v40  ;;  %v1149_v30 = vld [vmem:[%s2038_s0 + $0x130] sm:$0xff] }
 0x135   :  { %1063 = vrsqrt.f32 %v297_v52  ;;  %v824_v25 = vadd.f32 %v823_v46, %v775_v0  ;;  %v1874_v58 = vpop.xlane.xlu1 %497  ;;  %v645_v23 = vmul.f32 %v1144_v8, %v1048_v55  ;;  %v302_v20 = vadd.f32 1e-20, %v1854_v24  ;;  %v1155_v40 = vld [vmem:[%s2038_s0 + $0x230] sm:$0xff] }
 0x136   :  { %v448_v53 = vpop.xlane.xlu0 %447  ;;  %1065 = vrsqrt.f32 %v279_v12  ;;  %v794_v17 = vmul.f32 %v744_v51, %v744_v51  ;;  %v552_v31 = vadd.f32 1e-20, %v1866_v50  ;;  %v553_v24 = vadd.f32 1e-20, %v1874_v58  ;;  %v1148_v50 = vld [vmem:[%s2038_s0 + $0x128] sm:$0xff] }
 0x137   :  { %v528_v6 = vadd.f32 1e-20, %v448_v53  ;;  %v1050_v35 = vpop.eup %1049  ;;  %1067 = vrsqrt.f32 %v298_v14  ;;  %v745_v3 = vsub.f32 %v645_v23, %v695_v63  ;;  %v303_v58 = vadd.f32 1e-20, %v1864_v27  ;;  %v1153_v23 = vld [vmem:[%s2038_s0 + $0x2c8] sm:$0xff] }
 0x138   :  { %1069 = vrsqrt.f32 %v548_v60  ;;  %v676_v61 = vmul.f32 %v1050_v35, %v2095_v1  ;;  %v1052_v43 = vpop.eup %1051  ;;  %v1146_v60 = vld [vmem:[%s2038_s0 + $0x2b8] sm:$0xff]  ;;  %v848_v53 = vadd.f32 %v1798_v54, %v794_v17 }
 0x139   :  { %1071 = vrsqrt.f32 %v528_v6  ;;  %v450_v48 = vpop.xlane.xlu1 %449  ;;  %v628_v12 = vmul.f32 %v1145_v5, %v1052_v43  ;;  %v795_v14 = vmul.f32 %v745_v3, %v745_v3  ;;  %v1151_v43 = vld [vmem:[%s2038_s0 + $0x228] sm:$0xff] }
 0x13a   :  { %v1895_v59 = vpop.xlane.xlu0 %249  ;;  %v1054_v19 = vpop.eup %1053  ;;  %1073 = vrsqrt.f32 %v549_v4  ;;  %v726_v37 = vsub.f32 %v626_v57, %v676_v61  ;;  %v529_v56 = vadd.f32 1e-20, %v450_v48 }
 0x13b   :  { %v1898_v49 = vpop.eup %1055  ;;  %1075 = vrsqrt.f32 %v299_v16  ;;  %v677_v10 = vmul.f32 %v1054_v19, %v2096_v18  ;;  %v1150_v16 = vld [vmem:[%s2038_s0 + $0xa0] sm:$0xff]  ;;  %v849_v57 = vadd.f32 %v848_v53, %v795_v14  ;;  %v304_v48 = vadd.f32 1e-20, %v1895_v59  ;;  %v1158_v53 = vld [vmem:[%s2038_s0 + $0x2d8] sm:$0xff] }
 0x13c   :  { %v1058_v2 = vpop.eup %1057  ;;  %v776_v11 = vmul.f32 %v726_v37, %v726_v37  ;;  %1077 = vrsqrt.f32 %v529_v56 }
 0x13d   :  { %v1060_v21 = vpop.eup %1059  ;;  %1079 = vrsqrt.f32 %v281_v41  ;;  %v727_v52 = vsub.f32 %v627_v38, %v677_v10  ;;  %v1907_v42 = vpop.xlane.xlu1 %251  ;;  %v696_v28 = vmul.f32 %v1146_v60, %v1058_v2  ;;  %v1152_v38 = vld [vmem:[%s2038_s0 + $0x138] sm:$0xff]  ;;  %v1154_v10 = vld [vmem:[%s2038_s0 + $0x2d0] sm:$0xff] }
 0x13e   :  { %v500_v45 = vpop.xlane.xlu0 %499  ;;  %v1062_v34 = vpop.eup %1061  ;;  %1081 = vrsqrt.f32 %v300_v39  ;;  %v825_v46 = vadd.f32 %v824_v25, %v776_v11  ;;  %v697_v32 = vmul.f32 %v1147_v15, %v1060_v21 }
 0x13f   :  { %v1064_v62 = vpop.eup %1063  ;;  %1083 = vrsqrt.f32 %v550_v22  ;;  %v777_v0 = vmul.f32 %v727_v52, %v727_v52  ;;  %v646_v55 = vmul.f32 %v1148_v50, %v1062_v34  ;;  %v554_v47 = vadd.f32 1e-20, %v500_v45  ;;  %v1156_v45 = vld [vmem:[%s2038_s0 + $0x140] sm:$0xff] }
 0x140   :  { %v1066_v9 = vpop.eup %1065  ;;  %1085 = vrsqrt.f32 %v551_v7  ;;  %v647_v26 = vmul.f32 %v1149_v30, %v1064_v62  ;;  %v305_v7 = vadd.f32 1e-20, %v1907_v42 }
 0x141   :  { %v1068_v25 = vpop.eup %1067  ;;  %1087 = vrsqrt.f32 %v301_v13  ;;  %v826_v4 = vadd.f32 %v825_v46, %v777_v0  ;;  %v502_v6 = vpop.xlane.xlu1 %501  ;;  %v629_v36 = vmul.f32 %v1150_v16, %v1066_v9  ;;  %v746_v1 = vsub.f32 %v646_v55, %v696_v28 }
 0x142   :  { %v452_v35 = vpop.xlane.xlu0 %451  ;;  %v1070_v33 = vpop.eup %1069  ;;  %1089 = vrsqrt.f32 %v302_v20  ;;  %v747_v61 = vsub.f32 %v647_v26, %v697_v32  ;;  %v648_v8 = vmul.f32 %v1152_v38, %v1068_v25  ;;  %v555_v3 = vadd.f32 1e-20, %v502_v6  ;;  %v1157_v32 = vld [vmem:[%s2038_s0 + $0xa8] sm:$0xff]  ;;  %v1159_v6 = vld [vmem:[%s2038_s0 + $0x2e0] sm:$0xff] }
 0x143   :  { %v530_v63 = vadd.f32 1e-20, %v452_v35  ;;  %v1072_v54 = vpop.eup %1071  ;;  %1091 = vrsqrt.f32 %v552_v31  ;;  %v698_v51 = vmul.f32 %v1153_v23, %v1070_v33  ;;  %v796_v21 = vmul.f32 %v746_v1, %v746_v1 }
 0x144   :  { %v1074_v41 = vpop.eup %1073  ;;  %1093 = vrsqrt.f32 %v553_v24  ;;  %v678_v29 = vmul.f32 %v1151_v43, %v1072_v54  ;;  %v797_v17 = vmul.f32 %v747_v61, %v747_v61  ;;  %v630_v24 = vmul.f32 %v1157_v32, %v1898_v49  ;;  %v1162_v43 = vld [vmem:[%s2038_s0 + $0x2e8] sm:$0xff] }
 0x145   :  { %v1076_v27 = vpop.eup %1075  ;;  %1095 = vrsqrt.f32 %v530_v63  ;;  %v454_v19 = vpop.xlane.xlu1 %453  ;;  %v699_v2 = vmul.f32 %v1154_v10, %v1074_v41  ;;  %v748_v5 = vsub.f32 %v648_v8, %v698_v51  ;;  %v850_v25 = vadd.f32 %v849_v57, %v796_v21  ;;  %v1164_v51 = vld [vmem:[%s2038_s0 + $0x2f0] sm:$0xff] }
 0x146   :  { %v254_v39 = vpop.xlane.xlu0 %253  ;;  %v1078_v37 = vpop.eup %1077  ;;  %1097 = vrsqrt.f32 %v303_v58  ;;  %v728_v56 = vsub.f32 %v628_v12, %v678_v29  ;;  %v531_v22 = vadd.f32 1e-20, %v454_v19  ;;  %v649_v34 = vmul.f32 %v1156_v45, %v1076_v27  ;;  %v1163_v27 = vld [vmem:[%s2038_s0 + $0x238] sm:$0xff] }
 0x147   :  { %v1942_v18 = vpop.eup %1079  ;;  %v679_v59 = vmul.f32 %v1155_v40, %v1078_v37  ;;  %1099 = vrsqrt.f32 %v554_v47  ;;  %v306_v42 = vadd.f32 1e-20, %v254_v39  ;;  %v1161_v47 = vld [vmem:[%s2038_s0 + $0x150] sm:$0xff] }
 0x148   :  { %v1082_v11 = vpop.eup %1081  ;;  %v778_v13 = vmul.f32 %v728_v56, %v728_v56  ;;  %1101 = vrsqrt.f32 %v531_v22  ;;  %v749_v9 = vsub.f32 %v649_v34, %v699_v2 }
 0x149   :  { %v1084_v52 = vpop.eup %1083  ;;  %v729_v12 = vsub.f32 %v629_v36, %v679_v59  ;;  %1103 = vrsqrt.f32 %v304_v48  ;;  %v256_v46 = vpop.xlane.xlu1 %255  ;;  %v851_v36 = vadd.f32 %v850_v25, %v797_v17  ;;  %v1166_v59 = vld [vmem:[%s2038_s0 + $0xb0] sm:$0xff]  ;;  %v1168_v17 = vld [vmem:[%s2038_s0 + $0x240] sm:$0xff]  ;;  %v1170_v25 = vld [vmem:[%s2038_s0 + $0x168] sm:$0xff] }
 0x14a   :  { %v504_v20 = vpop.xlane.xlu0 %503  ;;  %v1086_v62 = vpop.eup %1085  ;;  %v827_v14 = vadd.f32 %v826_v4, %v778_v13  ;;  %1105 = vrsqrt.f32 %v555_v3  ;;  %v307_v28 = vadd.f32 1e-20, %v256_v46  ;;  %v700_v50 = vmul.f32 %v1158_v53, %v1084_v52  ;;  %v1165_v3 = vld [vmem:[%s2038_s0 + $0x158] sm:$0xff] }
 0x14b   :  { %v556_v0 = vadd.f32 1e-20, %v504_v20  ;;  %v1088_v31 = vpop.eup %1087  ;;  %v779_v60 = vmul.f32 %v729_v12, %v729_v12  ;;  %1107 = vrsqrt.f32 %v305_v7  ;;  %v798_v4 = vmul.f32 %v748_v5, %v748_v5 }
 0x14c   :  { %v1090_v15 = vpop.eup %1089  ;;  %1109 = vrsqrt.f32 %v1903_v44  ;;  %v701_v35 = vmul.f32 %v1159_v6, %v1086_v62  ;;  %v1160_v44 = vld [vmem:[%s2038_s0 + $0x148] sm:$0xff]  ;;  %v799_v57 = vmul.f32 %v749_v9, %v749_v9  ;;  %v651_v41 = vmul.f32 %v1161_v47, %v1088_v31 }
 0x14d   :  { %v1092_v55 = vpop.eup %1091  ;;  %v828_v33 = vadd.f32 %v827_v14, %v779_v60  ;;  %1111 = vrsqrt.f32 %v556_v0  ;;  %v506_v30 = vpop.xlane.xlu1 %505  ;;  %v650_v58 = vmul.f32 %v1160_v44, %v1082_v11  ;;  %v852_v56 = vadd.f32 %v851_v36, %v798_v4  ;;  %v1167_v11 = vld [vmem:[%s2038_s0 + $0x160] sm:$0xff] }
 0x14e   :  { %v456_v26 = vpop.xlane.xlu0 %455  ;;  %v1094_v49 = vpop.eup %1093  ;;  %1113 = vrsqrt.f32 %v306_v42  ;;  %v557_v63 = vadd.f32 1e-20, %v506_v30  ;;  %v702_v29 = vmul.f32 %v1162_v43, %v1092_v55  ;;  %v751_v23 = vsub.f32 %v651_v41, %v701_v35  ;;  %v1175_v43 = vld [vmem:[%s2038_s0 + $0x310] sm:$0xff] }
 0x14f   :  { %v532_v54 = vadd.f32 1e-20, %v456_v26  ;;  %v1096_v16 = vpop.eup %1095  ;;  %1115 = vrsqrt.f32 %v307_v28  ;;  %v750_v61 = vsub.f32 %v650_v58, %v700_v50  ;;  %v703_v48 = vmul.f32 %v1164_v51, %v1094_v49  ;;  %v1171_v50 = vld [vmem:[%s2038_s0 + $0x300] sm:$0xff] }
 0x150   :  { %v1098_v1 = vpop.eup %1097  ;;  %v680_v38 = vmul.f32 %v1163_v27, %v1096_v16  ;;  %1117 = vrsqrt.f32 %v557_v63  ;;  %v652_v22 = vmul.f32 %v1165_v3, %v1090_v15  ;;  %v631_v7 = vmul.f32 %v1166_v59, %v1942_v18  ;;  %v1169_v18 = vld [vmem:[%s2038_s0 + $0x2f8] sm:$0xff]  ;;  %v1173_v63 = vld [vmem:[%s2038_s0 + $0x308] sm:$0xff] }
 0x151   :  { %v1100_v8 = vpop.eup %1099  ;;  %1119 = vrsqrt.f32 %v532_v54  ;;  %v258_v19 = vpop.xlane.xlu1 %257  ;;  %v653_v21 = vmul.f32 %v1167_v11, %v1098_v1  ;;  %v853_v34 = vadd.f32 %v852_v56, %v799_v57  ;;  %v800_v5 = vmul.f32 %v750_v61, %v750_v61  ;;  %v1174_v1 = vld [vmem:[%s2038_s0 + $0x178] sm:$0xff] }
 0x152   :  { %v208_v39 = vpop.xlane.xlu0 %207  ;;  %v1102_v37 = vpop.eup %1101  ;;  %v730_v10 = vsub.f32 %v630_v24, %v680_v38  ;;  %v308_v2 = vadd.f32 1e-20, %v258_v19  ;;  %v752_v12 = vsub.f32 %v652_v22, %v702_v29  ;;  %v801_v62 = vmul.f32 %v751_v23, %v751_v23  ;;  %v1176_v27 = vld [vmem:[%s2038_s0 + $0xb8] sm:$0xff]  ;;  %v1178_v19 = vld [vmem:[%s2038_s0 + $0x180] sm:$0xff] }
 0x153   :  { %v1104_v40 = vpop.eup %1103  ;;  %v681_v13 = vmul.f32 %v1168_v17, %v1102_v37  ;;  %v283_v52 = vadd.f32 1e-20, %v208_v39  ;;  %v753_v14 = vsub.f32 %v653_v21, %v703_v48  ;;  %v704_v42 = vmul.f32 %v1169_v18, %v1100_v8  ;;  %v1177_v8 = vld [vmem:[%s2038_s0 + $0x248] sm:$0xff] }
 0x154   :  { %v1106_v45 = vpop.eup %1105  ;;  %v780_v46 = vmul.f32 %v730_v10, %v730_v10  ;;  %1121 = vrsqrt.f32 %v308_v2  ;;  %v654_v53 = vmul.f32 %v1170_v25, %v1104_v40  ;;  %v854_v35 = vadd.f32 %v853_v34, %v800_v5  ;;  %v1179_v34 = vld [vmem:[%s2038_s0 + $0x188] sm:$0xff] }
 0x155   :  { %v1108_v20 = vpop.eup %1107  ;;  %v731_v0 = vsub.f32 %v631_v7, %v681_v13  ;;  %v508_v31 = vpop.xlane.xlu1 %507  ;;  %v705_v55 = vmul.f32 %v1171_v50, %v1106_v45  ;;  %1123 = vrsqrt.f32 %v283_v52  ;;  %v802_v30 = vmul.f32 %v752_v12, %v752_v12  ;;  %v1180_v12 = vld [vmem:[%s2038_s0 + $0x318] sm:$0xff] }
 0x156   :  { %v458_v9 = vpop.xlane.xlu0 %457  ;;  %v1110_v60 = vpop.eup %1109  ;;  %v829_v28 = vadd.f32 %v828_v33, %v780_v46  ;;  %v558_v15 = vadd.f32 1e-20, %v508_v31  ;;  %v1172_v33 = vld [vmem:[%s2038_s0 + $0x170] sm:$0xff]  ;;  %v754_v44 = vsub.f32 %v654_v53, %v704_v42  ;;  %v855_v36 = vadd.f32 %v854_v35, %v801_v62 }
 0x157   :  { %v533_v32 = vadd.f32 1e-20, %v458_v9  ;;  %v1112_v24 = vpop.eup %1111  ;;  %v781_v4 = vmul.f32 %v731_v0, %v731_v0  ;;  %v655_v26 = vmul.f32 %v1172_v33, %v1108_v20  ;;  %v803_v47 = vmul.f32 %v753_v14, %v753_v14  ;;  %v1181_v20 = vld [vmem:[%s2038_s0 + $0xc0] sm:$0xff]  ;;  %v1182_v14 = vld [vmem:[%s2038_s0 + $0x250] sm:$0xff] }
 0x158   :  { %v1114_v6 = vpop.eup %1113  ;;  %1125 = vrsqrt.f32 %v558_v15  ;;  %v706_v54 = vmul.f32 %v1173_v63, %v1112_v24  ;;  %v632_v38 = vmul.f32 %v1176_v27, %v1110_v60  ;;  %v856_v51 = vadd.f32 %v855_v36, %v802_v30 }
 0x159   :  { %v1116_v49 = vpop.eup %1115  ;;  %v830_v58 = vadd.f32 %v829_v28, %v781_v4  ;;  %1127 = vrsqrt.f32 %v533_v32  ;;  %v755_v41 = vsub.f32 %v655_v26, %v705_v55  ;;  %v656_v61 = vmul.f32 %v1174_v1, %v1114_v6 }
 0x15a   :  { %v1118_v16 = vpop.eup %1117  ;;  %v804_v48 = vmul.f32 %v754_v44, %v754_v44  ;;  %v657_v39 = vmul.f32 %v1178_v19, %v1116_v49  ;;  %v857_v3 = vadd.f32 %v856_v51, %v803_v47 }
 0x15b   :  { %v1120_v57 = vpop.eup %1119  ;;  %v707_v29 = vmul.f32 %v1175_v43, %v1118_v16  ;;  %v756_v37 = vsub.f32 %v656_v61, %v706_v54  ;;  %v805_v22 = vmul.f32 %v755_v41, %v755_v41 }
 0x15c   :  { %v682_v23 = vmul.f32 %v1177_v8, %v1120_v57  ;;  %v858_v7 = vadd.f32 %v857_v3, %v804_v48 }
 0x15d   :  { %v757_v10 = vsub.f32 %v657_v39, %v707_v29  ;;  %v806_v11 = vmul.f32 %v756_v37, %v756_v37 }
 0x15e   :  { %v732_v56 = vsub.f32 %v632_v38, %v682_v23  ;;  %v1122_v2 = vpop.eup %1121  ;;  %v859_v52 = vadd.f32 %v858_v7, %v805_v22 }
 0x15f   :  { %v1124_v59 = vpop.eup %1123  ;;  %v807_v45 = vmul.f32 %v757_v10, %v757_v10  ;;  %v658_v5 = vmul.f32 %v1179_v34, %v1122_v2 }
 0x160   :  { %v782_v40 = vmul.f32 %v732_v56, %v732_v56  ;;  %v633_v62 = vmul.f32 %v1181_v20, %v1124_v59  ;;  %v860_v42 = vadd.f32 %v859_v52, %v806_v11 }
 0x162   :  { %v1126_v21 = vpop.eup %1125  ;;  %v831_v17 = vadd.f32 %v830_v58, %v782_v40  ;;  %v861_v9 = vadd.f32 %v860_v42, %v807_v45 }
 0x163   :  { %v1128_v13 = vpop.eup %1127  ;;  %v708_v46 = vmul.f32 %v1180_v12, %v1126_v21 }
 0x164   :  { %v683_v18 = vmul.f32 %v1182_v14, %v1128_v13 }
 0x165   :  { %v758_v0 = vsub.f32 %v658_v5, %v708_v46 }
 0x166   :  { %v733_v31 = vsub.f32 %v633_v62, %v683_v18 }
 0x167   :  { %v808_v60 = vmul.f32 %v758_v0, %v758_v0 }
 0x168   :  { %v783_v28 = vmul.f32 %v733_v31, %v733_v31 }
 0x169   :  { %v862_v15 = vadd.f32 %v861_v9, %v808_v60 }
 0x16a   :  { %v832_v32 = vadd.f32 %v831_v17, %v783_v28 }
 0x16b   :  { %v863_v24 = vrot.slane %v862_v15, 4 }
 0x16c   :  { %v833_v25 = vrot.slane %v832_v32, 4 }
 0x16d   :  { %v864_v53 = vadd.f32 %v863_v24, %v862_v15 }
 0x16e   :  { %v834_v50 = vadd.f32 %v833_v25, %v832_v32 }
 0x16f   :  { %v865_v55 = vrot.slane %v864_v53, 2 }
 0x170   :  { %v835_v4 = vrot.slane %v834_v50, 2 }
 0x171   :  { %v866_v6 = vadd.f32 %v865_v55, %v864_v53 }
 0x172   :  { %v836_v35 = vadd.f32 %v835_v4, %v834_v50 }
 0x173   :  { %v867_v30 = vrot.slane %v866_v6, 1 }
 0x174   :  { %v837_v33 = vrot.slane %v836_v35, 1 }
 0x175   :  { %v868_v26 = vadd.f32 %v867_v30, %v866_v6 }
 0x176   :  { %v838_v49 = vadd.f32 %v837_v33, %v836_v35 }
 0x178   :  { %v872_v44 = vsel %vm871_vm0, %v868_v26, %v838_v49 }
 0x179   :  { %874 = vst [vmem:[%s2039_s1] sm:$0x3] %v872_v44 }

// kernel: reconstruction_loss.9
= control target key start
LH: loop header
LB: loop body
LE: loop exit
PB: predicated region body
PF: predicated region fallthrough
CT: control target
= control target key end

     0   :  { %vm633_vm0 = vcmask 1041409   ;;  %s1425_s0 = inlined_call_operand.vmem [shape: f32[4,144,128], index: 0, kind: input, shape index: {}]   ;;  %s1426_s1 = inlined_call_operand.vmem [shape: f32[1,2,128], index: 1, kind: output, shape index: {}]  }
   0x1   :  { %v834_v0 = vld [vmem:[%s1425_s0 + $0x10] sm:$0xff]  ;;  %v839_v1 = vld [vmem:[%s1425_s0] sm:$0xff]  ;;  %v853_v5 = vld [vmem:[%s1425_s0 + $0x8] sm:$0xff] }
   0x2   :  { %v844_v2 = vld [vmem:[%s1425_s0 + $0x90] sm:$0xff]  ;;  %v83_v3 = vmul.f32 %v834_v0, %v834_v0  ;;  %v81_v4 = vmul.f32 %v839_v1, %v839_v1  ;;  %v82_v7 = vmul.f32 %v853_v5, %v853_v5  ;;  %v862_v8 = vld [vmem:[%s1425_s0 + $0x120] sm:$0xff]  ;;  %v867_v9 = vld [vmem:[%s1425_s0 + $0x98] sm:$0xff] }
   0x3   :  { %v99_v6 = vmul.f32 %v844_v2, %v844_v2  ;;  %v261_v10 = vmul.f32 %v862_v8, %v862_v8  ;;  %v100_v11 = vmul.f32 %v867_v9, %v867_v9  ;;  %v876_v12 = vld [vmem:[%s1425_s0 + $0x1b0] sm:$0xff]  ;;  %v881_v13 = vld [vmem:[%s1425_s0 + $0x128] sm:$0xff]  ;;  %v890_v16 = vld [vmem:[%s1425_s0 + $0xa0] sm:$0xff] }
   0x4   :  { %121 = vadd.xlane.f32.xlu1 %v83_v3  ;;  %117 = vadd.xlane.f32.xlu0 %v81_v4  ;;  %v279_v14 = vmul.f32 %v876_v12, %v876_v12  ;;  %v262_v15 = vmul.f32 %v881_v13, %v881_v13  ;;  %v895_v17 = vld [vmem:[%s1425_s0 + $0x1b8] sm:$0xff]  ;;  %v101_v18 = vmul.f32 %v890_v16, %v890_v16  ;;  %v904_v20 = vld [vmem:[%s1425_s0 + $0x1c0] sm:$0xff]  ;;  %v909_v21 = vld [vmem:[%s1425_s0 + $0x130] sm:$0xff] }
   0x5   :  { %v280_v19 = vmul.f32 %v895_v17, %v895_v17  ;;  %v281_v22 = vmul.f32 %v904_v20, %v904_v20  ;;  %v263_v23 = vmul.f32 %v909_v21, %v909_v21  ;;  %v918_v24 = vld [vmem:[%s1425_s0 + $0xa8] sm:$0xff]  ;;  %v923_v25 = vld [vmem:[%s1425_s0 + $0x18] sm:$0xff]  ;;  %v946_v32 = vld [vmem:[%s1425_s0 + $0xb0] sm:$0xff] }
   0x6   :  { %v102_v26 = vmul.f32 %v918_v24, %v918_v24  ;;  %v84_v27 = vmul.f32 %v923_v25, %v923_v25  ;;  %v932_v28 = vld [vmem:[%s1425_s0 + $0x1c8] sm:$0xff]  ;;  %v937_v29 = vld [vmem:[%s1425_s0 + $0x138] sm:$0xff]  ;;  %v951_v33 = vld [vmem:[%s1425_s0 + $0x20] sm:$0xff]  ;;  %v103_v34 = vmul.f32 %v946_v32, %v946_v32 }
   0x7   :  { %v282_v30 = vmul.f32 %v932_v28, %v932_v28  ;;  %v264_v31 = vmul.f32 %v937_v29, %v937_v29  ;;  %v85_v35 = vmul.f32 %v951_v33, %v951_v33  ;;  %v960_v36 = vld [vmem:[%s1425_s0 + $0x1d0] sm:$0xff]  ;;  %v965_v37 = vld [vmem:[%s1425_s0 + $0x140] sm:$0xff]  ;;  %v974_v40 = vld [vmem:[%s1425_s0 + $0xb8] sm:$0xff] }
   0x8   :  { %153 = vadd.xlane.f32.xlu1 %v99_v6  ;;  %119 = vadd.xlane.f32.xlu0 %v82_v7  ;;  %v283_v38 = vmul.f32 %v960_v36, %v960_v36  ;;  %v265_v39 = vmul.f32 %v965_v37, %v965_v37  ;;  %v979_v41 = vld [vmem:[%s1425_s0 + $0x28] sm:$0xff]  ;;  %v104_v42 = vmul.f32 %v974_v40, %v974_v40  ;;  %v988_v44 = vld [vmem:[%s1425_s0 + $0x1d8] sm:$0xff]  ;;  %v1002_v48 = vld [vmem:[%s1425_s0 + $0xc0] sm:$0xff] }
   0x9   :  { %v86_v43 = vmul.f32 %v979_v41, %v979_v41  ;;  %v993_v45 = vld [vmem:[%s1425_s0 + $0x148] sm:$0xff]  ;;  %v284_v46 = vmul.f32 %v988_v44, %v988_v44  ;;  %v1007_v49 = vld [vmem:[%s1425_s0 + $0x30] sm:$0xff]  ;;  %v105_v50 = vmul.f32 %v1002_v48, %v1002_v48  ;;  %v1016_v52 = vld [vmem:[%s1425_s0 + $0x1e0] sm:$0xff] }
   0xa   :  { %v266_v47 = vmul.f32 %v993_v45, %v993_v45  ;;  %v87_v51 = vmul.f32 %v1007_v49, %v1007_v49  ;;  %v1021_v53 = vld [vmem:[%s1425_s0 + $0x150] sm:$0xff]  ;;  %v285_v54 = vmul.f32 %v1016_v52, %v1016_v52  ;;  %v1030_v56 = vld [vmem:[%s1425_s0 + $0xc8] sm:$0xff]  ;;  %v1035_v57 = vld [vmem:[%s1425_s0 + $0x38] sm:$0xff] }
   0xb   :  { %v267_v55 = vmul.f32 %v1021_v53, %v1021_v53  ;;  %v106_v58 = vmul.f32 %v1030_v56, %v1030_v56  ;;  %v88_v59 = vmul.f32 %v1035_v57, %v1035_v57  ;;  %v1044_v60 = vld [vmem:[%s1425_s0 + $0x1e8] sm:$0xff]  ;;  %v1049_v61 = vld [vmem:[%s1425_s0 + $0x158] sm:$0xff]  ;;  %v1058_v3 = vld [vmem:[%s1425_s0 + $0xd0] sm:$0xff] }
   0xc   :  { %297 = vadd.xlane.f32.xlu1 %v261_v10  ;;  %155 = vadd.xlane.f32.xlu0 %v100_v11  ;;  %v286_v62 = vmul.f32 %v1044_v60, %v1044_v60  ;;  %v268_v63 = vmul.f32 %v1049_v61, %v1049_v61  ;;  %v1063_v4 = vld [vmem:[%s1425_s0 + $0x40] sm:$0xff]  ;;  %v107_v6 = vmul.f32 %v1058_v3, %v1058_v3  ;;  %v1072_v10 = vld [vmem:[%s1425_s0 + $0x1f0] sm:$0xff] }
   0xd   :  { %v89_v7 = vmul.f32 %v1063_v4, %v1063_v4  ;;  %v1077_v11 = vld [vmem:[%s1425_s0 + $0x160] sm:$0xff] }
  0x10   :  { %333 = vadd.xlane.f32.xlu1 %v279_v14  ;;  %299 = vadd.xlane.f32.xlu0 %v262_v15  ;;  %v287_v14 = vmul.f32 %v1072_v10, %v1072_v10  ;;  %v269_v15 = vmul.f32 %v1077_v11, %v1077_v11 }
  0x14   :  { %157 = vadd.xlane.f32.xlu1 %v101_v18  ;;  %335 = vadd.xlane.f32.xlu0 %v280_v19  ;;  %v1086_v18 = vld [vmem:[%s1425_s0 + $0xd8] sm:$0xff]  ;;  %v1091_v19 = vld [vmem:[%s1425_s0 + $0x48] sm:$0xff] }
  0x18   :  { %337 = vadd.xlane.f32.xlu1 %v281_v22  ;;  %301 = vadd.xlane.f32.xlu0 %v263_v23  ;;  %v108_v22 = vmul.f32 %v1086_v18, %v1086_v18  ;;  %v90_v23 = vmul.f32 %v1091_v19, %v1091_v19 }
  0x1c   :  { %159 = vadd.xlane.f32.xlu1 %v102_v26  ;;  %123 = vadd.xlane.f32.xlu0 %v84_v27  ;;  %v1100_v26 = vld [vmem:[%s1425_s0 + $0x1f8] sm:$0xff]  ;;  %v1105_v27 = vld [vmem:[%s1425_s0 + $0x168] sm:$0xff] }
  0x20   :  { %339 = vadd.xlane.f32.xlu1 %v282_v30  ;;  %303 = vadd.xlane.f32.xlu0 %v264_v31  ;;  %v288_v30 = vmul.f32 %v1100_v26, %v1100_v26  ;;  %v270_v31 = vmul.f32 %v1105_v27, %v1105_v27 }
  0x24   :  { %161 = vadd.xlane.f32.xlu1 %v103_v34  ;;  %125 = vadd.xlane.f32.xlu0 %v85_v35  ;;  %v1114_v34 = vld [vmem:[%s1425_s0 + $0xe0] sm:$0xff]  ;;  %v1119_v35 = vld [vmem:[%s1425_s0 + $0x50] sm:$0xff] }
  0x28   :  { %341 = vadd.xlane.f32.xlu1 %v283_v38  ;;  %305 = vadd.xlane.f32.xlu0 %v265_v39  ;;  %v109_v38 = vmul.f32 %v1114_v34, %v1114_v34  ;;  %v91_v39 = vmul.f32 %v1119_v35, %v1119_v35 }
  0x2c   :  { %163 = vadd.xlane.f32.xlu1 %v104_v42  ;;  %127 = vadd.xlane.f32.xlu0 %v86_v43  ;;  %v1128_v42 = vld [vmem:[%s1425_s0 + $0x200] sm:$0xff]  ;;  %v1133_v43 = vld [vmem:[%s1425_s0 + $0x170] sm:$0xff] }
  0x30   :  { %343 = vadd.xlane.f32.xlu1 %v284_v46  ;;  %307 = vadd.xlane.f32.xlu0 %v266_v47  ;;  %v289_v46 = vmul.f32 %v1128_v42, %v1128_v42  ;;  %v271_v47 = vmul.f32 %v1133_v43, %v1133_v43 }
  0x34   :  { %165 = vadd.xlane.f32.xlu1 %v105_v50  ;;  %129 = vadd.xlane.f32.xlu0 %v87_v51  ;;  %v1142_v50 = vld [vmem:[%s1425_s0 + $0xe8] sm:$0xff]  ;;  %v1147_v51 = vld [vmem:[%s1425_s0 + $0x58] sm:$0xff] }
  0x35   :  { %1454 = vst [vmem:[#allocation2_spill] sm:$0xff] %v1142_v50  ;;  %1455 = vst [vmem:[#allocation3_spill] sm:$0xff] %v1147_v51 }
  0x38   :  { %345 = vadd.xlane.f32.xlu1 %v285_v54  ;;  %309 = vadd.xlane.f32.xlu0 %v267_v55  ;;  %v110_v54 = vmul.f32 %v1142_v50, %v1142_v50  ;;  %v92_v55 = vmul.f32 %v1147_v51, %v1147_v51 }
  0x3c   :  { %167 = vadd.xlane.f32.xlu1 %v106_v58  ;;  %131 = vadd.xlane.f32.xlu0 %v88_v59  ;;  %v1156_v58 = vld [vmem:[%s1425_s0 + $0x208] sm:$0xff]  ;;  %v1161_v59 = vld [vmem:[%s1425_s0 + $0x178] sm:$0xff] }
  0x3d   :  { %1456 = vst [vmem:[#allocation4_spill] sm:$0xff] %v1161_v59 }
  0x40   :  { %347 = vadd.xlane.f32.xlu1 %v286_v62  ;;  %311 = vadd.xlane.f32.xlu0 %v268_v63  ;;  %v290_v62 = vmul.f32 %v1156_v58, %v1156_v58  ;;  %v272_v63 = vmul.f32 %v1161_v59, %v1161_v59 }
  0x44   :  { %169 = vadd.xlane.f32.xlu1 %v107_v6  ;;  %133 = vadd.xlane.f32.xlu0 %v89_v7  ;;  %v1170_v6 = vld [vmem:[%s1425_s0 + $0xf0] sm:$0xff]  ;;  %v1175_v7 = vld [vmem:[%s1425_s0 + $0x60] sm:$0xff] }
  0x45   :  { %1457 = vst [vmem:[#allocation5_spill] sm:$0xff] %v1170_v6  ;;  %1458 = vst [vmem:[#allocation6_spill] sm:$0xff] %v1175_v7 }
  0x48   :  { %349 = vadd.xlane.f32.xlu1 %v287_v14  ;;  %313 = vadd.xlane.f32.xlu0 %v269_v15  ;;  %v111_v14 = vmul.f32 %v1170_v6, %v1170_v6  ;;  %v93_v15 = vmul.f32 %v1175_v7, %v1175_v7 }
  0x4c   :  { %171 = vadd.xlane.f32.xlu1 %v108_v22  ;;  %135 = vadd.xlane.f32.xlu0 %v90_v23  ;;  %v1184_v22 = vld [vmem:[%s1425_s0 + $0x210] sm:$0xff]  ;;  %v1189_v23 = vld [vmem:[%s1425_s0 + $0x180] sm:$0xff] }
  0x4d   :  { %1459 = vst [vmem:[#allocation7_spill] sm:$0xff] %v1184_v22  ;;  %1460 = vst [vmem:[#allocation8_spill] sm:$0xff] %v1189_v23 }
  0x50   :  { %351 = vadd.xlane.f32.xlu1 %v288_v30  ;;  %315 = vadd.xlane.f32.xlu0 %v270_v31  ;;  %v291_v30 = vmul.f32 %v1184_v22, %v1184_v22  ;;  %v273_v31 = vmul.f32 %v1189_v23, %v1189_v23 }
  0x54   :  { %173 = vadd.xlane.f32.xlu1 %v109_v38  ;;  %137 = vadd.xlane.f32.xlu0 %v91_v39  ;;  %v1198_v38 = vld [vmem:[%s1425_s0 + $0xf8] sm:$0xff]  ;;  %v1203_v39 = vld [vmem:[%s1425_s0 + $0x68] sm:$0xff] }
  0x55   :  { %1461 = vst [vmem:[#allocation9_spill] sm:$0xff] %v1198_v38  ;;  %1462 = vst [vmem:[#allocation10_spill] sm:$0xff] %v1203_v39 }
  0x58   :  { %353 = vadd.xlane.f32.xlu1 %v289_v46  ;;  %317 = vadd.xlane.f32.xlu0 %v271_v47  ;;  %v112_v46 = vmul.f32 %v1198_v38, %v1198_v38  ;;  %v94_v47 = vmul.f32 %v1203_v39, %v1203_v39  ;;  %v1273_v39 = vld [vmem:[%s1425_s0 + $0x198] sm:$0xff] }
  0x59   :  { %1472 = vst [vmem:[#allocation20_spill] sm:$0xff] %v1273_v39 }
  0x5c   :  { %175 = vadd.xlane.f32.xlu1 %v110_v54  ;;  %139 = vadd.xlane.f32.xlu0 %v92_v55  ;;  %v1212_v54 = vld [vmem:[%s1425_s0 + $0x218] sm:$0xff]  ;;  %v1217_v55 = vld [vmem:[%s1425_s0 + $0x188] sm:$0xff] }
  0x5d   :  { %1463 = vst [vmem:[#allocation11_spill] sm:$0xff] %v1212_v54  ;;  %1464 = vst [vmem:[#allocation12_spill] sm:$0xff] %v1217_v55 }
  0x60   :  { %355 = vadd.xlane.f32.xlu1 %v290_v62  ;;  %319 = vadd.xlane.f32.xlu0 %v272_v63  ;;  %v292_v62 = vmul.f32 %v1212_v54, %v1212_v54  ;;  %v274_v63 = vmul.f32 %v1217_v55, %v1217_v55 }
  0x64   :  { %177 = vadd.xlane.f32.xlu1 %v111_v14  ;;  %141 = vadd.xlane.f32.xlu0 %v93_v15  ;;  %v1226_v14 = vld [vmem:[%s1425_s0 + $0x100] sm:$0xff]  ;;  %v1231_v15 = vld [vmem:[%s1425_s0 + $0x70] sm:$0xff] }
  0x65   :  { %1465 = vst [vmem:[#allocation13_spill] sm:$0xff] %v1226_v14  ;;  %1466 = vst [vmem:[#allocation14_spill] sm:$0xff] %v1231_v15 }
  0x68   :  { %357 = vadd.xlane.f32.xlu1 %v291_v30  ;;  %321 = vadd.xlane.f32.xlu0 %v273_v31  ;;  %v113_v30 = vmul.f32 %v1226_v14, %v1226_v14  ;;  %v95_v31 = vmul.f32 %v1231_v15, %v1231_v15  ;;  %v1254_v15 = vld [vmem:[%s1425_s0 + $0x108] sm:$0xff]  ;;  %v1259_v14 = vld [vmem:[%s1425_s0 + $0x78] sm:$0xff] }
  0x69   :  { %1469 = vst [vmem:[#allocation17_spill] sm:$0xff] %v1254_v15  ;;  %1470 = vst [vmem:[#allocation18_spill] sm:$0xff] %v1259_v14 }
  0x6c   :  { %179 = vadd.xlane.f32.xlu1 %v112_v46  ;;  %143 = vadd.xlane.f32.xlu0 %v94_v47  ;;  %v1240_v46 = vld [vmem:[%s1425_s0 + $0x220] sm:$0xff]  ;;  %v1245_v47 = vld [vmem:[%s1425_s0 + $0x190] sm:$0xff] }
  0x6d   :  { %1467 = vst [vmem:[#allocation15_spill] sm:$0xff] %v1240_v46  ;;  %1468 = vst [vmem:[#allocation16_spill] sm:$0xff] %v1245_v47 }
  0x70   :  { %359 = vadd.xlane.f32.xlu1 %v292_v62  ;;  %323 = vadd.xlane.f32.xlu0 %v274_v63  ;;  %v293_v62 = vmul.f32 %v1240_v46, %v1240_v46  ;;  %v275_v63 = vmul.f32 %v1245_v47, %v1245_v47  ;;  %v1268_v47 = vld [vmem:[%s1425_s0 + $0x228] sm:$0xff] }
  0x71   :  { %1471 = vst [vmem:[#allocation19_spill] sm:$0xff] %v1268_v47 }
  0x74   :  { %181 = vadd.xlane.f32.xlu1 %v113_v30  ;;  %145 = vadd.xlane.f32.xlu0 %v95_v31  ;;  %v114_v30 = vmul.f32 %v1254_v15, %v1254_v15  ;;  %v96_v31 = vmul.f32 %v1259_v14, %v1259_v14  ;;  %v1282_v14 = vld [vmem:[%s1425_s0 + $0x110] sm:$0xff]  ;;  %v1287_v15 = vld [vmem:[%s1425_s0 + $0x80] sm:$0xff] }
  0x75   :  { %1473 = vst [vmem:[#allocation21_spill] sm:$0xff] %v1282_v14  ;;  %1474 = vst [vmem:[#allocation22_spill] sm:$0xff] %v1287_v15 }
  0x78   :  { %361 = vadd.xlane.f32.xlu1 %v293_v62  ;;  %325 = vadd.xlane.f32.xlu0 %v275_v63  ;;  %v294_v62 = vmul.f32 %v1268_v47, %v1268_v47  ;;  %v276_v63 = vmul.f32 %v1273_v39, %v1273_v39  ;;  %v1296_v39 = vld [vmem:[%s1425_s0 + $0x230] sm:$0xff]  ;;  %v1301_v47 = vld [vmem:[%s1425_s0 + $0x1a0] sm:$0xff] }
  0x79   :  { %1475 = vst [vmem:[#allocation23_spill] sm:$0xff] %v1296_v39  ;;  %1476 = vst [vmem:[#allocation24_spill] sm:$0xff] %v1301_v47 }
  0x7c   :  { %183 = vadd.xlane.f32.xlu1 %v114_v30  ;;  %147 = vadd.xlane.f32.xlu0 %v96_v31  ;;  %v115_v30 = vmul.f32 %v1282_v14, %v1282_v14  ;;  %v97_v31 = vmul.f32 %v1287_v15, %v1287_v15  ;;  %v1310_v15 = vld [vmem:[%s1425_s0 + $0x118] sm:$0xff]  ;;  %v1315_v14 = vld [vmem:[%s1425_s0 + $0x88] sm:$0xff] }
  0x7d   :  { %1477 = vst [vmem:[#allocation25_spill] sm:$0xff] %v1310_v15  ;;  %1478 = vst [vmem:[#allocation26_spill] sm:$0xff] %v1315_v14 }
  0x80   :  { %363 = vadd.xlane.f32.xlu1 %v294_v62  ;;  %327 = vadd.xlane.f32.xlu0 %v276_v63  ;;  %v295_v62 = vmul.f32 %v1296_v39, %v1296_v39  ;;  %v277_v63 = vmul.f32 %v1301_v47, %v1301_v47  ;;  %v1324_v47 = vld [vmem:[%s1425_s0 + $0x238] sm:$0xff]  ;;  %v1329_v39 = vld [vmem:[%s1425_s0 + $0x1a8] sm:$0xff] }
  0x81   :  { %1479 = vst [vmem:[#allocation27_spill] sm:$0xff] %v1324_v47  ;;  %1480 = vst [vmem:[#allocation28_spill] sm:$0xff] %v1329_v39 }
  0x84   :  { %185 = vadd.xlane.f32.xlu1 %v115_v30  ;;  %149 = vadd.xlane.f32.xlu0 %v97_v31  ;;  %v116_v30 = vmul.f32 %v1310_v15, %v1310_v15  ;;  %v98_v31 = vmul.f32 %v1315_v14, %v1315_v14 }
  0x88   :  { %365 = vadd.xlane.f32.xlu1 %v295_v62  ;;  %329 = vadd.xlane.f32.xlu0 %v277_v63  ;;  %v296_v62 = vmul.f32 %v1324_v47, %v1324_v47  ;;  %v278_v63 = vmul.f32 %v1329_v39, %v1329_v39 }
  0x8c   :  { %187 = vadd.xlane.f32.xlu1 %v116_v30  ;;  %151 = vadd.xlane.f32.xlu0 %v98_v31 }
  0x90   :  { %367 = vadd.xlane.f32.xlu1 %v296_v62  ;;  %331 = vadd.xlane.f32.xlu0 %v278_v63 }
  0x91   :  { %v122_v14 = vpop.xlane.xlu1 %121  ;;  %v118_v15 = vpop.xlane.xlu0 %117 }
  0x92   :  { %v189_v55 = vadd.f32 1e-20, %v118_v15  ;;  %v191_v50 = vadd.f32 1e-20, %v122_v14 }
  0x94   :  { %677 = vrsqrt.f32 %v189_v55 }
  0x95   :  { %v154_v46 = vpop.xlane.xlu1 %153  ;;  %v120_v38 = vpop.xlane.xlu0 %119 }
  0x96   :  { %v207_v6 = vadd.f32 1e-20, %v154_v46  ;;  %v190_v30 = vadd.f32 1e-20, %v120_v38 }
  0x99   :  { %v298_v54 = vpop.xlane.xlu1 %297  ;;  %v156_v7 = vpop.xlane.xlu0 %155 }
  0x9a   :  { %v369_v23 = vadd.f32 1e-20, %v298_v54  ;;  %v208_v47 = vadd.f32 1e-20, %v156_v7 }
  0x9c   :  { %679 = vrsqrt.f32 %v369_v23 }
  0x9d   :  { %v334_v31 = vpop.xlane.xlu1 %333  ;;  %v300_v22 = vpop.xlane.xlu0 %299  ;;  %681 = vrsqrt.f32 %v207_v6 }
  0x9e   :  { %v387_v51 = vadd.f32 1e-20, %v334_v31  ;;  %v370_v39 = vadd.f32 1e-20, %v300_v22  ;;  %683 = vrsqrt.f32 %v190_v30  ;;  %v678_v55 = vpop.eup %677 }
  0x9f   :  { %v441_v7 = vmul.f32 %v678_v55, %v839_v1 }
  0xa0   :  { %685 = vrsqrt.f32 %v387_v51 }
  0xa1   :  { %687 = vrsqrt.f32 %v370_v39  ;;  %v158_v62 = vpop.xlane.xlu1 %157  ;;  %v336_v63 = vpop.xlane.xlu0 %335 }
  0xa2   :  { %689 = vrsqrt.f32 %v208_v47  ;;  %v209_v15 = vadd.f32 1e-20, %v158_v62  ;;  %v388_v59 = vadd.f32 1e-20, %v336_v63 }
  0xa4   :  { %691 = vrsqrt.f32 %v388_v59 }
  0xa5   :  { %v338_v54 = vpop.xlane.xlu1 %337  ;;  %v302_v38 = vpop.xlane.xlu0 %301  ;;  %693 = vrsqrt.f32 %v209_v15 }
  0xa6   :  { %v680_v23 = vpop.eup %679  ;;  %v389_v46 = vadd.f32 1e-20, %v338_v54  ;;  %v371_v6 = vadd.f32 1e-20, %v302_v38  ;;  %695 = vrsqrt.f32 %v191_v50 }
  0xa7   :  { %v477_v51 = vmul.f32 %v680_v23, %v862_v8  ;;  %v682_v22 = vpop.eup %681 }
  0xa8   :  { %697 = vrsqrt.f32 %v389_v46  ;;  %v684_v39 = vpop.eup %683  ;;  %v459_v63 = vmul.f32 %v682_v22, %v844_v2 }
  0xa9   :  { %v513_v47 = vsub.f32 %v441_v7, %v477_v51  ;;  %699 = vrsqrt.f32 %v371_v6  ;;  %v160_v30 = vpop.xlane.xlu1 %159  ;;  %v124_v14 = vpop.xlane.xlu0 %123  ;;  %v442_v1 = vmul.f32 %v684_v39, %v853_v5 }
  0xaa   :  { %v686_v31 = vpop.eup %685  ;;  %v210_v59 = vadd.f32 1e-20, %v160_v30  ;;  %v192_v54 = vadd.f32 1e-20, %v124_v14 }
  0xab   :  { %v688_v62 = vpop.eup %687  ;;  %v495_v15 = vmul.f32 %v686_v31, %v876_v12  ;;  %v549_v22 = vmul.f32 %v513_v47, %v513_v47 }
  0xac   :  { %v690_v50 = vpop.eup %689  ;;  %v478_v8 = vmul.f32 %v688_v62, %v881_v13  ;;  %701 = vrsqrt.f32 %v210_v59 }
  0xad   :  { %v531_v55 = vsub.f32 %v459_v63, %v495_v15  ;;  %v340_v38 = vpop.xlane.xlu1 %339  ;;  %v304_v23 = vpop.xlane.xlu0 %303  ;;  %v460_v30 = vmul.f32 %v690_v50, %v867_v9  ;;  %703 = vrsqrt.f32 %v192_v54 }
  0xae   :  { %v514_v46 = vsub.f32 %v442_v1, %v478_v8  ;;  %v390_v6 = vadd.f32 1e-20, %v340_v38  ;;  %v372_v7 = vadd.f32 1e-20, %v304_v23  ;;  %v692_v51 = vpop.eup %691 }
  0xaf   :  { %v694_v2 = vpop.eup %693  ;;  %v496_v14 = vmul.f32 %v692_v51, %v895_v17  ;;  %v567_v50 = vmul.f32 %v531_v55, %v531_v55 }
  0xb0   :  { %v550_v12 = vmul.f32 %v514_v46, %v514_v46  ;;  %705 = vrsqrt.f32 %v390_v6  ;;  %v696_v5 = vpop.eup %695  ;;  %v461_v1 = vmul.f32 %v694_v2, %v890_v16 }
  0xb1   :  { %707 = vrsqrt.f32 %v372_v7  ;;  %v162_v13 = vpop.xlane.xlu1 %161  ;;  %v126_v39 = vpop.xlane.xlu0 %125  ;;  %v532_v63 = vsub.f32 %v460_v30, %v496_v14  ;;  %v443_v47 = vmul.f32 %v696_v5, %v834_v0 }
  0xb2   :  { %v698_v31 = vpop.eup %697  ;;  %v585_v62 = vadd.f32 %v550_v12, %v549_v22  ;;  %v211_v59 = vadd.f32 1e-20, %v162_v13  ;;  %v193_v54 = vadd.f32 1e-20, %v126_v39 }
  0xb3   :  { %v700_v15 = vpop.eup %699  ;;  %v497_v9 = vmul.f32 %v698_v31, %v904_v20  ;;  %v568_v8 = vmul.f32 %v532_v63, %v532_v63 }
  0xb4   :  { %v479_v17 = vmul.f32 %v700_v15, %v909_v21  ;;  %709 = vrsqrt.f32 %v211_v59 }
  0xb5   :  { %v533_v38 = vsub.f32 %v461_v1, %v497_v9  ;;  %v342_v23 = vpop.xlane.xlu1 %341  ;;  %v306_v46 = vpop.xlane.xlu0 %305  ;;  %v608_v6 = vadd.f32 %v568_v8, %v567_v50  ;;  %711 = vrsqrt.f32 %v193_v54 }
  0xb6   :  { %v515_v7 = vsub.f32 %v443_v47, %v479_v17  ;;  %v391_v51 = vadd.f32 1e-20, %v342_v23  ;;  %v373_v30 = vadd.f32 1e-20, %v306_v46  ;;  %v702_v16 = vpop.eup %701 }
  0xb7   :  { %v569_v22 = vmul.f32 %v533_v38, %v533_v38  ;;  %v704_v20 = vpop.eup %703  ;;  %v462_v39 = vmul.f32 %v702_v16, %v918_v24 }
  0xb8   :  { %v551_v2 = vmul.f32 %v515_v7, %v515_v7  ;;  %713 = vrsqrt.f32 %v391_v51  ;;  %v444_v59 = vmul.f32 %v704_v20, %v923_v25 }
  0xb9   :  { %v609_v12 = vadd.f32 %v608_v6, %v569_v22  ;;  %715 = vrsqrt.f32 %v373_v30  ;;  %v164_v0 = vpop.xlane.xlu1 %163  ;;  %v128_v55 = vpop.xlane.xlu0 %127 }
  0xba   :  { %v706_v14 = vpop.eup %705  ;;  %v586_v21 = vadd.f32 %v585_v62, %v551_v2  ;;  %v212_v5 = vadd.f32 1e-20, %v164_v0  ;;  %v194_v63 = vadd.f32 1e-20, %v128_v55 }
  0xbb   :  { %v708_v13 = vpop.eup %707  ;;  %v498_v31 = vmul.f32 %v706_v14, %v932_v28 }
  0xbc   :  { %v480_v15 = vmul.f32 %v708_v13, %v937_v29  ;;  %717 = vrsqrt.f32 %v212_v5 }
  0xbd   :  { %v534_v1 = vsub.f32 %v462_v39, %v498_v31  ;;  %v344_v9 = vpop.xlane.xlu1 %343  ;;  %v308_v54 = vpop.xlane.xlu0 %307  ;;  %719 = vrsqrt.f32 %v194_v63 }
  0xbe   :  { %v516_v47 = vsub.f32 %v444_v59, %v480_v15  ;;  %v392_v50 = vadd.f32 1e-20, %v344_v9  ;;  %v374_v8 = vadd.f32 1e-20, %v308_v54  ;;  %v710_v17 = vpop.eup %709 }
  0xbf   :  { %v570_v62 = vmul.f32 %v534_v1, %v534_v1  ;;  %v712_v24 = vpop.eup %711  ;;  %v463_v51 = vmul.f32 %v710_v17, %v946_v32 }
  0xc0   :  { %v552_v38 = vmul.f32 %v516_v47, %v516_v47  ;;  %721 = vrsqrt.f32 %v392_v50  ;;  %v445_v16 = vmul.f32 %v712_v24, %v951_v33 }
  0xc1   :  { %v610_v23 = vadd.f32 %v609_v12, %v570_v62  ;;  %723 = vrsqrt.f32 %v374_v8  ;;  %v166_v28 = vpop.xlane.xlu1 %165  ;;  %v130_v46 = vpop.xlane.xlu0 %129 }
  0xc2   :  { %v714_v25 = vpop.eup %713  ;;  %v587_v6 = vadd.f32 %v586_v21, %v552_v38  ;;  %v213_v29 = vadd.f32 1e-20, %v166_v28  ;;  %v195_v22 = vadd.f32 1e-20, %v130_v46 }
  0xc3   :  { %v716_v7 = vpop.eup %715  ;;  %v499_v30 = vmul.f32 %v714_v25, %v960_v36 }
  0xc4   :  { %v481_v2 = vmul.f32 %v716_v7, %v965_v37  ;;  %725 = vrsqrt.f32 %v213_v29 }
  0xc5   :  { %v535_v20 = vsub.f32 %v463_v51, %v499_v30  ;;  %v346_v0 = vpop.xlane.xlu1 %345  ;;  %v310_v55 = vpop.xlane.xlu0 %309  ;;  %727 = vrsqrt.f32 %v195_v22 }
  0xc6   :  { %v517_v12 = vsub.f32 %v445_v16, %v481_v2  ;;  %v393_v14 = vadd.f32 1e-20, %v346_v0  ;;  %v375_v5 = vadd.f32 1e-20, %v310_v55  ;;  %v718_v21 = vpop.eup %717 }
  0xc7   :  { %v571_v13 = vmul.f32 %v535_v20, %v535_v20  ;;  %v720_v32 = vpop.eup %719  ;;  %v464_v1 = vmul.f32 %v718_v21, %v974_v40 }
  0xc8   :  { %v553_v39 = vmul.f32 %v517_v12, %v517_v12  ;;  %729 = vrsqrt.f32 %v393_v14  ;;  %v446_v47 = vmul.f32 %v720_v32, %v979_v41 }
  0xc9   :  { %v611_v31 = vadd.f32 %v610_v23, %v571_v13  ;;  %731 = vrsqrt.f32 %v375_v5  ;;  %v168_v36 = vpop.xlane.xlu1 %167  ;;  %v132_v63 = vpop.xlane.xlu0 %131 }
  0xca   :  { %v722_v33 = vpop.eup %721  ;;  %v588_v59 = vadd.f32 %v587_v6, %v553_v39  ;;  %v214_v37 = vadd.f32 1e-20, %v168_v36  ;;  %v196_v54 = vadd.f32 1e-20, %v132_v63 }
  0xcb   :  { %v724_v15 = vpop.eup %723  ;;  %v500_v9 = vmul.f32 %v722_v33, %v988_v44 }
  0xcc   :  { %v482_v50 = vmul.f32 %v724_v15, %v993_v45  ;;  %733 = vrsqrt.f32 %v214_v37 }
  0xcd   :  { %v536_v8 = vsub.f32 %v464_v1, %v500_v9  ;;  %v348_v17 = vpop.xlane.xlu1 %347  ;;  %v312_v62 = vpop.xlane.xlu0 %311  ;;  %735 = vrsqrt.f32 %v196_v54 }
  0xce   :  { %v518_v38 = vsub.f32 %v446_v47, %v482_v50  ;;  %v394_v24 = vadd.f32 1e-20, %v348_v17  ;;  %v376_v23 = vadd.f32 1e-20, %v312_v62  ;;  %v726_v46 = vpop.eup %725 }
  0xcf   :  { %v572_v28 = vmul.f32 %v536_v8, %v536_v8  ;;  %v728_v40 = vpop.eup %727  ;;  %v465_v51 = vmul.f32 %v726_v46, %v1002_v48 }
  0xd0   :  { %v554_v25 = vmul.f32 %v518_v38, %v518_v38  ;;  %737 = vrsqrt.f32 %v394_v24  ;;  %v447_v22 = vmul.f32 %v728_v40, %v1007_v49 }
  0xd1   :  { %v612_v6 = vadd.f32 %v611_v31, %v572_v28  ;;  %739 = vrsqrt.f32 %v376_v23  ;;  %v170_v44 = vpop.xlane.xlu1 %169  ;;  %v134_v29 = vpop.xlane.xlu0 %133 }
  0xd2   :  { %v730_v41 = vpop.eup %729  ;;  %v589_v7 = vadd.f32 %v588_v59, %v554_v25  ;;  %v215_v23 = vadd.f32 1e-20, %v170_v44  ;;  %v197_v28 = vadd.f32 1e-20, %v134_v29 }
  0xd3   :  { %v732_v45 = vpop.eup %731  ;;  %v501_v30 = vmul.f32 %v730_v41, %v1016_v52 }
  0xd4   :  { %v483_v16 = vmul.f32 %v732_v45, %v1021_v53  ;;  %741 = vrsqrt.f32 %v215_v23 }
  0xd5   :  { %v537_v2 = vsub.f32 %v465_v51, %v501_v30  ;;  %v350_v20 = vpop.xlane.xlu1 %349  ;;  %v314_v0 = vpop.xlane.xlu0 %313  ;;  %743 = vrsqrt.f32 %v197_v28 }
  0xd6   :  { %v519_v55 = vsub.f32 %v447_v22, %v483_v16  ;;  %v734_v14 = vpop.eup %733  ;;  %v395_v46 = vadd.f32 1e-20, %v350_v20  ;;  %v377_v25 = vadd.f32 1e-20, %v314_v0 }
  0xd7   :  { %v573_v12 = vmul.f32 %v537_v2, %v537_v2  ;;  %v736_v13 = vpop.eup %735  ;;  %v466_v52 = vmul.f32 %v734_v14, %v1030_v56 }
  0xd8   :  { %v555_v5 = vmul.f32 %v519_v55, %v519_v55  ;;  %v448_v53 = vmul.f32 %v736_v13, %v1035_v57  ;;  %745 = vrsqrt.f32 %v395_v46 }
  0xd9   :  { %v613_v21 = vadd.f32 %v612_v6, %v573_v12  ;;  %v172_v39 = vpop.xlane.xlu1 %171  ;;  %v136_v32 = vpop.xlane.xlu0 %135  ;;  %747 = vrsqrt.f32 %v377_v25 }
  0xda   :  { %v738_v31 = vpop.eup %737  ;;  %v590_v36 = vadd.f32 %v589_v7, %v555_v5  ;;  %v216_v41 = vadd.f32 1e-20, %v172_v39  ;;  %v198_v7 = vadd.f32 1e-20, %v136_v32 }
  0xdb   :  { %v740_v48 = vpop.eup %739  ;;  %v502_v49 = vmul.f32 %v738_v31, %v1044_v60 }
  0xdc   :  { %v484_v63 = vmul.f32 %v740_v48, %v1049_v61  ;;  %749 = vrsqrt.f32 %v216_v41 }
  0xdd   :  { %v538_v33 = vsub.f32 %v466_v52, %v502_v49  ;;  %v352_v59 = vpop.xlane.xlu1 %351  ;;  %v316_v37 = vpop.xlane.xlu0 %315  ;;  %751 = vrsqrt.f32 %v198_v7 }
  0xde   :  { %v520_v15 = vsub.f32 %v448_v53, %v484_v63  ;;  %v396_v45 = vadd.f32 1e-20, %v352_v59  ;;  %v378_v51 = vadd.f32 1e-20, %v316_v37  ;;  %v742_v14 = vpop.eup %741 }
  0xdf   :  { %v574_v1 = vmul.f32 %v538_v33, %v538_v33  ;;  %v744_v13 = vpop.eup %743 }
  0xe0   :  { %v556_v9 = vmul.f32 %v520_v15, %v520_v15  ;;  %753 = vrsqrt.f32 %v396_v45 }
  0xe1   :  { %v1367_v54 = vadd.f32 %v613_v21, %v574_v1  ;;  %v174_v47 = vpop.xlane.xlu1 %173  ;;  %v138_v50 = vpop.xlane.xlu0 %137  ;;  %755 = vrsqrt.f32 %v378_v51 }
  0xe2   :  { %v1369_v8 = vadd.f32 %v590_v36, %v556_v9  ;;  %v217_v16 = vadd.f32 1e-20, %v174_v47  ;;  %v199_v2 = vadd.f32 1e-20, %v138_v50  ;;  %v746_v31 = vpop.eup %745 }
  0xe3   :  { %v748_v48 = vpop.eup %747 }
  0xe4   :  { %757 = vrsqrt.f32 %v217_v16 }
  0xe5   :  { %v354_v17 = vpop.xlane.xlu1 %353  ;;  %v318_v56 = vpop.xlane.xlu0 %317  ;;  %759 = vrsqrt.f32 %v199_v2 }
  0xe6   :  { %v397_v44 = vadd.f32 1e-20, %v354_v17  ;;  %v379_v29 = vadd.f32 1e-20, %v318_v56  ;;  %v750_v49 = vpop.eup %749 }
  0xe7   :  { %v752_v63 = vpop.eup %751 }
  0xe8   :  { %761 = vrsqrt.f32 %v397_v44 }
  0xe9   :  { %v176_v62 = vpop.xlane.xlu1 %175  ;;  %v140_v60 = vpop.xlane.xlu0 %139  ;;  %763 = vrsqrt.f32 %v379_v29  ;;  %v450_v29 = vmul.f32 %v752_v63, %v1091_v19 }
  0xea   :  { %v218_v55 = vadd.f32 1e-20, %v176_v62  ;;  %v200_v12 = vadd.f32 1e-20, %v140_v60  ;;  %v754_v15 = vpop.eup %753 }
  0xeb   :  { %v756_v9 = vpop.eup %755  ;;  %v504_v45 = vmul.f32 %v754_v15, %v1100_v26 }
  0xec   :  { %765 = vrsqrt.f32 %v218_v55 }
  0xed   :  { %v356_v38 = vpop.xlane.xlu1 %355  ;;  %v320_v57 = vpop.xlane.xlu0 %319  ;;  %767 = vrsqrt.f32 %v200_v12 }
  0xee   :  { %v398_v5 = vadd.f32 1e-20, %v356_v38  ;;  %v380_v21 = vadd.f32 1e-20, %v320_v57  ;;  %v758_v50 = vpop.eup %757 }
  0xef   :  { %v760_v56 = vpop.eup %759  ;;  %v469_v19 = vmul.f32 %v758_v50, %v1114_v34 }
  0xf0   :  { %769 = vrsqrt.f32 %v398_v5 }
  0xf1   :  { %v178_v24 = vpop.xlane.xlu1 %177  ;;  %v142_v61 = vpop.xlane.xlu0 %141  ;;  %771 = vrsqrt.f32 %v380_v21 }
  0xf2   :  { %v219_v36 = vadd.f32 1e-20, %v178_v24  ;;  %v201_v52 = vadd.f32 1e-20, %v142_v61  ;;  %v762_v57 = vpop.eup %761  ;;  %v503_v24 = vmul.f32 %v746_v31, %v1072_v10  ;;  %v485_v61 = vmul.f32 %v748_v48, %v1077_v11 }
  0xf3   :  { %v764_v28 = vpop.eup %763  ;;  %v486_v10 = vmul.f32 %v756_v9, %v1105_v27  ;;  %v505_v26 = vmul.f32 %v762_v57, %v1128_v42 }
  0xf4   :  { %773 = vrsqrt.f32 %v219_v36  ;;  %v487_v27 = vmul.f32 %v764_v28, %v1133_v43 }
  0xf5   :  { %v358_v40 = vpop.xlane.xlu1 %357  ;;  %v322_v6 = vpop.xlane.xlu0 %321  ;;  %775 = vrsqrt.f32 %v201_v52  ;;  %v522_v5 = vsub.f32 %v450_v29, %v486_v10  ;;  %v1484_v10 = vld [vmem:[#allocation7_spill] sm:$0xff] }
  0xf6   :  { %v399_v53 = vadd.f32 1e-20, %v358_v40  ;;  %v381_v33 = vadd.f32 1e-20, %v322_v6  ;;  %v766_v25 = vpop.eup %765  ;;  %v467_v40 = vmul.f32 %v742_v14, %v1058_v3  ;;  %v449_v6 = vmul.f32 %v744_v13, %v1063_v4 }
  0xf7   :  { %v1375_v7 = vpop.eup %767  ;;  %v468_v4 = vmul.f32 %v750_v49, %v1086_v18  ;;  %v541_v49 = vsub.f32 %v469_v19, %v505_v26 }
  0xf8   :  { %777 = vrsqrt.f32 %v399_v53  ;;  %v539_v16 = vsub.f32 %v467_v40, %v503_v24  ;;  %v521_v2 = vsub.f32 %v449_v6, %v485_v61 }
  0xf9   :  { %v180_v30 = vpop.xlane.xlu1 %179  ;;  %v144_v22 = vpop.xlane.xlu0 %143  ;;  %779 = vrsqrt.f32 %v381_v33  ;;  %v540_v14 = vsub.f32 %v468_v4, %v504_v45 }
  0xfa   :  { %v220_v1 = vadd.f32 1e-20, %v180_v30  ;;  %v202_v47 = vadd.f32 1e-20, %v144_v22  ;;  %v770_v22 = vpop.eup %769  ;;  %v575_v36 = vmul.f32 %v539_v16, %v539_v16  ;;  %v557_v43 = vmul.f32 %v521_v2, %v521_v2 }
  0xfb   :  { %v772_v3 = vpop.eup %771  ;;  %v576_v33 = vmul.f32 %v540_v14, %v540_v14 }
  0xfc   :  { %781 = vrsqrt.f32 %v220_v1  ;;  %v615_v50 = vadd.f32 %v1367_v54, %v575_v36  ;;  %v1483_v54 = vld [vmem:[#allocation3_spill] sm:$0xff]  ;;  %v1490_v36 = vld [vmem:[#allocation9_spill] sm:$0xff] }
  0xfd   :  { %v360_v20 = vpop.xlane.xlu1 %359  ;;  %v324_v0 = vpop.xlane.xlu0 %323  ;;  %783 = vrsqrt.f32 %v202_v47 }
  0xfe   :  { %v400_v17 = vadd.f32 1e-20, %v360_v20  ;;  %v382_v62 = vadd.f32 1e-20, %v324_v0  ;;  %v1381_v0 = vpop.eup %773  ;;  %v616_v6 = vadd.f32 %v615_v50, %v576_v33 }
  0xff   :  { %v1385_v12 = vpop.eup %775 }
 0x100   :  { %785 = vrsqrt.f32 %v400_v17  ;;  %v592_v17 = vadd.f32 %v1369_v8, %v557_v43  ;;  %v452_v8 = vmul.f32 %v1375_v7, %v1483_v54  ;;  %v1488_v7 = vld [vmem:[#allocation11_spill] sm:$0xff] }
 0x101   :  { %v182_v39 = vpop.xlane.xlu1 %181  ;;  %v146_v32 = vpop.xlane.xlu0 %145  ;;  %787 = vrsqrt.f32 %v382_v62 }
 0x102   :  { %v221_v23 = vadd.f32 1e-20, %v182_v39  ;;  %v203_v46 = vadd.f32 1e-20, %v146_v32  ;;  %v778_v39 = vpop.eup %777  ;;  %v451_v32 = vmul.f32 %v760_v56, %v1119_v35  ;;  %v558_v35 = vmul.f32 %v522_v5, %v522_v5  ;;  %v1481_v56 = vld [vmem:[#allocation2_spill] sm:$0xff] }
 0x103   :  { %v780_v42 = vpop.eup %779  ;;  %v470_v62 = vmul.f32 %v766_v25, %v1481_v56  ;;  %v1496_v56 = vld [vmem:[#allocation14_spill] sm:$0xff] }
 0x104   :  { %789 = vrsqrt.f32 %v221_v23  ;;  %v523_v53 = vsub.f32 %v451_v32, %v487_v27  ;;  %v1487_v27 = vld [vmem:[#allocation6_spill] sm:$0xff] }
 0x105   :  { %v362_v59 = vpop.xlane.xlu1 %361  ;;  %v326_v37 = vpop.xlane.xlu0 %325  ;;  %791 = vrsqrt.f32 %v203_v46 }
 0x106   :  { %v401_v41 = vadd.f32 1e-20, %v362_v59  ;;  %v383_v11 = vadd.f32 1e-20, %v326_v37  ;;  %v782_v52 = vpop.eup %781  ;;  %v506_v59 = vmul.f32 %v770_v22, %v1156_v58  ;;  %v559_v57 = vmul.f32 %v523_v53, %v523_v53  ;;  %v1482_v58 = vld [vmem:[#allocation4_spill] sm:$0xff] }
 0x107   :  { %v784_v63 = vpop.eup %783  ;;  %v488_v24 = vmul.f32 %v772_v3, %v1482_v58  ;;  %v472_v43 = vmul.f32 %v782_v52, %v1490_v36  ;;  %v1505_v36 = vld [vmem:[#allocation27_spill] sm:$0xff] }
 0x108   :  { %793 = vrsqrt.f32 %v401_v41  ;;  %v542_v23 = vsub.f32 %v470_v62, %v506_v59  ;;  %v593_v41 = vadd.f32 %v592_v17, %v558_v35  ;;  %v1493_v59 = vld [vmem:[#allocation16_spill] sm:$0xff]  ;;  %v1494_v35 = vld [vmem:[#allocation13_spill] sm:$0xff] }
 0x109   :  { %v184_v60 = vpop.xlane.xlu1 %183  ;;  %v148_v38 = vpop.xlane.xlu0 %147  ;;  %795 = vrsqrt.f32 %v383_v11  ;;  %v507_v11 = vmul.f32 %v778_v39, %v1484_v10  ;;  %v524_v2 = vsub.f32 %v452_v8, %v488_v24  ;;  %v1501_v8 = vld [vmem:[#allocation24_spill] sm:$0xff] }
 0x10a   :  { %v222_v44 = vadd.f32 1e-20, %v184_v60  ;;  %v204_v20 = vadd.f32 1e-20, %v148_v38  ;;  %v786_v15 = vpop.eup %785  ;;  %v577_v38 = vmul.f32 %v541_v49, %v541_v49  ;;  %v594_v16 = vadd.f32 %v593_v41, %v559_v57 }
 0x10b   :  { %v788_v47 = vpop.eup %787  ;;  %v578_v29 = vmul.f32 %v542_v23, %v542_v23  ;;  %v508_v14 = vmul.f32 %v786_v15, %v1488_v7  ;;  %v560_v17 = vmul.f32 %v524_v2, %v524_v2  ;;  %v1498_v23 = vld [vmem:[#allocation17_spill] sm:$0xff] }
 0x10c   :  { %797 = vrsqrt.f32 %v222_v44  ;;  %v617_v22 = vadd.f32 %v616_v6, %v577_v38  ;;  %v1485_v44 = vld [vmem:[#allocation8_spill] sm:$0xff] }
 0x10d   :  { %v364_v51 = vpop.xlane.xlu1 %363  ;;  %v328_v30 = vpop.xlane.xlu0 %327  ;;  %799 = vrsqrt.f32 %v204_v20  ;;  %v489_v3 = vmul.f32 %v780_v42, %v1485_v44  ;;  %v1486_v20 = vld [vmem:[#allocation5_spill] sm:$0xff]  ;;  %v544_v15 = vsub.f32 %v472_v43, %v508_v14  ;;  %v1497_v38 = vld [vmem:[#allocation20_spill] sm:$0xff]  ;;  %v595_v2 = vadd.f32 %v594_v16, %v560_v17 }
 0x10e   :  { %v402_v55 = vadd.f32 1e-20, %v364_v51  ;;  %v384_v13 = vadd.f32 1e-20, %v328_v30  ;;  %v790_v60 = vpop.eup %789  ;;  %v471_v26 = vmul.f32 %v1381_v0, %v1486_v20  ;;  %v1503_v20 = vld [vmem:[#allocation22_spill] sm:$0xff] }
 0x10f   :  { %v792_v61 = vpop.eup %791  ;;  %v580_v10 = vmul.f32 %v544_v15, %v544_v15 }
 0x110   :  { %801 = vrsqrt.f32 %v402_v55  ;;  %v453_v55 = vmul.f32 %v1385_v12, %v1487_v27  ;;  %v543_v42 = vsub.f32 %v471_v26, %v507_v11  ;;  %v1492_v12 = vld [vmem:[#allocation10_spill] sm:$0xff]  ;;  %v455_v62 = vmul.f32 %v792_v61, %v1496_v56 }
 0x111   :  { %v186_v21 = vpop.xlane.xlu1 %185  ;;  %v150_v18 = vpop.xlane.xlu0 %149  ;;  %803 = vrsqrt.f32 %v384_v13  ;;  %v454_v33 = vmul.f32 %v784_v63, %v1492_v12  ;;  %v1507_v12 = vld [vmem:[#allocation28_spill] sm:$0xff] }
 0x112   :  { %v223_v31 = vadd.f32 1e-20, %v186_v21  ;;  %v205_v48 = vadd.f32 1e-20, %v150_v18  ;;  %v794_v40 = vpop.eup %793  ;;  %v1489_v18 = vld [vmem:[#allocation12_spill] sm:$0xff]  ;;  %v525_v53 = vsub.f32 %v453_v55, %v489_v3  ;;  %v579_v24 = vmul.f32 %v543_v42, %v543_v42 }
 0x113   :  { %v796_v25 = vpop.eup %795  ;;  %v490_v39 = vmul.f32 %v788_v47, %v1489_v18 }
 0x114   :  { %805 = vrsqrt.f32 %v223_v31  ;;  %v561_v6 = vmul.f32 %v525_v53, %v525_v53 }
 0x115   :  { %v366_v37 = vpop.xlane.xlu1 %365  ;;  %v330_v34 = vpop.xlane.xlu0 %329  ;;  %807 = vrsqrt.f32 %v205_v48  ;;  %v1491_v48 = vld [vmem:[#allocation15_spill] sm:$0xff]  ;;  %v526_v52 = vsub.f32 %v454_v33, %v490_v39 }
 0x116   :  { %v403_v1 = vadd.f32 1e-20, %v366_v37  ;;  %v385_v9 = vadd.f32 1e-20, %v330_v34  ;;  %v798_v30 = vpop.eup %797  ;;  %v509_v49 = vmul.f32 %v794_v40, %v1491_v48  ;;  %v491_v37 = vmul.f32 %v796_v25, %v1493_v59 }
 0x117   :  { %v800_v4 = vpop.eup %799  ;;  %v618_v25 = vadd.f32 %v617_v22, %v578_v29  ;;  %v562_v44 = vmul.f32 %v526_v52, %v526_v52  ;;  %v596_v14 = vadd.f32 %v595_v2, %v561_v6 }
 0x118   :  { %809 = vrsqrt.f32 %v403_v1  ;;  %v473_v1 = vmul.f32 %v790_v60, %v1494_v35  ;;  %v527_v41 = vsub.f32 %v455_v62, %v491_v37  ;;  %v1500_v60 = vld [vmem:[#allocation18_spill] sm:$0xff] }
 0x119   :  { %811 = vrsqrt.f32 %v385_v9  ;;  %v188_v28 = vpop.xlane.xlu1 %187  ;;  %v152_v46 = vpop.xlane.xlu0 %151  ;;  %v1495_v9 = vld [vmem:[#allocation19_spill] sm:$0xff]  ;;  %v456_v54 = vmul.f32 %v800_v4, %v1500_v60  ;;  %v619_v27 = vadd.f32 %v618_v25, %v579_v24  ;;  %v597_v29 = vadd.f32 %v596_v14, %v562_v44 }
 0x11a   :  { %v224_v45 = vadd.f32 1e-20, %v188_v28  ;;  %v206_v51 = vadd.f32 1e-20, %v152_v46  ;;  %v802_v21 = vpop.eup %801  ;;  %v545_v63 = vsub.f32 %v473_v1, %v509_v49  ;;  %v474_v28 = vmul.f32 %v798_v30, %v1498_v23  ;;  %v1499_v46 = vld [vmem:[#allocation23_spill] sm:$0xff] }
 0x11b   :  { %v804_v31 = vpop.eup %803  ;;  %v510_v47 = vmul.f32 %v802_v21, %v1495_v9  ;;  %v620_v21 = vadd.f32 %v619_v27, %v580_v10 }
 0x11c   :  { %813 = vrsqrt.f32 %v224_v45  ;;  %v492_v57 = vmul.f32 %v804_v31, %v1497_v38  ;;  %v581_v30 = vmul.f32 %v545_v63, %v545_v63  ;;  %v1504_v31 = vld [vmem:[#allocation25_spill] sm:$0xff] }
 0x11d   :  { %v368_v5 = vpop.xlane.xlu1 %367  ;;  %v332_v13 = vpop.xlane.xlu0 %331  ;;  %815 = vrsqrt.f32 %v206_v51  ;;  %v546_v11 = vsub.f32 %v474_v28, %v510_v47  ;;  %v1502_v51 = vld [vmem:[#allocation21_spill] sm:$0xff] }
 0x11e   :  { %v404_v19 = vadd.f32 1e-20, %v368_v5  ;;  %v386_v32 = vadd.f32 1e-20, %v332_v13  ;;  %v806_v0 = vpop.eup %805  ;;  %v528_v3 = vsub.f32 %v456_v54, %v492_v57  ;;  %v563_v5 = vmul.f32 %v527_v41, %v527_v41 }
 0x11f   :  { %v808_v34 = vpop.eup %807  ;;  %v475_v61 = vmul.f32 %v806_v0, %v1502_v51  ;;  %v582_v18 = vmul.f32 %v546_v11, %v546_v11  ;;  %v1506_v0 = vld [vmem:[#allocation26_spill] sm:$0xff] }
 0x120   :  { %817 = vrsqrt.f32 %v404_v19  ;;  %v457_v26 = vmul.f32 %v808_v34, %v1503_v20  ;;  %v564_v39 = vmul.f32 %v528_v3, %v528_v3  ;;  %v598_v48 = vadd.f32 %v597_v29, %v563_v5 }
 0x121   :  { %819 = vrsqrt.f32 %v386_v32  ;;  %v621_v32 = vadd.f32 %v620_v21, %v581_v30 }
 0x122   :  { %v810_v50 = vpop.eup %809  ;;  %v599_v34 = vadd.f32 %v598_v48, %v564_v39 }
 0x123   :  { %v812_v58 = vpop.eup %811  ;;  %v511_v40 = vmul.f32 %v810_v50, %v1499_v46  ;;  %v622_v59 = vadd.f32 %v621_v32, %v582_v18 }
 0x124   :  { %v493_v45 = vmul.f32 %v812_v58, %v1501_v8 }
 0x125   :  { %v547_v55 = vsub.f32 %v475_v61, %v511_v40 }
 0x126   :  { %v814_v7 = vpop.eup %813  ;;  %v529_v13 = vsub.f32 %v457_v26, %v493_v45 }
 0x127   :  { %v816_v4 = vpop.eup %815  ;;  %v583_v16 = vmul.f32 %v547_v55, %v547_v55  ;;  %v476_v42 = vmul.f32 %v814_v7, %v1504_v31 }
 0x128   :  { %v565_v49 = vmul.f32 %v529_v13, %v529_v13  ;;  %v458_v53 = vmul.f32 %v816_v4, %v1506_v0 }
 0x129   :  { %v623_v35 = vadd.f32 %v622_v59, %v583_v16 }
 0x12a   :  { %v818_v22 = vpop.eup %817  ;;  %v600_v9 = vadd.f32 %v599_v34, %v565_v49 }
 0x12b   :  { %v820_v19 = vpop.eup %819  ;;  %v512_v43 = vmul.f32 %v818_v22, %v1505_v36 }
 0x12c   :  { %v494_v33 = vmul.f32 %v820_v19, %v1507_v12 }
 0x12d   :  { %v548_v37 = vsub.f32 %v476_v42, %v512_v43 }
 0x12e   :  { %v530_v15 = vsub.f32 %v458_v53, %v494_v33 }
 0x12f   :  { %v584_v1 = vmul.f32 %v548_v37, %v548_v37 }
 0x130   :  { %v566_v47 = vmul.f32 %v530_v15, %v530_v15 }
 0x131   :  { %v624_v50 = vadd.f32 %v623_v35, %v584_v1 }
 0x132   :  { %v601_v17 = vadd.f32 %v600_v9, %v566_v47 }
 0x133   :  { %v625_v52 = vrot.slane %v624_v50, 4 }
 0x134   :  { %v602_v56 = vrot.slane %v601_v17, 4 }
 0x135   :  { %v626_v62 = vadd.f32 %v625_v52, %v624_v50 }
 0x136   :  { %v603_v38 = vadd.f32 %v602_v56, %v601_v17 }
 0x137   :  { %v627_v57 = vrot.slane %v626_v62, 2 }
 0x138   :  { %v604_v58 = vrot.slane %v603_v38, 2 }
 0x139   :  { %v628_v24 = vadd.f32 %v627_v57, %v626_v62 }
 0x13a   :  { %v605_v63 = vadd.f32 %v604_v58, %v603_v38 }
 0x13b   :  { %v629_v23 = vrot.slane %v628_v24, 1 }
 0x13c   :  { %v606_v28 = vrot.slane %v605_v63, 1 }
 0x13d   :  { %v630_v46 = vadd.f32 %v629_v23, %v628_v24 }
 0x13e   :  { %v607_v40 = vadd.f32 %v606_v28, %v605_v63 }
 0x140   :  { %v634_v6 = vsel %vm633_vm0, %v630_v46, %v607_v40 }
 0x141   :  { %636 = vst [vmem:[%s1426_s1] sm:$0x3] %v634_v6 }

// kernel: reconstruction_loss.7
= control target key start
LH: loop header
LB: loop body
LE: loop exit
PB: predicated region body
PF: predicated region fallthrough
CT: control target
= control target key end

     0   :  { %v1092_v0 = vmov 0.0|0.0   ;;  %vm183_vm0 = vcmask 130048   ;;  %s1982_s1 = inlined_call_operand.vmem [shape: f32[144,128], index: 1, kind: input, shape index: {}]   ;;  %s1983_s0 = inlined_call_operand.vmem [shape: f32[576,144], index: 0, kind: input, shape index: {}]   ;;  %s1984_s2 = inlined_call_operand.vmem [shape: f32[1,128], index: 2, kind: input, shape index: {}]   ;;  %s1985_s3 = inlined_call_operand.vmem [shape: f32[576,128], index: 3, kind: output, shape index: {}]  }
   0x1   :  { %1046 = vmatprep.subr.bf16.mxu0 %v1092_v0  ;;  %1073 = vmatprep.subr.bf16.mxu1 %v1092_v0  ;;  %v158_v1 = vld [vmem:[%s1982_s1] sm:$0xff]  ;;  %v159_v2 = vld [vmem:[%s1982_s1 + $0x8] sm:$0xff]  ;;  %v160_v3 = vld [vmem:[%s1982_s1 + $0x10] sm:$0xff] }
   0x2   :  { %v1047_v4 = vpack.c.bf16 %v159_v2, %v158_v1  ;;  %v161_v5 = vld [vmem:[%s1982_s1 + $0x18] sm:$0xff]  ;;  %v162_v7 = vld [vmem:[%s1982_s1 + $0x20] sm:$0xff]  ;;  %v163_v8 = vld [vmem:[%s1982_s1 + $0x28] sm:$0xff] }
   0x3   :  { %v1050_v6 = vpack.c.bf16 %v161_v5, %v160_v3  ;;  %v15_v9 = vld [vmem:[%s1983_s0 + $0x8] sm:$0xff]  ;;  %v1053_v11 = vpack.c.bf16 %v163_v8, %v162_v7  ;;  %v164_v12 = vld [vmem:[%s1982_s1 + $0x30] sm:$0xff]  ;;  %v165_v13 = vld [vmem:[%s1982_s1 + $0x38] sm:$0xff] }
   0x4   :  { %1048 = vmatpush1.bf16.msra.mxu0 %v1047_v4  ;;  %1082 = vmatpush1.bf16.msra.mxu1 %v1047_v4  ;;  %v87_v10 = vld [vmem:[%s1983_s0 + $0x248] sm:$0xff]  ;;  %v1056_v14 = vpack.c.bf16 %v165_v13, %v164_v12  ;;  %v166_v15 = vld [vmem:[%s1982_s1 + $0x40] sm:$0xff]  ;;  %v168_v18 = vld [vmem:[%s1982_s1 + $0x50] sm:$0xff] }
   0x5   :  { %1049 = vmatprep.subr.bf16.mxu0 %v1092_v0  ;;  %1074 = vmatprep.subr.bf16.mxu1 %v1092_v0  ;;  %v167_v16 = vld [vmem:[%s1982_s1 + $0x48] sm:$0xff]  ;;  %v169_v19 = vld [vmem:[%s1982_s1 + $0x58] sm:$0xff]  ;;  %v170_v21 = vld [vmem:[%s1982_s1 + $0x60] sm:$0xff] }
   0x6   :  { %974 = vmatprep.mubr.msk.f32.mxu0 %vm183_vm0, %v15_v9  ;;  %1010 = vmatprep.mubr.msk.f32.mxu1 %vm183_vm0, %v87_v10  ;;  %v1059_v17 = vpack.c.bf16 %v167_v16, %v166_v15  ;;  %v1062_v20 = vpack.c.bf16 %v169_v19, %v168_v18  ;;  %v171_v22 = vld [vmem:[%s1982_s1 + $0x68] sm:$0xff]  ;;  %v172_v24 = vld [vmem:[%s1982_s1 + $0x70] sm:$0xff]  ;;  %v173_v25 = vld [vmem:[%s1982_s1 + $0x78] sm:$0xff] }
   0x7   :  { %v1065_v23 = vpack.c.bf16 %v171_v22, %v170_v21  ;;  %v1068_v26 = vpack.c.bf16 %v173_v25, %v172_v24  ;;  %v174_v27 = vld [vmem:[%s1982_s1 + $0x80] sm:$0xff]  ;;  %v175_v28 = vld [vmem:[%s1982_s1 + $0x88] sm:$0xff]  ;;  %v17_v32 = vld [vmem:[%s1983_s0 + $0x18] sm:$0xff] }
   0x8   :  { %1051 = vmatpush1.bf16.msra.mxu0 %v1050_v6  ;;  %1083 = vmatpush1.bf16.msra.mxu1 %v1050_v6  ;;  %v1071_v29 = vpack.c.bf16 %v175_v28, %v174_v27  ;;  %v14_v30 = vld [vmem:[%s1983_s0] sm:$0xff]  ;;  %v89_v33 = vld [vmem:[%s1983_s0 + $0x258] sm:$0xff]  ;;  %v16_v34 = vld [vmem:[%s1983_s0 + $0x10] sm:$0xff] }
   0x9   :  { %1052 = vmatprep.subr.bf16.mxu0 %v1092_v0  ;;  %1075 = vmatprep.subr.bf16.mxu1 %v1092_v0  ;;  %v86_v31 = vld [vmem:[%s1983_s0 + $0x240] sm:$0xff]  ;;  %v88_v35 = vld [vmem:[%s1983_s0 + $0x250] sm:$0xff]  ;;  %v19_v36 = vld [vmem:[%s1983_s0 + $0x28] sm:$0xff] }
   0xa   :  { %v91_v37 = vld [vmem:[%s1983_s0 + $0x268] sm:$0xff]  ;;  %v18_v38 = vld [vmem:[%s1983_s0 + $0x20] sm:$0xff]  ;;  %v21_v40 = vld [vmem:[%s1983_s0 + $0x38] sm:$0xff] }
   0xb   :  { %v90_v39 = vld [vmem:[%s1983_s0 + $0x260] sm:$0xff]  ;;  %v93_v41 = vld [vmem:[%s1983_s0 + $0x278] sm:$0xff]  ;;  %v20_v42 = vld [vmem:[%s1983_s0 + $0x30] sm:$0xff] }
   0xc   :  { %1054 = vmatpush1.bf16.msra.mxu0 %v1053_v11  ;;  %1084 = vmatpush1.bf16.msra.mxu1 %v1053_v11  ;;  %v92_v43 = vld [vmem:[%s1983_s0 + $0x270] sm:$0xff]  ;;  %v23_v44 = vld [vmem:[%s1983_s0 + $0x48] sm:$0xff]  ;;  %v22_v46 = vld [vmem:[%s1983_s0 + $0x40] sm:$0xff] }
   0xd   :  { %1055 = vmatprep.subr.bf16.mxu0 %v1092_v0  ;;  %1076 = vmatprep.subr.bf16.mxu1 %v1092_v0  ;;  %v95_v45 = vld [vmem:[%s1983_s0 + $0x288] sm:$0xff]  ;;  %v94_v47 = vld [vmem:[%s1983_s0 + $0x280] sm:$0xff]  ;;  %v25_v48 = vld [vmem:[%s1983_s0 + $0x58] sm:$0xff] }
   0xe   :  { %v97_v49 = vld [vmem:[%s1983_s0 + $0x298] sm:$0xff]  ;;  %v24_v50 = vld [vmem:[%s1983_s0 + $0x50] sm:$0xff]  ;;  %v27_v52 = vld [vmem:[%s1983_s0 + $0x68] sm:$0xff] }
   0xf   :  { %v96_v51 = vld [vmem:[%s1983_s0 + $0x290] sm:$0xff]  ;;  %v99_v53 = vld [vmem:[%s1983_s0 + $0x2a8] sm:$0xff]  ;;  %v26_v54 = vld [vmem:[%s1983_s0 + $0x60] sm:$0xff] }
  0x10   :  { %1057 = vmatpush1.bf16.msra.mxu0 %v1056_v14  ;;  %1085 = vmatpush1.bf16.msra.mxu1 %v1056_v14  ;;  %v98_v55 = vld [vmem:[%s1983_s0 + $0x2a0] sm:$0xff]  ;;  %v29_v56 = vld [vmem:[%s1983_s0 + $0x78] sm:$0xff]  ;;  %v28_v58 = vld [vmem:[%s1983_s0 + $0x70] sm:$0xff] }
  0x11   :  { %1058 = vmatprep.subr.bf16.mxu0 %v1092_v0  ;;  %1077 = vmatprep.subr.bf16.mxu1 %v1092_v0  ;;  %v101_v57 = vld [vmem:[%s1983_s0 + $0x2b8] sm:$0xff]  ;;  %v100_v59 = vld [vmem:[%s1983_s0 + $0x2b0] sm:$0xff]  ;;  %v31_v60 = vld [vmem:[%s1983_s0 + $0x88] sm:$0xff] }
  0x12   :  { %v103_v61 = vld [vmem:[%s1983_s0 + $0x2c8] sm:$0xff]  ;;  %v30_v62 = vld [vmem:[%s1983_s0 + $0x80] sm:$0xff]  ;;  %v105_v1 = vld [vmem:[%s1983_s0 + $0x2d8] sm:$0xff] }
  0x13   :  { %v102_v63 = vld [vmem:[%s1983_s0 + $0x2c0] sm:$0xff]  ;;  %v32_v2 = vld [vmem:[%s1983_s0 + $0x90] sm:$0xff]  ;;  %v35_v4 = vld [vmem:[%s1983_s0 + $0xa8] sm:$0xff] }
  0x14   :  { %1060 = vmatpush1.bf16.msra.mxu0 %v1059_v17  ;;  %1086 = vmatpush1.bf16.msra.mxu1 %v1059_v17  ;;  %v104_v3 = vld [vmem:[%s1983_s0 + $0x2d0] sm:$0xff]  ;;  %v107_v5 = vld [vmem:[%s1983_s0 + $0x2e8] sm:$0xff]  ;;  %v34_v6 = vld [vmem:[%s1983_s0 + $0xa0] sm:$0xff] }
  0x15   :  { %1061 = vmatprep.subr.bf16.mxu0 %v1092_v0  ;;  %1078 = vmatprep.subr.bf16.mxu1 %v1092_v0  ;;  %v106_v7 = vld [vmem:[%s1983_s0 + $0x2e0] sm:$0xff]  ;;  %v37_v8 = vld [vmem:[%s1983_s0 + $0xb8] sm:$0xff]  ;;  %v36_v10 = vld [vmem:[%s1983_s0 + $0xb0] sm:$0xff] }
  0x16   :  { %v109_v9 = vld [vmem:[%s1983_s0 + $0x2f8] sm:$0xff]  ;;  %v108_v11 = vld [vmem:[%s1983_s0 + $0x2f0] sm:$0xff]  ;;  %v39_v12 = vld [vmem:[%s1983_s0 + $0xc8] sm:$0xff] }
  0x17   :  { %v111_v13 = vld [vmem:[%s1983_s0 + $0x308] sm:$0xff]  ;;  %v38_v14 = vld [vmem:[%s1983_s0 + $0xc0] sm:$0xff]  ;;  %v41_v16 = vld [vmem:[%s1983_s0 + $0xd8] sm:$0xff] }
  0x18   :  { %1063 = vmatpush1.bf16.msra.mxu0 %v1062_v20  ;;  %1087 = vmatpush1.bf16.msra.mxu1 %v1062_v20  ;;  %v110_v15 = vld [vmem:[%s1983_s0 + $0x300] sm:$0xff]  ;;  %v113_v17 = vld [vmem:[%s1983_s0 + $0x318] sm:$0xff]  ;;  %v40_v18 = vld [vmem:[%s1983_s0 + $0xd0] sm:$0xff] }
  0x19   :  { %1064 = vmatprep.subr.bf16.mxu0 %v1092_v0  ;;  %1079 = vmatprep.subr.bf16.mxu1 %v1092_v0  ;;  %v112_v19 = vld [vmem:[%s1983_s0 + $0x310] sm:$0xff]  ;;  %v43_v20 = vld [vmem:[%s1983_s0 + $0xe8] sm:$0xff]  ;;  %v42_v22 = vld [vmem:[%s1983_s0 + $0xe0] sm:$0xff] }
  0x1a   :  { %v115_v21 = vld [vmem:[%s1983_s0 + $0x328] sm:$0xff]  ;;  %v45_v24 = vld [vmem:[%s1983_s0 + $0xf8] sm:$0xff]  ;;  %v116_v27 = vld [vmem:[%s1983_s0 + $0x330] sm:$0xff] }
  0x1b   :  { %v117_v25 = vld [vmem:[%s1983_s0 + $0x338] sm:$0xff]  ;;  %v47_v28 = vld [vmem:[%s1983_s0 + $0x108] sm:$0xff] }
  0x1c   :  { %1066 = vmatpush1.bf16.msra.mxu0 %v1065_v23  ;;  %1088 = vmatpush1.bf16.msra.mxu1 %v1065_v23  ;;  %v114_v23 = vld [vmem:[%s1983_s0 + $0x320] sm:$0xff] }
  0x1d   :  { %1067 = vmatprep.subr.bf16.mxu0 %v1092_v0  ;;  %1080 = vmatprep.subr.bf16.mxu1 %v1092_v0 }
  0x20   :  { %1069 = vmatpush1.bf16.msra.mxu0 %v1068_v26  ;;  %1089 = vmatpush1.bf16.msra.mxu1 %v1068_v26  ;;  %v44_v26 = vld [vmem:[%s1983_s0 + $0xf0] sm:$0xff] }
  0x21   :  { %1070 = vmatprep.subr.bf16.mxu0 %v1092_v0  ;;  %1081 = vmatprep.subr.bf16.mxu1 %v1092_v0  ;;  %v33_v0 = vld [vmem:[%s1983_s0 + $0x98] sm:$0xff] }
  0x24   :  { %1072 = vmatpush1.bf16.msra.mxu0 %v1071_v29  ;;  %1090 = vmatpush1.bf16.msra.mxu1 %v1071_v29  ;;  %v119_v29 = vld [vmem:[%s1983_s0 + $0x348] sm:$0xff] }
  0x27   :  { %465 = vmatmul.mubr.f32.vlgmr.msra.gmra.mrb[0].mxu0 %v14_v30  ;;  %645 = vmatmul.mubr.f32.vlgmr.msra.gmra.mrb[0].mxu1 %v86_v31  ;;  %v46_v30 = vld [vmem:[%s1983_s0 + $0x100] sm:$0xff] }
  0x28   :  { %975 = vmatprep.mubr.msk.f32.mxu0 %vm183_vm0, %v17_v32  ;;  %1011 = vmatprep.mubr.msk.f32.mxu1 %vm183_vm0, %v89_v33  ;;  %v118_v31 = vld [vmem:[%s1983_s0 + $0x340] sm:$0xff]  ;;  %v49_v32 = vld [vmem:[%s1983_s0 + $0x118] sm:$0xff] }
  0x29   :  { %v121_v33 = vld [vmem:[%s1983_s0 + $0x358] sm:$0xff] }
  0x2b   :  { %470 = vmatmul.mubr.f32.gmra.mrb[2].mxu0 %v16_v34  ;;  %650 = vmatmul.mubr.f32.gmra.mrb[2].mxu1 %v88_v35  ;;  %v48_v34 = vld [vmem:[%s1983_s0 + $0x110] sm:$0xff] }
  0x2c   :  { %976 = vmatprep.mubr.msk.f32.mxu0 %vm183_vm0, %v19_v36  ;;  %1012 = vmatprep.mubr.msk.f32.mxu1 %vm183_vm0, %v91_v37  ;;  %v120_v35 = vld [vmem:[%s1983_s0 + $0x350] sm:$0xff]  ;;  %v51_v36 = vld [vmem:[%s1983_s0 + $0x128] sm:$0xff] }
  0x2d   :  { %v123_v37 = vld [vmem:[%s1983_s0 + $0x368] sm:$0xff] }
  0x2f   :  { %475 = vmatmul.mubr.f32.gmra.mrb[4].mxu0 %v18_v38  ;;  %655 = vmatmul.mubr.f32.gmra.mrb[4].mxu1 %v90_v39  ;;  %v50_v38 = vld [vmem:[%s1983_s0 + $0x120] sm:$0xff] }
  0x30   :  { %977 = vmatprep.mubr.msk.f32.mxu0 %vm183_vm0, %v21_v40  ;;  %1013 = vmatprep.mubr.msk.f32.mxu1 %vm183_vm0, %v93_v41  ;;  %v122_v39 = vld [vmem:[%s1983_s0 + $0x360] sm:$0xff]  ;;  %v53_v40 = vld [vmem:[%s1983_s0 + $0x138] sm:$0xff] }
  0x31   :  { %v125_v41 = vld [vmem:[%s1983_s0 + $0x378] sm:$0xff] }
  0x33   :  { %480 = vmatmul.mubr.f32.gmra.mrb[6].mxu0 %v20_v42  ;;  %660 = vmatmul.mubr.f32.gmra.mrb[6].mxu1 %v92_v43  ;;  %v52_v42 = vld [vmem:[%s1983_s0 + $0x130] sm:$0xff] }
  0x34   :  { %978 = vmatprep.mubr.msk.f32.mxu0 %vm183_vm0, %v23_v44  ;;  %1014 = vmatprep.mubr.msk.f32.mxu1 %vm183_vm0, %v95_v45  ;;  %v124_v43 = vld [vmem:[%s1983_s0 + $0x370] sm:$0xff]  ;;  %v55_v44 = vld [vmem:[%s1983_s0 + $0x148] sm:$0xff] }
  0x35   :  { %v127_v45 = vld [vmem:[%s1983_s0 + $0x388] sm:$0xff] }
  0x37   :  { %485 = vmatmul.mubr.f32.gmra.mrb[8].mxu0 %v22_v46  ;;  %665 = vmatmul.mubr.f32.gmra.mrb[8].mxu1 %v94_v47  ;;  %v54_v46 = vld [vmem:[%s1983_s0 + $0x140] sm:$0xff] }
  0x38   :  { %979 = vmatprep.mubr.msk.f32.mxu0 %vm183_vm0, %v25_v48  ;;  %1015 = vmatprep.mubr.msk.f32.mxu1 %vm183_vm0, %v97_v49  ;;  %v126_v47 = vld [vmem:[%s1983_s0 + $0x380] sm:$0xff]  ;;  %v57_v48 = vld [vmem:[%s1983_s0 + $0x158] sm:$0xff] }
  0x39   :  { %v129_v49 = vld [vmem:[%s1983_s0 + $0x398] sm:$0xff] }
  0x3b   :  { %490 = vmatmul.mubr.f32.gmra.mrb[10].mxu0 %v24_v50  ;;  %670 = vmatmul.mubr.f32.gmra.mrb[10].mxu1 %v96_v51  ;;  %v56_v50 = vld [vmem:[%s1983_s0 + $0x150] sm:$0xff] }
  0x3c   :  { %980 = vmatprep.mubr.msk.f32.mxu0 %vm183_vm0, %v27_v52  ;;  %1016 = vmatprep.mubr.msk.f32.mxu1 %vm183_vm0, %v99_v53  ;;  %v128_v51 = vld [vmem:[%s1983_s0 + $0x390] sm:$0xff]  ;;  %v59_v52 = vld [vmem:[%s1983_s0 + $0x168] sm:$0xff] }
  0x3d   :  { %v131_v53 = vld [vmem:[%s1983_s0 + $0x3a8] sm:$0xff] }
  0x3f   :  { %495 = vmatmul.mubr.f32.gmra.mrb[12].mxu0 %v26_v54  ;;  %675 = vmatmul.mubr.f32.gmra.mrb[12].mxu1 %v98_v55  ;;  %v58_v54 = vld [vmem:[%s1983_s0 + $0x160] sm:$0xff] }
  0x40   :  { %981 = vmatprep.mubr.msk.f32.mxu0 %vm183_vm0, %v29_v56  ;;  %1017 = vmatprep.mubr.msk.f32.mxu1 %vm183_vm0, %v101_v57  ;;  %v130_v55 = vld [vmem:[%s1983_s0 + $0x3a0] sm:$0xff]  ;;  %v61_v56 = vld [vmem:[%s1983_s0 + $0x178] sm:$0xff] }
  0x41   :  { %v133_v57 = vld [vmem:[%s1983_s0 + $0x3b8] sm:$0xff] }
  0x43   :  { %500 = vmatmul.mubr.f32.gmra.mrb[14].mxu0 %v28_v58  ;;  %680 = vmatmul.mubr.f32.gmra.mrb[14].mxu1 %v100_v59  ;;  %v60_v58 = vld [vmem:[%s1983_s0 + $0x170] sm:$0xff] }
  0x44   :  { %982 = vmatprep.mubr.msk.f32.mxu0 %vm183_vm0, %v31_v60  ;;  %1018 = vmatprep.mubr.msk.f32.mxu1 %vm183_vm0, %v103_v61  ;;  %v132_v59 = vld [vmem:[%s1983_s0 + $0x3b0] sm:$0xff]  ;;  %v63_v60 = vld [vmem:[%s1983_s0 + $0x188] sm:$0xff] }
  0x45   :  { %v135_v61 = vld [vmem:[%s1983_s0 + $0x3c8] sm:$0xff] }
  0x47   :  { %505 = vmatmul.mubr.f32.gmra.mrb[16].mxu0 %v30_v62  ;;  %685 = vmatmul.mubr.f32.gmra.mrb[16].mxu1 %v102_v63  ;;  %v62_v62 = vld [vmem:[%s1983_s0 + $0x180] sm:$0xff] }
  0x48   :  { %983 = vmatprep.mubr.msk.f32.mxu0 %vm183_vm0, %v33_v0  ;;  %1019 = vmatprep.mubr.msk.f32.mxu1 %vm183_vm0, %v105_v1  ;;  %v134_v63 = vld [vmem:[%s1983_s0 + $0x3c0] sm:$0xff]  ;;  %v65_v0 = vld [vmem:[%s1983_s0 + $0x198] sm:$0xff] }
  0x49   :  { %v137_v1 = vld [vmem:[%s1983_s0 + $0x3d8] sm:$0xff] }
  0x4b   :  { %510 = vmatmul.mubr.f32.gmra.mrb[18].mxu0 %v32_v2  ;;  %690 = vmatmul.mubr.f32.gmra.mrb[18].mxu1 %v104_v3  ;;  %v64_v2 = vld [vmem:[%s1983_s0 + $0x190] sm:$0xff] }
  0x4c   :  { %984 = vmatprep.mubr.msk.f32.mxu0 %vm183_vm0, %v35_v4  ;;  %1020 = vmatprep.mubr.msk.f32.mxu1 %vm183_vm0, %v107_v5  ;;  %v136_v3 = vld [vmem:[%s1983_s0 + $0x3d0] sm:$0xff]  ;;  %v67_v4 = vld [vmem:[%s1983_s0 + $0x1a8] sm:$0xff] }
  0x4d   :  { %v139_v5 = vld [vmem:[%s1983_s0 + $0x3e8] sm:$0xff] }
  0x4f   :  { %515 = vmatmul.mubr.f32.gmra.mrb[20].mxu0 %v34_v6  ;;  %695 = vmatmul.mubr.f32.gmra.mrb[20].mxu1 %v106_v7  ;;  %v66_v6 = vld [vmem:[%s1983_s0 + $0x1a0] sm:$0xff] }
  0x50   :  { %985 = vmatprep.mubr.msk.f32.mxu0 %vm183_vm0, %v37_v8  ;;  %1021 = vmatprep.mubr.msk.f32.mxu1 %vm183_vm0, %v109_v9  ;;  %v138_v7 = vld [vmem:[%s1983_s0 + $0x3e0] sm:$0xff]  ;;  %v69_v8 = vld [vmem:[%s1983_s0 + $0x1b8] sm:$0xff] }
  0x51   :  { %v141_v9 = vld [vmem:[%s1983_s0 + $0x3f8] sm:$0xff] }
  0x53   :  { %520 = vmatmul.mubr.f32.gmra.mrb[22].mxu0 %v36_v10  ;;  %700 = vmatmul.mubr.f32.gmra.mrb[22].mxu1 %v108_v11  ;;  %v68_v10 = vld [vmem:[%s1983_s0 + $0x1b0] sm:$0xff] }
  0x54   :  { %986 = vmatprep.mubr.msk.f32.mxu0 %vm183_vm0, %v39_v12  ;;  %1022 = vmatprep.mubr.msk.f32.mxu1 %vm183_vm0, %v111_v13  ;;  %v140_v11 = vld [vmem:[%s1983_s0 + $0x3f0] sm:$0xff]  ;;  %v71_v12 = vld [vmem:[%s1983_s0 + $0x1c8] sm:$0xff] }
  0x55   :  { %v143_v13 = vld [vmem:[%s1983_s0 + $0x408] sm:$0xff] }
  0x57   :  { %525 = vmatmul.mubr.f32.gmra.mrb[24].mxu0 %v38_v14  ;;  %705 = vmatmul.mubr.f32.gmra.mrb[24].mxu1 %v110_v15  ;;  %v70_v14 = vld [vmem:[%s1983_s0 + $0x1c0] sm:$0xff] }
  0x58   :  { %987 = vmatprep.mubr.msk.f32.mxu0 %vm183_vm0, %v41_v16  ;;  %1023 = vmatprep.mubr.msk.f32.mxu1 %vm183_vm0, %v113_v17  ;;  %v142_v15 = vld [vmem:[%s1983_s0 + $0x400] sm:$0xff]  ;;  %v73_v16 = vld [vmem:[%s1983_s0 + $0x1d8] sm:$0xff] }
  0x59   :  { %v145_v17 = vld [vmem:[%s1983_s0 + $0x418] sm:$0xff] }
  0x5b   :  { %530 = vmatmul.mubr.f32.gmra.mrb[26].mxu0 %v40_v18  ;;  %710 = vmatmul.mubr.f32.gmra.mrb[26].mxu1 %v112_v19  ;;  %v72_v18 = vld [vmem:[%s1983_s0 + $0x1d0] sm:$0xff] }
  0x5c   :  { %988 = vmatprep.mubr.msk.f32.mxu0 %vm183_vm0, %v43_v20  ;;  %1024 = vmatprep.mubr.msk.f32.mxu1 %vm183_vm0, %v115_v21  ;;  %v144_v19 = vld [vmem:[%s1983_s0 + $0x410] sm:$0xff]  ;;  %v75_v20 = vld [vmem:[%s1983_s0 + $0x1e8] sm:$0xff] }
  0x5d   :  { %v147_v21 = vld [vmem:[%s1983_s0 + $0x428] sm:$0xff] }
  0x5f   :  { %535 = vmatmul.mubr.f32.gmra.mrb[28].mxu0 %v42_v22  ;;  %715 = vmatmul.mubr.f32.gmra.mrb[28].mxu1 %v114_v23  ;;  %v74_v22 = vld [vmem:[%s1983_s0 + $0x1e0] sm:$0xff] }
  0x60   :  { %989 = vmatprep.mubr.msk.f32.mxu0 %vm183_vm0, %v45_v24  ;;  %1025 = vmatprep.mubr.msk.f32.mxu1 %vm183_vm0, %v117_v25  ;;  %v146_v23 = vld [vmem:[%s1983_s0 + $0x420] sm:$0xff]  ;;  %v77_v24 = vld [vmem:[%s1983_s0 + $0x1f8] sm:$0xff] }
  0x61   :  { %v149_v25 = vld [vmem:[%s1983_s0 + $0x438] sm:$0xff] }
  0x63   :  { %540 = vmatmul.mubr.f32.gmra.mrb[30].mxu0 %v44_v26  ;;  %720 = vmatmul.mubr.f32.gmra.mrb[30].mxu1 %v116_v27  ;;  %v76_v26 = vld [vmem:[%s1983_s0 + $0x1f0] sm:$0xff] }
  0x64   :  { %990 = vmatprep.mubr.msk.f32.mxu0 %vm183_vm0, %v47_v28  ;;  %1026 = vmatprep.mubr.msk.f32.mxu1 %vm183_vm0, %v119_v29  ;;  %v148_v27 = vld [vmem:[%s1983_s0 + $0x430] sm:$0xff]  ;;  %v79_v28 = vld [vmem:[%s1983_s0 + $0x208] sm:$0xff] }
  0x65   :  { %v151_v29 = vld [vmem:[%s1983_s0 + $0x448] sm:$0xff] }
  0x67   :  { %545 = vmatmul.mubr.f32.gmra.mrb[32].mxu0 %v46_v30  ;;  %725 = vmatmul.mubr.f32.gmra.mrb[32].mxu1 %v118_v31  ;;  %v78_v30 = vld [vmem:[%s1983_s0 + $0x200] sm:$0xff] }
  0x68   :  { %991 = vmatprep.mubr.msk.f32.mxu0 %vm183_vm0, %v49_v32  ;;  %1027 = vmatprep.mubr.msk.f32.mxu1 %vm183_vm0, %v121_v33  ;;  %v150_v31 = vld [vmem:[%s1983_s0 + $0x440] sm:$0xff]  ;;  %v81_v32 = vld [vmem:[%s1983_s0 + $0x218] sm:$0xff] }
  0x69   :  { %v153_v33 = vld [vmem:[%s1983_s0 + $0x458] sm:$0xff] }
  0x6b   :  { %550 = vmatmul.mubr.f32.gmra.mrb[34].mxu0 %v48_v34  ;;  %730 = vmatmul.mubr.f32.gmra.mrb[34].mxu1 %v120_v35  ;;  %v80_v34 = vld [vmem:[%s1983_s0 + $0x210] sm:$0xff] }
  0x6c   :  { %992 = vmatprep.mubr.msk.f32.mxu0 %vm183_vm0, %v51_v36  ;;  %1028 = vmatprep.mubr.msk.f32.mxu1 %vm183_vm0, %v123_v37  ;;  %v152_v35 = vld [vmem:[%s1983_s0 + $0x450] sm:$0xff]  ;;  %v83_v36 = vld [vmem:[%s1983_s0 + $0x228] sm:$0xff] }
  0x6d   :  { %v155_v37 = vld [vmem:[%s1983_s0 + $0x468] sm:$0xff] }
  0x6f   :  { %555 = vmatmul.mubr.f32.gmra.mrb[36].mxu0 %v50_v38  ;;  %735 = vmatmul.mubr.f32.gmra.mrb[36].mxu1 %v122_v39  ;;  %v82_v38 = vld [vmem:[%s1983_s0 + $0x220] sm:$0xff] }
  0x70   :  { %993 = vmatprep.mubr.msk.f32.mxu0 %vm183_vm0, %v53_v40  ;;  %1029 = vmatprep.mubr.msk.f32.mxu1 %vm183_vm0, %v125_v41  ;;  %v154_v39 = vld [vmem:[%s1983_s0 + $0x460] sm:$0xff]  ;;  %v85_v40 = vld [vmem:[%s1983_s0 + $0x238] sm:$0xff] }
  0x71   :  { %v157_v41 = vld [vmem:[%s1983_s0 + $0x478] sm:$0xff] }
  0x73   :  { %560 = vmatmul.mubr.f32.gmra.mrb[38].mxu0 %v52_v42  ;;  %740 = vmatmul.mubr.f32.gmra.mrb[38].mxu1 %v124_v43  ;;  %v84_v42 = vld [vmem:[%s1983_s0 + $0x230] sm:$0xff] }
  0x74   :  { %994 = vmatprep.mubr.msk.f32.mxu0 %vm183_vm0, %v55_v44  ;;  %1030 = vmatprep.mubr.msk.f32.mxu1 %vm183_vm0, %v127_v45  ;;  %v156_v43 = vld [vmem:[%s1983_s0 + $0x470] sm:$0xff]  ;;  %v1692_v44 = vld [vmem:[%s1984_s2] ss:$0 sm:$0xff] }
  0x77   :  { %565 = vmatmul.mubr.f32.gmra.mrb[40].mxu0 %v54_v46  ;;  %745 = vmatmul.mubr.f32.gmra.mrb[40].mxu1 %v126_v47 }
  0x78   :  { %995 = vmatprep.mubr.msk.f32.mxu0 %vm183_vm0, %v57_v48  ;;  %1031 = vmatprep.mubr.msk.f32.mxu1 %vm183_vm0, %v129_v49 }
  0x7b   :  { %570 = vmatmul.mubr.f32.gmra.mrb[42].mxu0 %v56_v50  ;;  %750 = vmatmul.mubr.f32.gmra.mrb[42].mxu1 %v128_v51 }
  0x7c   :  { %996 = vmatprep.mubr.msk.f32.mxu0 %vm183_vm0, %v59_v52  ;;  %1032 = vmatprep.mubr.msk.f32.mxu1 %vm183_vm0, %v131_v53 }
  0x7f   :  { %575 = vmatmul.mubr.f32.gmra.mrb[44].mxu0 %v58_v54  ;;  %755 = vmatmul.mubr.f32.gmra.mrb[44].mxu1 %v130_v55 }
  0x80   :  { %997 = vmatprep.mubr.msk.f32.mxu0 %vm183_vm0, %v61_v56  ;;  %1033 = vmatprep.mubr.msk.f32.mxu1 %vm183_vm0, %v133_v57 }
  0x83   :  { %580 = vmatmul.mubr.f32.gmra.mrb[46].mxu0 %v60_v58  ;;  %760 = vmatmul.mubr.f32.gmra.mrb[46].mxu1 %v132_v59 }
  0x84   :  { %998 = vmatprep.mubr.msk.f32.mxu0 %vm183_vm0, %v63_v60  ;;  %1034 = vmatprep.mubr.msk.f32.mxu1 %vm183_vm0, %v135_v61 }
  0x87   :  { %585 = vmatmul.mubr.f32.gmra.mrb[48].mxu0 %v62_v62  ;;  %765 = vmatmul.mubr.f32.gmra.mrb[48].mxu1 %v134_v63 }
  0x88   :  { %999 = vmatprep.mubr.msk.f32.mxu0 %vm183_vm0, %v65_v0  ;;  %1035 = vmatprep.mubr.msk.f32.mxu1 %vm183_vm0, %v137_v1 }
  0x8b   :  { %590 = vmatmul.mubr.f32.gmra.mrb[50].mxu0 %v64_v2  ;;  %770 = vmatmul.mubr.f32.gmra.mrb[50].mxu1 %v136_v3 }
  0x8c   :  { %1000 = vmatprep.mubr.msk.f32.mxu0 %vm183_vm0, %v67_v4  ;;  %1036 = vmatprep.mubr.msk.f32.mxu1 %vm183_vm0, %v139_v5 }
  0x8f   :  { %595 = vmatmul.mubr.f32.gmra.mrb[52].mxu0 %v66_v6  ;;  %775 = vmatmul.mubr.f32.gmra.mrb[52].mxu1 %v138_v7 }
  0x90   :  { %1001 = vmatprep.mubr.msk.f32.mxu0 %vm183_vm0, %v69_v8  ;;  %1037 = vmatprep.mubr.msk.f32.mxu1 %vm183_vm0, %v141_v9 }
  0x93   :  { %600 = vmatmul.mubr.f32.gmra.mrb[54].mxu0 %v68_v10  ;;  %780 = vmatmul.mubr.f32.gmra.mrb[54].mxu1 %v140_v11 }
  0x94   :  { %1002 = vmatprep.mubr.msk.f32.mxu0 %vm183_vm0, %v71_v12  ;;  %1038 = vmatprep.mubr.msk.f32.mxu1 %vm183_vm0, %v143_v13 }
  0x97   :  { %605 = vmatmul.mubr.f32.gmra.mrb[56].mxu0 %v70_v14  ;;  %785 = vmatmul.mubr.f32.gmra.mrb[56].mxu1 %v142_v15 }
  0x98   :  { %1003 = vmatprep.mubr.msk.f32.mxu0 %vm183_vm0, %v73_v16  ;;  %1039 = vmatprep.mubr.msk.f32.mxu1 %vm183_vm0, %v145_v17 }
  0x9b   :  { %610 = vmatmul.mubr.f32.gmra.mrb[58].mxu0 %v72_v18  ;;  %790 = vmatmul.mubr.f32.gmra.mrb[58].mxu1 %v144_v19 }
  0x9c   :  { %1004 = vmatprep.mubr.msk.f32.mxu0 %vm183_vm0, %v75_v20  ;;  %1040 = vmatprep.mubr.msk.f32.mxu1 %vm183_vm0, %v147_v21 }
  0x9f   :  { %615 = vmatmul.mubr.f32.gmra.mrb[60].mxu0 %v74_v22  ;;  %795 = vmatmul.mubr.f32.gmra.mrb[60].mxu1 %v146_v23 }
  0xa0   :  { %1005 = vmatprep.mubr.msk.f32.mxu0 %vm183_vm0, %v77_v24  ;;  %1041 = vmatprep.mubr.msk.f32.mxu1 %vm183_vm0, %v149_v25 }
  0xa3   :  { %620 = vmatmul.mubr.f32.gmra.mrb[62].mxu0 %v76_v26  ;;  %800 = vmatmul.mubr.f32.gmra.mrb[62].mxu1 %v148_v27 }
  0xa4   :  { %1006 = vmatprep.mubr.msk.f32.mxu0 %vm183_vm0, %v79_v28  ;;  %1042 = vmatprep.mubr.msk.f32.mxu1 %vm183_vm0, %v151_v29 }
  0xa7   :  { %625 = vmatmul.mubr.f32.gmra.mrb[64].mxu0 %v78_v30  ;;  %805 = vmatmul.mubr.f32.gmra.mrb[64].mxu1 %v150_v31 }
  0xa8   :  { %1007 = vmatprep.mubr.msk.f32.mxu0 %vm183_vm0, %v81_v32  ;;  %1043 = vmatprep.mubr.msk.f32.mxu1 %vm183_vm0, %v153_v33 }
  0xab   :  { %630 = vmatmul.mubr.f32.gmra.mrb[66].mxu0 %v80_v34  ;;  %810 = vmatmul.mubr.f32.gmra.mrb[66].mxu1 %v152_v35 }
  0xac   :  { %1008 = vmatprep.mubr.msk.f32.mxu0 %vm183_vm0, %v83_v36  ;;  %1044 = vmatprep.mubr.msk.f32.mxu1 %vm183_vm0, %v155_v37 }
  0xaf   :  { %635 = vmatmul.mubr.f32.gmra.mrb[68].mxu0 %v82_v38  ;;  %815 = vmatmul.mubr.f32.gmra.mrb[68].mxu1 %v154_v39 }
  0xb0   :  { %1009 = vmatprep.mubr.msk.f32.mxu0 %vm183_vm0, %v85_v40  ;;  %1045 = vmatprep.mubr.msk.f32.mxu1 %vm183_vm0, %v157_v41 }
  0xb3   :  { %640 = vmatmul.mubr.f32.gmra.mrb[70].mxu0 %v84_v42  ;;  %820 = vmatmul.mubr.f32.gmra.mrb[70].mxu1 %v156_v43 }
  0xfa   :  { %v466_v45 = vpop.f32.mrb[0].mxu0  ;;  %v646_v46 = vpop.f32.mrb[0].mxu1 }
  0xfb   :  { %v467_v47 = vadd.f32 %v1692_v44, %v466_v45  ;;  %v647_v48 = vadd.f32 %v1692_v44, %v646_v46  ;;  %v468_v49 = vpop.f32.mrb[1].mxu0  ;;  %v648_v50 = vpop.f32.mrb[1].mxu1 }
  0xfd   :  { %v825_v51 = vmax.f32 %v467_v47, 0.0  ;;  %v861_v52 = vmax.f32 %v647_v48, 0.0 }
  0xfe   :  { %v471_v53 = vpop.f32.mrb[2].mxu0  ;;  %v651_v54 = vpop.f32.mrb[2].mxu1 }
  0xff   :  { %897 = vst [vmem:[%s1985_s3] sm:$0xff] %v825_v51  ;;  %933 = vst [vmem:[%s1985_s3 + $0x120] sm:$0xff] %v861_v52  ;;  %v472_v55 = vadd.f32 %v1692_v44, %v471_v53  ;;  %v652_v56 = vadd.f32 %v1692_v44, %v651_v54  ;;  %v473_v57 = vpop.f32.mrb[3].mxu0  ;;  %v653_v58 = vpop.f32.mrb[3].mxu1 }
 0x101   :  { %v826_v59 = vmax.f32 %v472_v55, 0.0  ;;  %v862_v60 = vmax.f32 %v652_v56, 0.0 }
 0x102   :  { %v476_v61 = vpop.f32.mrb[4].mxu0  ;;  %v656_v62 = vpop.f32.mrb[4].mxu1 }
 0x103   :  { %898 = vst [vmem:[%s1985_s3 + $0x8] sm:$0xff] %v826_v59  ;;  %934 = vst [vmem:[%s1985_s3 + $0x128] sm:$0xff] %v862_v60  ;;  %v477_v63 = vadd.f32 %v1692_v44, %v476_v61  ;;  %v657_v0 = vadd.f32 %v1692_v44, %v656_v62  ;;  %v478_v1 = vpop.f32.mrb[5].mxu0  ;;  %v658_v2 = vpop.f32.mrb[5].mxu1 }
 0x105   :  { %v827_v3 = vmax.f32 %v477_v63, 0.0  ;;  %v863_v4 = vmax.f32 %v657_v0, 0.0 }
 0x106   :  { %v481_v5 = vpop.f32.mrb[6].mxu0  ;;  %v661_v6 = vpop.f32.mrb[6].mxu1 }
 0x107   :  { %899 = vst [vmem:[%s1985_s3 + $0x10] sm:$0xff] %v827_v3  ;;  %935 = vst [vmem:[%s1985_s3 + $0x130] sm:$0xff] %v863_v4  ;;  %v482_v7 = vadd.f32 %v1692_v44, %v481_v5  ;;  %v662_v8 = vadd.f32 %v1692_v44, %v661_v6  ;;  %v483_v9 = vpop.f32.mrb[7].mxu0  ;;  %v663_v10 = vpop.f32.mrb[7].mxu1 }
 0x109   :  { %v828_v11 = vmax.f32 %v482_v7, 0.0  ;;  %v864_v12 = vmax.f32 %v662_v8, 0.0 }
 0x10a   :  { %v486_v13 = vpop.f32.mrb[8].mxu0  ;;  %v666_v14 = vpop.f32.mrb[8].mxu1 }
 0x10b   :  { %900 = vst [vmem:[%s1985_s3 + $0x18] sm:$0xff] %v828_v11  ;;  %936 = vst [vmem:[%s1985_s3 + $0x138] sm:$0xff] %v864_v12  ;;  %v487_v15 = vadd.f32 %v1692_v44, %v486_v13  ;;  %v667_v16 = vadd.f32 %v1692_v44, %v666_v14  ;;  %v488_v17 = vpop.f32.mrb[9].mxu0  ;;  %v668_v18 = vpop.f32.mrb[9].mxu1 }
 0x10d   :  { %v829_v19 = vmax.f32 %v487_v15, 0.0  ;;  %v865_v20 = vmax.f32 %v667_v16, 0.0 }
 0x10e   :  { %v491_v21 = vpop.f32.mrb[10].mxu0  ;;  %v671_v22 = vpop.f32.mrb[10].mxu1 }
 0x10f   :  { %901 = vst [vmem:[%s1985_s3 + $0x20] sm:$0xff] %v829_v19  ;;  %937 = vst [vmem:[%s1985_s3 + $0x140] sm:$0xff] %v865_v20  ;;  %v492_v23 = vadd.f32 %v1692_v44, %v491_v21  ;;  %v672_v24 = vadd.f32 %v1692_v44, %v671_v22  ;;  %v493_v25 = vpop.f32.mrb[11].mxu0  ;;  %v673_v26 = vpop.f32.mrb[11].mxu1 }
 0x111   :  { %v830_v27 = vmax.f32 %v492_v23, 0.0  ;;  %v866_v28 = vmax.f32 %v672_v24, 0.0 }
 0x112   :  { %v496_v29 = vpop.f32.mrb[12].mxu0  ;;  %v676_v30 = vpop.f32.mrb[12].mxu1 }
 0x113   :  { %902 = vst [vmem:[%s1985_s3 + $0x28] sm:$0xff] %v830_v27  ;;  %938 = vst [vmem:[%s1985_s3 + $0x148] sm:$0xff] %v866_v28  ;;  %v497_v31 = vadd.f32 %v1692_v44, %v496_v29  ;;  %v677_v32 = vadd.f32 %v1692_v44, %v676_v30  ;;  %v498_v33 = vpop.f32.mrb[13].mxu0  ;;  %v678_v34 = vpop.f32.mrb[13].mxu1 }
 0x115   :  { %v831_v35 = vmax.f32 %v497_v31, 0.0  ;;  %v867_v36 = vmax.f32 %v677_v32, 0.0 }
 0x116   :  { %v501_v37 = vpop.f32.mrb[14].mxu0  ;;  %v681_v38 = vpop.f32.mrb[14].mxu1 }
 0x117   :  { %903 = vst [vmem:[%s1985_s3 + $0x30] sm:$0xff] %v831_v35  ;;  %939 = vst [vmem:[%s1985_s3 + $0x150] sm:$0xff] %v867_v36  ;;  %v502_v39 = vadd.f32 %v1692_v44, %v501_v37  ;;  %v682_v40 = vadd.f32 %v1692_v44, %v681_v38  ;;  %v503_v41 = vpop.f32.mrb[15].mxu0  ;;  %v683_v42 = vpop.f32.mrb[15].mxu1 }
 0x119   :  { %v832_v43 = vmax.f32 %v502_v39, 0.0  ;;  %v868_v45 = vmax.f32 %v682_v40, 0.0 }
 0x11a   :  { %v506_v46 = vpop.f32.mrb[16].mxu0  ;;  %v686_v47 = vpop.f32.mrb[16].mxu1 }
 0x11b   :  { %904 = vst [vmem:[%s1985_s3 + $0x38] sm:$0xff] %v832_v43  ;;  %940 = vst [vmem:[%s1985_s3 + $0x158] sm:$0xff] %v868_v45  ;;  %v507_v48 = vadd.f32 %v1692_v44, %v506_v46  ;;  %v687_v49 = vadd.f32 %v1692_v44, %v686_v47  ;;  %v508_v50 = vpop.f32.mrb[17].mxu0  ;;  %v688_v51 = vpop.f32.mrb[17].mxu1 }
 0x11d   :  { %v833_v52 = vmax.f32 %v507_v48, 0.0  ;;  %v869_v53 = vmax.f32 %v687_v49, 0.0 }
 0x11e   :  { %v511_v54 = vpop.f32.mrb[18].mxu0  ;;  %v691_v55 = vpop.f32.mrb[18].mxu1 }
 0x11f   :  { %905 = vst [vmem:[%s1985_s3 + $0x40] sm:$0xff] %v833_v52  ;;  %941 = vst [vmem:[%s1985_s3 + $0x160] sm:$0xff] %v869_v53  ;;  %v512_v56 = vadd.f32 %v1692_v44, %v511_v54  ;;  %v692_v57 = vadd.f32 %v1692_v44, %v691_v55  ;;  %v513_v58 = vpop.f32.mrb[19].mxu0  ;;  %v693_v59 = vpop.f32.mrb[19].mxu1 }
 0x121   :  { %v834_v60 = vmax.f32 %v512_v56, 0.0  ;;  %v870_v61 = vmax.f32 %v692_v57, 0.0 }
 0x122   :  { %v516_v62 = vpop.f32.mrb[20].mxu0  ;;  %v696_v63 = vpop.f32.mrb[20].mxu1 }
 0x123   :  { %906 = vst [vmem:[%s1985_s3 + $0x48] sm:$0xff] %v834_v60  ;;  %942 = vst [vmem:[%s1985_s3 + $0x168] sm:$0xff] %v870_v61  ;;  %v517_v0 = vadd.f32 %v1692_v44, %v516_v62  ;;  %v697_v1 = vadd.f32 %v1692_v44, %v696_v63  ;;  %v518_v2 = vpop.f32.mrb[21].mxu0  ;;  %v698_v3 = vpop.f32.mrb[21].mxu1 }
 0x125   :  { %v835_v4 = vmax.f32 %v517_v0, 0.0  ;;  %v871_v5 = vmax.f32 %v697_v1, 0.0 }
 0x126   :  { %v521_v6 = vpop.f32.mrb[22].mxu0  ;;  %v701_v7 = vpop.f32.mrb[22].mxu1 }
 0x127   :  { %907 = vst [vmem:[%s1985_s3 + $0x50] sm:$0xff] %v835_v4  ;;  %943 = vst [vmem:[%s1985_s3 + $0x170] sm:$0xff] %v871_v5  ;;  %v522_v8 = vadd.f32 %v1692_v44, %v521_v6  ;;  %v702_v9 = vadd.f32 %v1692_v44, %v701_v7  ;;  %v523_v10 = vpop.f32.mrb[23].mxu0  ;;  %v703_v11 = vpop.f32.mrb[23].mxu1 }
 0x129   :  { %v836_v12 = vmax.f32 %v522_v8, 0.0  ;;  %v872_v13 = vmax.f32 %v702_v9, 0.0 }
 0x12a   :  { %v526_v14 = vpop.f32.mrb[24].mxu0  ;;  %v706_v15 = vpop.f32.mrb[24].mxu1 }
 0x12b   :  { %908 = vst [vmem:[%s1985_s3 + $0x58] sm:$0xff] %v836_v12  ;;  %944 = vst [vmem:[%s1985_s3 + $0x178] sm:$0xff] %v872_v13  ;;  %v527_v16 = vadd.f32 %v1692_v44, %v526_v14  ;;  %v707_v17 = vadd.f32 %v1692_v44, %v706_v15  ;;  %v528_v18 = vpop.f32.mrb[25].mxu0  ;;  %v708_v19 = vpop.f32.mrb[25].mxu1 }
 0x12d   :  { %v837_v20 = vmax.f32 %v527_v16, 0.0  ;;  %v873_v21 = vmax.f32 %v707_v17, 0.0 }
 0x12e   :  { %v531_v22 = vpop.f32.mrb[26].mxu0  ;;  %v711_v23 = vpop.f32.mrb[26].mxu1 }
 0x12f   :  { %909 = vst [vmem:[%s1985_s3 + $0x60] sm:$0xff] %v837_v20  ;;  %945 = vst [vmem:[%s1985_s3 + $0x180] sm:$0xff] %v873_v21  ;;  %v532_v24 = vadd.f32 %v1692_v44, %v531_v22  ;;  %v712_v25 = vadd.f32 %v1692_v44, %v711_v23  ;;  %v533_v26 = vpop.f32.mrb[27].mxu0  ;;  %v713_v27 = vpop.f32.mrb[27].mxu1 }
 0x131   :  { %v838_v28 = vmax.f32 %v532_v24, 0.0  ;;  %v874_v29 = vmax.f32 %v712_v25, 0.0 }
 0x132   :  { %v536_v30 = vpop.f32.mrb[28].mxu0  ;;  %v716_v31 = vpop.f32.mrb[28].mxu1 }
 0x133   :  { %910 = vst [vmem:[%s1985_s3 + $0x68] sm:$0xff] %v838_v28  ;;  %946 = vst [vmem:[%s1985_s3 + $0x188] sm:$0xff] %v874_v29  ;;  %v537_v32 = vadd.f32 %v1692_v44, %v536_v30  ;;  %v717_v33 = vadd.f32 %v1692_v44, %v716_v31  ;;  %v538_v34 = vpop.f32.mrb[29].mxu0  ;;  %v718_v35 = vpop.f32.mrb[29].mxu1 }
 0x135   :  { %v839_v36 = vmax.f32 %v537_v32, 0.0  ;;  %v875_v37 = vmax.f32 %v717_v33, 0.0 }
 0x136   :  { %v541_v38 = vpop.f32.mrb[30].mxu0  ;;  %v721_v39 = vpop.f32.mrb[30].mxu1 }
 0x137   :  { %911 = vst [vmem:[%s1985_s3 + $0x70] sm:$0xff] %v839_v36  ;;  %947 = vst [vmem:[%s1985_s3 + $0x190] sm:$0xff] %v875_v37  ;;  %v542_v40 = vadd.f32 %v1692_v44, %v541_v38  ;;  %v722_v41 = vadd.f32 %v1692_v44, %v721_v39  ;;  %v543_v42 = vpop.f32.mrb[31].mxu0  ;;  %v723_v43 = vpop.f32.mrb[31].mxu1 }
 0x139   :  { %v840_v45 = vmax.f32 %v542_v40, 0.0  ;;  %v876_v46 = vmax.f32 %v722_v41, 0.0 }
 0x13a   :  { %v546_v47 = vpop.f32.mrb[32].mxu0  ;;  %v726_v48 = vpop.f32.mrb[32].mxu1 }
 0x13b   :  { %912 = vst [vmem:[%s1985_s3 + $0x78] sm:$0xff] %v840_v45  ;;  %948 = vst [vmem:[%s1985_s3 + $0x198] sm:$0xff] %v876_v46  ;;  %v547_v49 = vadd.f32 %v1692_v44, %v546_v47  ;;  %v727_v50 = vadd.f32 %v1692_v44, %v726_v48  ;;  %v548_v51 = vpop.f32.mrb[33].mxu0  ;;  %v728_v52 = vpop.f32.mrb[33].mxu1 }
 0x13d   :  { %v841_v53 = vmax.f32 %v547_v49, 0.0  ;;  %v877_v54 = vmax.f32 %v727_v50, 0.0 }
 0x13e   :  { %v551_v55 = vpop.f32.mrb[34].mxu0  ;;  %v731_v56 = vpop.f32.mrb[34].mxu1 }
 0x13f   :  { %913 = vst [vmem:[%s1985_s3 + $0x80] sm:$0xff] %v841_v53  ;;  %949 = vst [vmem:[%s1985_s3 + $0x1a0] sm:$0xff] %v877_v54  ;;  %v552_v57 = vadd.f32 %v1692_v44, %v551_v55  ;;  %v732_v58 = vadd.f32 %v1692_v44, %v731_v56  ;;  %v553_v59 = vpop.f32.mrb[35].mxu0  ;;  %v733_v60 = vpop.f32.mrb[35].mxu1 }
 0x141   :  { %v842_v61 = vmax.f32 %v552_v57, 0.0  ;;  %v878_v62 = vmax.f32 %v732_v58, 0.0 }
 0x142   :  { %v556_v63 = vpop.f32.mrb[36].mxu0  ;;  %v736_v0 = vpop.f32.mrb[36].mxu1 }
 0x143   :  { %914 = vst [vmem:[%s1985_s3 + $0x88] sm:$0xff] %v842_v61  ;;  %950 = vst [vmem:[%s1985_s3 + $0x1a8] sm:$0xff] %v878_v62  ;;  %v557_v1 = vadd.f32 %v1692_v44, %v556_v63  ;;  %v737_v2 = vadd.f32 %v1692_v44, %v736_v0  ;;  %v558_v3 = vpop.f32.mrb[37].mxu0  ;;  %v738_v4 = vpop.f32.mrb[37].mxu1 }
 0x145   :  { %v843_v5 = vmax.f32 %v557_v1, 0.0  ;;  %v879_v6 = vmax.f32 %v737_v2, 0.0 }
 0x146   :  { %v561_v7 = vpop.f32.mrb[38].mxu0  ;;  %v741_v8 = vpop.f32.mrb[38].mxu1 }
 0x147   :  { %915 = vst [vmem:[%s1985_s3 + $0x90] sm:$0xff] %v843_v5  ;;  %951 = vst [vmem:[%s1985_s3 + $0x1b0] sm:$0xff] %v879_v6  ;;  %v562_v9 = vadd.f32 %v1692_v44, %v561_v7  ;;  %v742_v10 = vadd.f32 %v1692_v44, %v741_v8  ;;  %v563_v11 = vpop.f32.mrb[39].mxu0  ;;  %v743_v12 = vpop.f32.mrb[39].mxu1 }
 0x149   :  { %v844_v13 = vmax.f32 %v562_v9, 0.0  ;;  %v880_v14 = vmax.f32 %v742_v10, 0.0 }
 0x14a   :  { %v566_v15 = vpop.f32.mrb[40].mxu0  ;;  %v746_v16 = vpop.f32.mrb[40].mxu1 }
 0x14b   :  { %916 = vst [vmem:[%s1985_s3 + $0x98] sm:$0xff] %v844_v13  ;;  %952 = vst [vmem:[%s1985_s3 + $0x1b8] sm:$0xff] %v880_v14  ;;  %v567_v17 = vadd.f32 %v1692_v44, %v566_v15  ;;  %v747_v18 = vadd.f32 %v1692_v44, %v746_v16  ;;  %v568_v19 = vpop.f32.mrb[41].mxu0  ;;  %v748_v20 = vpop.f32.mrb[41].mxu1 }
 0x14d   :  { %v845_v21 = vmax.f32 %v567_v17, 0.0  ;;  %v881_v22 = vmax.f32 %v747_v18, 0.0 }
 0x14e   :  { %v571_v23 = vpop.f32.mrb[42].mxu0  ;;  %v751_v24 = vpop.f32.mrb[42].mxu1 }
 0x14f   :  { %917 = vst [vmem:[%s1985_s3 + $0xa0] sm:$0xff] %v845_v21  ;;  %953 = vst [vmem:[%s1985_s3 + $0x1c0] sm:$0xff] %v881_v22  ;;  %v572_v25 = vadd.f32 %v1692_v44, %v571_v23  ;;  %v752_v26 = vadd.f32 %v1692_v44, %v751_v24  ;;  %v573_v27 = vpop.f32.mrb[43].mxu0  ;;  %v753_v28 = vpop.f32.mrb[43].mxu1 }
 0x151   :  { %v846_v29 = vmax.f32 %v572_v25, 0.0  ;;  %v882_v30 = vmax.f32 %v752_v26, 0.0 }
 0x152   :  { %v576_v31 = vpop.f32.mrb[44].mxu0  ;;  %v756_v32 = vpop.f32.mrb[44].mxu1 }
 0x153   :  { %918 = vst [vmem:[%s1985_s3 + $0xa8] sm:$0xff] %v846_v29  ;;  %954 = vst [vmem:[%s1985_s3 + $0x1c8] sm:$0xff] %v882_v30  ;;  %v577_v33 = vadd.f32 %v1692_v44, %v576_v31  ;;  %v757_v34 = vadd.f32 %v1692_v44, %v756_v32  ;;  %v578_v35 = vpop.f32.mrb[45].mxu0  ;;  %v758_v36 = vpop.f32.mrb[45].mxu1 }
 0x155   :  { %v847_v37 = vmax.f32 %v577_v33, 0.0  ;;  %v883_v38 = vmax.f32 %v757_v34, 0.0 }
 0x156   :  { %v581_v39 = vpop.f32.mrb[46].mxu0  ;;  %v761_v40 = vpop.f32.mrb[46].mxu1 }
 0x157   :  { %919 = vst [vmem:[%s1985_s3 + $0xb0] sm:$0xff] %v847_v37  ;;  %955 = vst [vmem:[%s1985_s3 + $0x1d0] sm:$0xff] %v883_v38  ;;  %v582_v41 = vadd.f32 %v1692_v44, %v581_v39  ;;  %v762_v42 = vadd.f32 %v1692_v44, %v761_v40  ;;  %v583_v43 = vpop.f32.mrb[47].mxu0  ;;  %v763_v45 = vpop.f32.mrb[47].mxu1 }
 0x159   :  { %v848_v46 = vmax.f32 %v582_v41, 0.0  ;;  %v884_v47 = vmax.f32 %v762_v42, 0.0 }
 0x15a   :  { %v586_v48 = vpop.f32.mrb[48].mxu0  ;;  %v766_v49 = vpop.f32.mrb[48].mxu1 }
 0x15b   :  { %920 = vst [vmem:[%s1985_s3 + $0xb8] sm:$0xff] %v848_v46  ;;  %956 = vst [vmem:[%s1985_s3 + $0x1d8] sm:$0xff] %v884_v47  ;;  %v587_v50 = vadd.f32 %v1692_v44, %v586_v48  ;;  %v767_v51 = vadd.f32 %v1692_v44, %v766_v49  ;;  %v588_v52 = vpop.f32.mrb[49].mxu0  ;;  %v768_v53 = vpop.f32.mrb[49].mxu1 }
 0x15d   :  { %v849_v54 = vmax.f32 %v587_v50, 0.0  ;;  %v885_v55 = vmax.f32 %v767_v51, 0.0 }
 0x15e   :  { %v591_v56 = vpop.f32.mrb[50].mxu0  ;;  %v771_v57 = vpop.f32.mrb[50].mxu1 }
 0x15f   :  { %921 = vst [vmem:[%s1985_s3 + $0xc0] sm:$0xff] %v849_v54  ;;  %957 = vst [vmem:[%s1985_s3 + $0x1e0] sm:$0xff] %v885_v55  ;;  %v592_v58 = vadd.f32 %v1692_v44, %v591_v56  ;;  %v772_v59 = vadd.f32 %v1692_v44, %v771_v57  ;;  %v593_v60 = vpop.f32.mrb[51].mxu0  ;;  %v773_v61 = vpop.f32.mrb[51].mxu1 }
 0x161   :  { %v850_v62 = vmax.f32 %v592_v58, 0.0  ;;  %v886_v63 = vmax.f32 %v772_v59, 0.0 }
 0x162   :  { %v596_v0 = vpop.f32.mrb[52].mxu0  ;;  %v776_v1 = vpop.f32.mrb[52].mxu1 }
 0x163   :  { %922 = vst [vmem:[%s1985_s3 + $0xc8] sm:$0xff] %v850_v62  ;;  %958 = vst [vmem:[%s1985_s3 + $0x1e8] sm:$0xff] %v886_v63  ;;  %v597_v2 = vadd.f32 %v1692_v44, %v596_v0  ;;  %v777_v3 = vadd.f32 %v1692_v44, %v776_v1  ;;  %v598_v4 = vpop.f32.mrb[53].mxu0  ;;  %v778_v5 = vpop.f32.mrb[53].mxu1 }
 0x165   :  { %v851_v6 = vmax.f32 %v597_v2, 0.0  ;;  %v887_v7 = vmax.f32 %v777_v3, 0.0 }
 0x166   :  { %v601_v8 = vpop.f32.mrb[54].mxu0  ;;  %v781_v9 = vpop.f32.mrb[54].mxu1 }
 0x167   :  { %923 = vst [vmem:[%s1985_s3 + $0xd0] sm:$0xff] %v851_v6  ;;  %959 = vst [vmem:[%s1985_s3 + $0x1f0] sm:$0xff] %v887_v7  ;;  %v602_v10 = vadd.f32 %v1692_v44, %v601_v8  ;;  %v782_v11 = vadd.f32 %v1692_v44, %v781_v9  ;;  %v603_v12 = vpop.f32.mrb[55].mxu0  ;;  %v783_v13 = vpop.f32.mrb[55].mxu1 }
 0x169   :  { %v852_v14 = vmax.f32 %v602_v10, 0.0  ;;  %v888_v15 = vmax.f32 %v782_v11, 0.0 }
 0x16a   :  { %v606_v16 = vpop.f32.mrb[56].mxu0  ;;  %v786_v17 = vpop.f32.mrb[56].mxu1 }
 0x16b   :  { %924 = vst [vmem:[%s1985_s3 + $0xd8] sm:$0xff] %v852_v14  ;;  %960 = vst [vmem:[%s1985_s3 + $0x1f8] sm:$0xff] %v888_v15  ;;  %v607_v18 = vadd.f32 %v1692_v44, %v606_v16  ;;  %v787_v19 = vadd.f32 %v1692_v44, %v786_v17  ;;  %v608_v20 = vpop.f32.mrb[57].mxu0  ;;  %v788_v21 = vpop.f32.mrb[57].mxu1 }
 0x16d   :  { %v853_v22 = vmax.f32 %v607_v18, 0.0  ;;  %v889_v23 = vmax.f32 %v787_v19, 0.0 }
 0x16e   :  { %v611_v24 = vpop.f32.mrb[58].mxu0  ;;  %v791_v25 = vpop.f32.mrb[58].mxu1 }
 0x16f   :  { %925 = vst [vmem:[%s1985_s3 + $0xe0] sm:$0xff] %v853_v22  ;;  %961 = vst [vmem:[%s1985_s3 + $0x200] sm:$0xff] %v889_v23  ;;  %v612_v26 = vadd.f32 %v1692_v44, %v611_v24  ;;  %v792_v27 = vadd.f32 %v1692_v44, %v791_v25  ;;  %v613_v28 = vpop.f32.mrb[59].mxu0  ;;  %v793_v29 = vpop.f32.mrb[59].mxu1 }
 0x171   :  { %v854_v30 = vmax.f32 %v612_v26, 0.0  ;;  %v890_v31 = vmax.f32 %v792_v27, 0.0 }
 0x172   :  { %v616_v32 = vpop.f32.mrb[60].mxu0  ;;  %v796_v33 = vpop.f32.mrb[60].mxu1 }
 0x173   :  { %926 = vst [vmem:[%s1985_s3 + $0xe8] sm:$0xff] %v854_v30  ;;  %962 = vst [vmem:[%s1985_s3 + $0x208] sm:$0xff] %v890_v31  ;;  %v617_v34 = vadd.f32 %v1692_v44, %v616_v32  ;;  %v797_v35 = vadd.f32 %v1692_v44, %v796_v33  ;;  %v618_v36 = vpop.f32.mrb[61].mxu0  ;;  %v798_v37 = vpop.f32.mrb[61].mxu1 }
 0x175   :  { %v855_v38 = vmax.f32 %v617_v34, 0.0  ;;  %v891_v39 = vmax.f32 %v797_v35, 0.0 }
 0x176   :  { %v621_v40 = vpop.f32.mrb[62].mxu0  ;;  %v801_v41 = vpop.f32.mrb[62].mxu1 }
 0x177   :  { %927 = vst [vmem:[%s1985_s3 + $0xf0] sm:$0xff] %v855_v38  ;;  %963 = vst [vmem:[%s1985_s3 + $0x210] sm:$0xff] %v891_v39  ;;  %v622_v42 = vadd.f32 %v1692_v44, %v621_v40  ;;  %v802_v43 = vadd.f32 %v1692_v44, %v801_v41  ;;  %v623_v45 = vpop.f32.mrb[63].mxu0  ;;  %v803_v46 = vpop.f32.mrb[63].mxu1 }
 0x179   :  { %v856_v47 = vmax.f32 %v622_v42, 0.0  ;;  %v892_v48 = vmax.f32 %v802_v43, 0.0 }
 0x17a   :  { %v626_v49 = vpop.f32.mrb[64].mxu0  ;;  %v806_v50 = vpop.f32.mrb[64].mxu1 }
 0x17b   :  { %928 = vst [vmem:[%s1985_s3 + $0xf8] sm:$0xff] %v856_v47  ;;  %964 = vst [vmem:[%s1985_s3 + $0x218] sm:$0xff] %v892_v48  ;;  %v627_v51 = vadd.f32 %v1692_v44, %v626_v49  ;;  %v807_v52 = vadd.f32 %v1692_v44, %v806_v50  ;;  %v628_v53 = vpop.f32.mrb[65].mxu0  ;;  %v808_v54 = vpop.f32.mrb[65].mxu1 }
 0x17d   :  { %v857_v55 = vmax.f32 %v627_v51, 0.0  ;;  %v893_v56 = vmax.f32 %v807_v52, 0.0 }
 0x17e   :  { %v631_v57 = vpop.f32.mrb[66].mxu0  ;;  %v811_v58 = vpop.f32.mrb[66].mxu1 }
 0x17f   :  { %929 = vst [vmem:[%s1985_s3 + $0x100] sm:$0xff] %v857_v55  ;;  %965 = vst [vmem:[%s1985_s3 + $0x220] sm:$0xff] %v893_v56  ;;  %v632_v59 = vadd.f32 %v1692_v44, %v631_v57  ;;  %v812_v60 = vadd.f32 %v1692_v44, %v811_v58  ;;  %v633_v61 = vpop.f32.mrb[67].mxu0  ;;  %v813_v62 = vpop.f32.mrb[67].mxu1 }
 0x181   :  { %v858_v63 = vmax.f32 %v632_v59, 0.0  ;;  %v894_v0 = vmax.f32 %v812_v60, 0.0 }
 0x182   :  { %v636_v1 = vpop.f32.mrb[68].mxu0  ;;  %v816_v2 = vpop.f32.mrb[68].mxu1 }
 0x183   :  { %930 = vst [vmem:[%s1985_s3 + $0x108] sm:$0xff] %v858_v63  ;;  %966 = vst [vmem:[%s1985_s3 + $0x228] sm:$0xff] %v894_v0  ;;  %v637_v3 = vadd.f32 %v1692_v44, %v636_v1  ;;  %v817_v4 = vadd.f32 %v1692_v44, %v816_v2  ;;  %v638_v5 = vpop.f32.mrb[69].mxu0  ;;  %v818_v6 = vpop.f32.mrb[69].mxu1 }
 0x185   :  { %v859_v7 = vmax.f32 %v637_v3, 0.0  ;;  %v895_v8 = vmax.f32 %v817_v4, 0.0 }
 0x186   :  { %v641_v9 = vpop.f32.mrb[70].mxu0  ;;  %v821_v10 = vpop.f32.mrb[70].mxu1 }
 0x187   :  { %931 = vst [vmem:[%s1985_s3 + $0x110] sm:$0xff] %v859_v7  ;;  %967 = vst [vmem:[%s1985_s3 + $0x230] sm:$0xff] %v895_v8  ;;  %v642_v11 = vadd.f32 %v1692_v44, %v641_v9  ;;  %v822_v12 = vadd.f32 %v1692_v44, %v821_v10  ;;  %v643_v13 = vpop.f32.mrb[71].mxu0  ;;  %v823_v14 = vpop.f32.mrb[71].mxu1 }
 0x189   :  { %v860_v15 = vmax.f32 %v642_v11, 0.0  ;;  %v896_v16 = vmax.f32 %v822_v12, 0.0 }
 0x18b   :  { %932 = vst [vmem:[%s1985_s3 + $0x118] sm:$0xff] %v860_v15  ;;  %968 = vst [vmem:[%s1985_s3 + $0x238] sm:$0xff] %v896_v16 }

</bundles_post_ra>
